<compile_context>
chip_gen: v5e
topology: v5e:2x2
jax: 0.10.0
libtpu: 0.0.40
codegen_flags: <defaults>
</compile_context>

<pallas_src>
import functools

import jax
import jax.numpy as jnp
from jax.experimental import pallas as pl
from jax.experimental.pallas import tpu as pltpu


# ------------------------------ fused kernel ---------------------------------
def _crosspath_kernel(x1_ref, x2_ref, sg_ref, wp_ref, wkv_ref, we_ref,
                      rows_ref, mask_ref, o1_ref, o2_ref, y3_ref,
                      *, n_tokens, bb, eps):
    M, C = x1_ref.shape          # M = bb * n_tokens
    N = n_tokens

    def mm(a_bf16, w_bf16):
        # bf16 operands on the MXU, f32 accumulation.
        return jnp.dot(a_bf16, w_bf16, preferred_element_type=jnp.float32)

    rows = rows_ref[...]         # (16, C) f32 -- 2 vregs, packed bias/g/b rows.
    # rows: 0=bp1 1=bp2 2=bp3 3=be1 4=be2 5=g1 6=b1 7=g2 8=b2

    # Shared query projection (channel_proj3 + ReLU).  Parked in a bf16 VMEM
    # scratch so it does not occupy vregs across both paths.
    y3 = jnp.maximum(
        mm(sg_ref[...].astype(jnp.bfloat16), wp_ref[:, 2 * C:3 * C]) + rows[2:3, :],
        0.0)
    y3_ref[...] = y3.astype(jnp.bfloat16)

    def run_path(x_ref, p, o_ref):
        # p = 0 -> path 1 (x1, wp1, wkv1, we1, norm1); p = 1 -> path 2.
        # channel_proj + ReLU (only the used y-chunk; the u-chunk is dead in
        # the reference forward).
        y = jnp.maximum(
            mm(x_ref[...].astype(jnp.bfloat16), wp_ref[:, p * C:(p + 1) * C])
            + rows[p:p + 1, :], 0.0).astype(jnp.bfloat16)
        # kv projection (bias-free Linear); attention scale already folded
        # into the K columns of the packed weight.  Heads occupy contiguous
        # d-column groups (matches torch reshape(B,N,2,H,d)).
        kv = mm(y, wkv_ref[:, 2 * p * C:2 * (p + 1) * C]).astype(jnp.bfloat16)

        zs = []
        for b in range(bb):                      # static, tiny loop
            k = kv[b * N:(b + 1) * N, :C]
            v = kv[b * N:(b + 1) * N, C:]
            # Block-diagonal (C, C) context: block (h, h) = k_h^T @ v_h.  One
            # dense 128-lane MXU matmul instead of H tiny masked ones.
            # TODO(synk): verify via pl.lower_as_mlir that the transposed-LHS
            # dot lowers to an XLU vxpose and not a materialized VMEM copy.
            s = jax.lax.dot_general(k, v, (((0,), (0,)), ((), ())),
                                    preferred_element_type=jnp.float32)
            s = s + mask_ref[...]                # additive 0 / -1e30 head mask
            s = s - jnp.max(s, axis=0, keepdims=True)     # softmax over dim=-2
            pexp = jnp.exp(s)                    # off-head entries -> exactly 0
            denom = jnp.sum(pexp, axis=0, keepdims=True)
            ctx = (pexp * pl.reciprocal(denom, approx=True)).astype(jnp.bfloat16)
            # q3 @ ctx for all heads at once; heads land back in contiguous
            # column groups (== permute(0,2,1,3).reshape(B,N,C)).
            zs.append(mm(y3_ref[b * N:(b + 1) * N, :], ctx))
        z = zs[0] if bb == 1 else jnp.concatenate(zs, axis=0)     # (M, C) f32

        # end_proj + residual (x re-read HERE, not held across attention) + LN.
        v_out = (x_ref[...]
                 + mm(z.astype(jnp.bfloat16), we_ref[:, p * C:(p + 1) * C])
                 + rows[3 + p:4 + p, :])
        mu = jnp.mean(v_out, axis=-1, keepdims=True)
        var = jnp.mean(jnp.square(v_out - mu), axis=-1, keepdims=True)
        nrm = (v_out - mu) * jax.lax.rsqrt(var + eps)
        out = nrm * rows[5 + 2 * p:6 + 2 * p, :] + rows[6 + 2 * p:7 + 2 * p, :]
        o_ref[...] = out.astype(o_ref.dtype)

    # Path 1 completely, then path 2 (sequenced -> no interleaved live ranges;
    # the o1 writeback overlaps path-2 compute).
    run_path(x1_ref, 0, o1_ref)
    run_path(x2_ref, 1, o2_ref)


# --------------------------------- wrapper -----------------------------------
def crosspath_s_forward(x1, x2, segfeature, params, *, num_heads=8, eps=1e-5,
                        batch_block=None, out_dtype=jnp.float32):
    """CrossPath_S.forward (reduction=1).  x*, segfeature: (B, N, dim)."""
    B, N, C = x1.shape
    assert C % num_heads == 0
    d = C // num_heads
    scale = d ** -0.5

    if batch_block is None:
        # Default keeps >= 2 parallel grid steps (both v7x TCs busy).  On
        # single-TC v5e/v6e pass batch_block > 1 to cut fixed per-step cost.
        batch_block = 1
    bb = batch_block
    assert B % bb == 0
    M = bb * N

    f32, bf16 = jnp.float32, jnp.bfloat16

    # torch Linear stores W as (out, in); the kernel consumes W.T = (in, out).
    # Only the first C output columns of channel_proj are used (u* chunks dead).
    wp = jnp.concatenate([params['wp1'][:C].T, params['wp2'][:C].T,
                          params['wp3'][:C].T], axis=1).astype(bf16)   # (C, 3C)

    def kv_w(w):                                 # fold scale into K columns
        wt = w.T                                 # (C, 2C): [:, :C]=K, [:, C:]=V
        return jnp.concatenate([wt[:, :C] * scale, wt[:, C:]], axis=1)
    wkv = jnp.concatenate([kv_w(params['wkv1']), kv_w(params['wkv2'])],
                          axis=1).astype(bf16)                         # (C, 4C)
    we = jnp.concatenate([params['we1'].T, params['we2'].T],
                         axis=1).astype(bf16)                          # (C, 2C)

    # All nine (C,) row vectors in ONE (16, C) f32 slab (one DMA instead of 9;
    # each (1,C) block would pad to a full (8,128) VMEM tile anyway).
    row_vals = jnp.stack([params['bp1'][:C], params['bp2'][:C], params['bp3'][:C],
                          params['be1'], params['be2'],
                          params['g1'], params['b1'],
                          params['g2'], params['b2']], axis=0).astype(f32)
    rows = jnp.zeros((16, C), f32).at[:9].set(row_vals)

    # Additive block-diagonal head mask, precomputed once (f32 so exp -> 0).
    head = jnp.arange(C) // d
    neg_mask = jnp.where(head[:, None] == head[None, :], 0.0, -1e30).astype(f32)

    # Flatten (B, N, C) -> (B*N, C) in the wrapper (metadata-only) so the
    # kernel's token-wise matmuls need no in-kernel reshape.
    x1f = x1.reshape(B * N, C).astype(f32)
    x2f = x2.reshape(B * N, C).astype(f32)
    sgf = segfeature.reshape(B * N, C).astype(f32)

    tok = lambda: pl.BlockSpec((M, C), lambda i: (i, 0))
    full = lambda shape: pl.BlockSpec(shape, lambda i: (0, 0))

    kern = functools.partial(_crosspath_kernel, n_tokens=N, bb=bb, eps=eps)
    out1, out2 = pl.pallas_call(
        kern,
        grid=(B // bb,),
        in_specs=[tok(), tok(), tok(),
                  full((C, 3 * C)), full((C, 4 * C)), full((C, 2 * C)),
                  full((16, C)), full((C, C))],
        out_specs=[tok(), tok()],
        out_shape=[jax.ShapeDtypeStruct((B * N, C), out_dtype),
                   jax.ShapeDtypeStruct((B * N, C), out_dtype)],
        scratch_shapes=[pltpu.VMEM((M, C), bf16)],      # shared y3 parking spot
        compiler_params=pltpu.CompilerParams(
            dimension_semantics=("parallel",),
            vmem_limit_bytes=32 * 1024 * 1024),
    )(x1f, x2f, sgf, wp, wkv, we, rows, neg_mask)
    return out1.reshape(B, N, C), out2.reshape(B, N, C)


# --------------------------- pure-JAX reference -------------------------------
def crosspath_s_reference(x1, x2, segfeature, params, *, num_heads=8, eps=1e-5):
    def linear(x, w, b=None):
        y = jnp.einsum('bnc,oc->bno', x, w)
        return y if b is None else y + b

    B, N, C = x1.shape
    H, d = num_heads, C // num_heads
    scale = d ** -0.5

    y1 = jax.nn.relu(linear(x1, params['wp1'], params['bp1']))[..., :C]
    y2 = jax.nn.relu(linear(x2, params['wp2'], params['bp2']))[..., :C]
    y3 = jax.nn.relu(linear(segfeature, params['wp3'], params['bp3']))[..., :C]

    def split_kv(y, w):
        kv = linear(y, w).reshape(B, N, 2, H, d).transpose(2, 0, 3, 1, 4)
        return kv[0], kv[1]                                   # (B, H, N, d)

    k1, v1 = split_kv(y1, params['wkv1'])
    k2, v2 = split_kv(y2, params['wkv2'])
    q = y3.reshape(B, N, H, d).transpose(0, 2, 1, 3)

    def attend(k, v):
        ctx = jnp.einsum('bhnd,bhne->bhde', k, v) * scale
        ctx = jax.nn.softmax(ctx, axis=-2)
        z = jnp.einsum('bhnd,bhde->bhne', q, ctx)
        return z.transpose(0, 2, 1, 3).reshape(B, N, C)

    z1, z2 = attend(k1, v1), attend(k2, v2)

    def ln(v, g, b):
        mu = v.mean(-1, keepdims=True)
        var = ((v - mu) ** 2).mean(-1, keepdims=True)
        return (v - mu) / jnp.sqrt(var + eps) * g + b

    o1 = ln(x1 + linear(z1, params['we1'], params['be1']), params['g1'], params['b1'])
    o2 = ln(x2 + linear(z2, params['we2'], params['be2']), params['g2'], params['b2'])
    return o1, o2


# ------------------------------------ main ------------------------------------
if __name__ == "__main__":
    DIM, NUM_HEADS = 128, 8
    B, N = 2, 128

    key = jax.random.PRNGKey(0)
    keys = jax.random.split(key, 16)
    std = 0.05
    params = dict(
        wp1=jax.random.normal(keys[0], (2 * DIM, DIM), jnp.float32) * std,
        bp1=jax.random.normal(keys[1], (2 * DIM,), jnp.float32) * std,
        wp2=jax.random.normal(keys[2], (2 * DIM, DIM), jnp.float32) * std,
        bp2=jax.random.normal(keys[3], (2 * DIM,), jnp.float32) * std,
        wp3=jax.random.normal(keys[4], (2 * DIM, DIM), jnp.float32) * std,
        bp3=jax.random.normal(keys[5], (2 * DIM,), jnp.float32) * std,
        wkv1=jax.random.normal(keys[6], (2 * DIM, DIM), jnp.float32) * std,
        wkv2=jax.random.normal(keys[7], (2 * DIM, DIM), jnp.float32) * std,
        we1=jax.random.normal(keys[8], (DIM, DIM), jnp.float32) * std,
        be1=jax.random.normal(keys[9], (DIM,), jnp.float32) * std,
        we2=jax.random.normal(keys[10], (DIM, DIM), jnp.float32) * std,
        be2=jax.random.normal(keys[11], (DIM,), jnp.float32) * std,
        g1=jnp.ones((DIM,), jnp.float32),
        b1=jnp.zeros((DIM,), jnp.float32),
        g2=jnp.ones((DIM,), jnp.float32),
        b2=jnp.zeros((DIM,), jnp.float32),
    )
    xk = jax.random.split(keys[12], 3)
    x1 = jax.random.normal(xk[0], (B, N, DIM), jnp.float32)
    x2 = jax.random.normal(xk[1], (B, N, DIM), jnp.float32)
    seg = jax.random.normal(xk[2], (B, N, DIM), jnp.float32)

    r1, r2 = crosspath_s_reference(x1, x2, seg, params, num_heads=NUM_HEADS)

    # Default path: batch_block=1 -> grid=(2,) "parallel" (both v7x TCs busy).
    out1, out2 = crosspath_s_forward(x1, x2, seg, params, num_heads=NUM_HEADS)
    out1, out2 = jax.block_until_ready((out1, out2))
    assert out1.shape == (B, N, DIM) and out2.shape == (B, N, DIM)
    assert bool(jnp.all(jnp.isfinite(out1))) and bool(jnp.all(jnp.isfinite(out2)))
    err = max(float(jnp.max(jnp.abs(out1 - r1))),
              float(jnp.max(jnp.abs(out2 - r2))))
    assert err < 0.25, err

    # Batch-blocked path (bb=2 -> single grid step with (256, C) flattened
    # token matmuls; preferred on single-TC v5e/v6e).
    b1, b2 = crosspath_s_forward(x1, x2, seg, params, num_heads=NUM_HEADS,
                                 batch_block=2)
    b1, b2 = jax.block_until_ready((b1, b2))
    err_bb = max(float(jnp.max(jnp.abs(b1 - r1))),
                 float(jnp.max(jnp.abs(b2 - r2))))
    assert err_bb < 0.25, err_bb

    print("KERNEL_OK")
</pallas_src>

<mosaic_0001>
module attributes {stable_mosaic.version = 11 : i64} {
  func.func @_crosspath_kernel(%arg0: i32, %arg1: memref<128x128xf32, #tpu.memory_space<vmem>>, %arg2: memref<128x128xf32, #tpu.memory_space<vmem>>, %arg3: memref<128x128xf32, #tpu.memory_space<vmem>>, %arg4: memref<128x384xbf16, #tpu.memory_space<vmem>>, %arg5: memref<128x512xbf16, #tpu.memory_space<vmem>>, %arg6: memref<128x256xbf16, #tpu.memory_space<vmem>>, %arg7: memref<16x128xf32, #tpu.memory_space<vmem>>, %arg8: memref<128x128xf32, #tpu.memory_space<vmem>>, %arg9: memref<128x128xf32, #tpu.memory_space<vmem>>, %arg10: memref<128x128xf32, #tpu.memory_space<vmem>>, %arg11: memref<128x128xbf16, #tpu.memory_space<vmem>>) attributes {dimension_semantics = [#tpu.dimension_semantics<parallel>], iteration_bounds = array<i64: 2>, scalar_prefetch = 0 : i64, scratch_operands = 1 : i64, tpu.core_type = #tpu.core_type<tc>, window_params = [{transform_indices = @transform_0, window_bounds = array<i64: 128, 128>}, {transform_indices = @transform_1, window_bounds = array<i64: 128, 128>}, {transform_indices = @transform_2, window_bounds = array<i64: 128, 128>}, {pipeline_mode = #tpu.pipeline_mode<synchronous>, transform_indices = @transform_3, window_bounds = array<i64: 128, 384>}, {pipeline_mode = #tpu.pipeline_mode<synchronous>, transform_indices = @transform_4, window_bounds = array<i64: 128, 512>}, {pipeline_mode = #tpu.pipeline_mode<synchronous>, transform_indices = @transform_5, window_bounds = array<i64: 128, 256>}, {pipeline_mode = #tpu.pipeline_mode<synchronous>, transform_indices = @transform_6, window_bounds = array<i64: 16, 128>}, {pipeline_mode = #tpu.pipeline_mode<synchronous>, transform_indices = @transform_7, window_bounds = array<i64: 128, 128>}, {transform_indices = @transform_8, window_bounds = array<i64: 128, 128>}, {transform_indices = @transform_9, window_bounds = array<i64: 128, 128>}]} {
    %c0 = arith.constant 0 : index
    %c0_0 = arith.constant 0 : index
    %0 = vector.load %arg7[%c0, %c0_0] : memref<16x128xf32, #tpu.memory_space<vmem>>, vector<16x128xf32>
    %c0_1 = arith.constant 0 : index
    %c0_2 = arith.constant 0 : index
    %1 = vector.load %arg3[%c0_1, %c0_2] : memref<128x128xf32, #tpu.memory_space<vmem>>, vector<128x128xf32>
    %2 = arith.truncf %1 : vector<128x128xf32> to vector<128x128xbf16>
    %c0_3 = arith.constant 0 : index
    %c256 = arith.constant 256 : index
    %3 = vector.load %arg4[%c0_3, %c256] : memref<128x384xbf16, #tpu.memory_space<vmem>>, vector<128x128xbf16>
    %cst = arith.constant dense<0.000000e+00> : vector<128x128xf32>
    %4 = tpu.matmul %2, %3, %cst {dimension_numbers = #tpu.dot_dimension_numbers<[1], [0], [0], [1], [0, 0, 1, 1], [], []>} : vector<128x128xbf16>, vector<128x128xbf16>, vector<128x128xf32> -> vector<128x128xf32>
    %5 = vector.extract_strided_slice %0 {offsets = [2, 0], sizes = [1, 128], strides = [1, 1]} : vector<16x128xf32> to vector<1x128xf32>
    %6 = vector.broadcast %5 : vector<1x128xf32> to vector<128x128xf32>
    %7 = arith.addf %4, %6 : vector<128x128xf32>
    %cst_4 = arith.constant 0.000000e+00 : f32
    %8 = vector.broadcast %cst_4 : f32 to vector<128x128xf32>
    %9 = arith.maximumf %7, %8 : vector<128x128xf32>
    %10 = arith.truncf %9 : vector<128x128xf32> to vector<128x128xbf16>
    %c0_5 = arith.constant 0 : index
    %c0_6 = arith.constant 0 : index
    %11 = vector.load %arg11[%c0_5, %c0_6] : memref<128x128xbf16, #tpu.memory_space<vmem>>, vector<128x128xbf16>
    tpu.vector_store %arg11[%c0_5, %c0_6], %10 {strides = array<i32>} : memref<128x128xbf16, #tpu.memory_space<vmem>>, vector<128x128xbf16>,
    %c0_7 = arith.constant 0 : index
    %c0_8 = arith.constant 0 : index
    %12 = vector.load %arg1[%c0_7, %c0_8] : memref<128x128xf32, #tpu.memory_space<vmem>>, vector<128x128xf32>
    %13 = arith.truncf %12 : vector<128x128xf32> to vector<128x128xbf16>
    %c0_9 = arith.constant 0 : index
    %c0_10 = arith.constant 0 : index
    %14 = vector.load %arg4[%c0_9, %c0_10] : memref<128x384xbf16, #tpu.memory_space<vmem>>, vector<128x128xbf16>
    %cst_11 = arith.constant dense<0.000000e+00> : vector<128x128xf32>
    %15 = tpu.matmul %13, %14, %cst_11 {dimension_numbers = #tpu.dot_dimension_numbers<[1], [0], [0], [1], [0, 0, 1, 1], [], []>} : vector<128x128xbf16>, vector<128x128xbf16>, vector<128x128xf32> -> vector<128x128xf32>
    %16 = vector.extract_strided_slice %0 {offsets = [0, 0], sizes = [1, 128], strides = [1, 1]} : vector<16x128xf32> to vector<1x128xf32>
    %17 = vector.broadcast %16 : vector<1x128xf32> to vector<128x128xf32>
    %18 = arith.addf %15, %17 : vector<128x128xf32>
    %cst_12 = arith.constant 0.000000e+00 : f32
    %19 = vector.broadcast %cst_12 : f32 to vector<128x128xf32>
    %20 = arith.maximumf %18, %19 : vector<128x128xf32>
    %21 = arith.truncf %20 : vector<128x128xf32> to vector<128x128xbf16>
    %c0_13 = arith.constant 0 : index
    %c0_14 = arith.constant 0 : index
    %22 = vector.load %arg5[%c0_13, %c0_14] : memref<128x512xbf16, #tpu.memory_space<vmem>>, vector<128x256xbf16>
    %cst_15 = arith.constant dense<0.000000e+00> : vector<128x256xf32>
    %23 = tpu.matmul %21, %22, %cst_15 {dimension_numbers = #tpu.dot_dimension_numbers<[1], [0], [0], [1], [0, 0, 1, 1], [], []>} : vector<128x128xbf16>, vector<128x256xbf16>, vector<128x256xf32> -> vector<128x256xf32>
    %24 = arith.truncf %23 : vector<128x256xf32> to vector<128x256xbf16>
    %25 = vector.extract_strided_slice %24 {offsets = [0, 0], sizes = [128, 128], strides = [1, 1]} : vector<128x256xbf16> to vector<128x128xbf16>
    %26 = vector.extract_strided_slice %24 {offsets = [0, 128], sizes = [128, 128], strides = [1, 1]} : vector<128x256xbf16> to vector<128x128xbf16>
    %cst_16 = arith.constant dense<0.000000e+00> : vector<128x128xf32>
    %27 = tpu.matmul %25, %26, %cst_16 {dimension_numbers = #tpu.dot_dimension_numbers<[0], [0], [1], [1], [0, 1, 1, 1], [], []>} : vector<128x128xbf16>, vector<128x128xbf16>, vector<128x128xf32> -> vector<128x128xf32>
    %c0_17 = arith.constant 0 : index
    %c0_18 = arith.constant 0 : index
    %28 = vector.load %arg8[%c0_17, %c0_18] : memref<128x128xf32, #tpu.memory_space<vmem>>, vector<128x128xf32>
    %29 = arith.addf %27, %28 : vector<128x128xf32>
    %cst_19 = arith.constant dense<0xFF800000> : vector<128xf32>
    %30 = vector.multi_reduction <maximumf>, %29, %cst_19 [0] : vector<128x128xf32> to vector<128xf32>
    %31 = vector.shape_cast %30 : vector<128xf32> to vector<1x128xf32>
    %32 = vector.broadcast %31 : vector<1x128xf32> to vector<128x128xf32>
    %33 = arith.subf %29, %32 : vector<128x128xf32>
    %34 = math.exp %33 : vector<128x128xf32>
    %cst_20 = arith.constant dense<0.000000e+00> : vector<128xf32>
    %35 = vector.multi_reduction <add>, %34, %cst_20 [0] : vector<128x128xf32> to vector<128xf32>
    %36 = vector.shape_cast %35 : vector<128xf32> to vector<1x128xf32>
    %37 = tpu.reciprocal %36 {approx = true} : vector<1x128xf32> -> vector<1x128xf32>
    %38 = vector.broadcast %37 : vector<1x128xf32> to vector<128x128xf32>
    %39 = arith.mulf %34, %38 : vector<128x128xf32>
    %40 = arith.truncf %39 : vector<128x128xf32> to vector<128x128xbf16>
    %c0_21 = arith.constant 0 : index
    %c0_22 = arith.constant 0 : index
    %41 = vector.load %arg11[%c0_21, %c0_22] : memref<128x128xbf16, #tpu.memory_space<vmem>>, vector<128x128xbf16>
    %cst_23 = arith.constant dense<0.000000e+00> : vector<128x128xf32>
    %42 = tpu.matmul %41, %40, %cst_23 {dimension_numbers = #tpu.dot_dimension_numbers<[1], [0], [0], [1], [0, 0, 1, 1], [], []>} : vector<128x128xbf16>, vector<128x128xbf16>, vector<128x128xf32> -> vector<128x128xf32>
    %c0_24 = arith.constant 0 : index
    %c0_25 = arith.constant 0 : index
    %43 = vector.load %arg1[%c0_24, %c0_25] : memref<128x128xf32, #tpu.memory_space<vmem>>, vector<128x128xf32>
    %44 = arith.truncf %42 : vector<128x128xf32> to vector<128x128xbf16>
    %c0_26 = arith.constant 0 : index
    %c0_27 = arith.constant 0 : index
    %45 = vector.load %arg6[%c0_26, %c0_27] : memref<128x256xbf16, #tpu.memory_space<vmem>>, vector<128x128xbf16>
    %cst_28 = arith.constant dense<0.000000e+00> : vector<128x128xf32>
    %46 = tpu.matmul %44, %45, %cst_28 {dimension_numbers = #tpu.dot_dimension_numbers<[1], [0], [0], [1], [0, 0, 1, 1], [], []>} : vector<128x128xbf16>, vector<128x128xbf16>, vector<128x128xf32> -> vector<128x128xf32>
    %47 = arith.addf %43, %46 : vector<128x128xf32>
    %48 = vector.extract_strided_slice %0 {offsets = [3, 0], sizes = [1, 128], strides = [1, 1]} : vector<16x128xf32> to vector<1x128xf32>
    %49 = vector.broadcast %48 : vector<1x128xf32> to vector<128x128xf32>
    %50 = arith.addf %47, %49 : vector<128x128xf32>
    %cst_29 = arith.constant dense<0.000000e+00> : vector<128xf32>
    %51 = vector.multi_reduction <add>, %50, %cst_29 [1] : vector<128x128xf32> to vector<128xf32>
    %52 = vector.shape_cast %51 : vector<128xf32> to vector<128x1xf32>
    %cst_30 = arith.constant 1.280000e+02 : f32
    %53 = vector.broadcast %cst_30 : f32 to vector<128x1xf32>
    %54 = arith.divf %52, %53 : vector<128x1xf32>
    %55 = vector.broadcast %54 : vector<128x1xf32> to vector<128x128xf32>
    %56 = arith.subf %50, %55 : vector<128x128xf32>
    %57 = arith.mulf %56, %56 : vector<128x128xf32>
    %cst_31 = arith.constant dense<0.000000e+00> : vector<128xf32>
    %58 = vector.multi_reduction <add>, %57, %cst_31 [1] : vector<128x128xf32> to vector<128xf32>
    %59 = vector.shape_cast %58 : vector<128xf32> to vector<128x1xf32>
    %cst_32 = arith.constant 1.280000e+02 : f32
    %60 = vector.broadcast %cst_32 : f32 to vector<128x1xf32>
    %61 = arith.divf %59, %60 : vector<128x1xf32>
    %62 = vector.broadcast %54 : vector<128x1xf32> to vector<128x128xf32>
    %63 = arith.subf %50, %62 : vector<128x128xf32>
    %cst_33 = arith.constant 9.99999974E-6 : f32
    %64 = vector.broadcast %cst_33 : f32 to vector<128x1xf32>
    %65 = arith.addf %61, %64 : vector<128x1xf32>
    %66 = math.rsqrt %65 : vector<128x1xf32>
    %67 = vector.broadcast %66 : vector<128x1xf32> to vector<128x128xf32>
    %68 = arith.mulf %63, %67 : vector<128x128xf32>
    %69 = vector.extract_strided_slice %0 {offsets = [5, 0], sizes = [1, 128], strides = [1, 1]} : vector<16x128xf32> to vector<1x128xf32>
    %70 = vector.broadcast %69 : vector<1x128xf32> to vector<128x128xf32>
    %71 = arith.mulf %68, %70 : vector<128x128xf32>
    %72 = vector.extract_strided_slice %0 {offsets = [6, 0], sizes = [1, 128], strides = [1, 1]} : vector<16x128xf32> to vector<1x128xf32>
    %73 = vector.broadcast %72 : vector<1x128xf32> to vector<128x128xf32>
    %74 = arith.addf %71, %73 : vector<128x128xf32>
    %c0_34 = arith.constant 0 : index
    %c0_35 = arith.constant 0 : index
    %75 = vector.load %arg9[%c0_34, %c0_35] : memref<128x128xf32, #tpu.memory_space<vmem>>, vector<128x128xf32>
    tpu.vector_store %arg9[%c0_34, %c0_35], %74 {strides = array<i32>} : memref<128x128xf32, #tpu.memory_space<vmem>>, vector<128x128xf32>,
    %c0_36 = arith.constant 0 : index
    %c0_37 = arith.constant 0 : index
    %76 = vector.load %arg2[%c0_36, %c0_37] : memref<128x128xf32, #tpu.memory_space<vmem>>, vector<128x128xf32>
    %77 = arith.truncf %76 : vector<128x128xf32> to vector<128x128xbf16>
    %c0_38 = arith.constant 0 : index
    %c128 = arith.constant 128 : index
    %78 = vector.load %arg4[%c0_38, %c128] : memref<128x384xbf16, #tpu.memory_space<vmem>>, vector<128x128xbf16>
    %cst_39 = arith.constant dense<0.000000e+00> : vector<128x128xf32>
    %79 = tpu.matmul %77, %78, %cst_39 {dimension_numbers = #tpu.dot_dimension_numbers<[1], [0], [0], [1], [0, 0, 1, 1], [], []>} : vector<128x128xbf16>, vector<128x128xbf16>, vector<128x128xf32> -> vector<128x128xf32>
    %80 = vector.extract_strided_slice %0 {offsets = [1, 0], sizes = [1, 128], strides = [1, 1]} : vector<16x128xf32> to vector<1x128xf32>
    %81 = vector.broadcast %80 : vector<1x128xf32> to vector<128x128xf32>
    %82 = arith.addf %79, %81 : vector<128x128xf32>
    %cst_40 = arith.constant 0.000000e+00 : f32
    %83 = vector.broadcast %cst_40 : f32 to vector<128x128xf32>
    %84 = arith.maximumf %82, %83 : vector<128x128xf32>
    %85 = arith.truncf %84 : vector<128x128xf32> to vector<128x128xbf16>
    %c0_41 = arith.constant 0 : index
    %c256_42 = arith.constant 256 : index
    %86 = vector.load %arg5[%c0_41, %c256_42] : memref<128x512xbf16, #tpu.memory_space<vmem>>, vector<128x256xbf16>
    %cst_43 = arith.constant dense<0.000000e+00> : vector<128x256xf32>
    %87 = tpu.matmul %85, %86, %cst_43 {dimension_numbers = #tpu.dot_dimension_numbers<[1], [0], [0], [1], [0, 0, 1, 1], [], []>} : vector<128x128xbf16>, vector<128x256xbf16>, vector<128x256xf32> -> vector<128x256xf32>
    %88 = arith.truncf %87 : vector<128x256xf32> to vector<128x256xbf16>
    %89 = vector.extract_strided_slice %88 {offsets = [0, 0], sizes = [128, 128], strides = [1, 1]} : vector<128x256xbf16> to vector<128x128xbf16>
    %90 = vector.extract_strided_slice %88 {offsets = [0, 128], sizes = [128, 128], strides = [1, 1]} : vector<128x256xbf16> to vector<128x128xbf16>
    %cst_44 = arith.constant dense<0.000000e+00> : vector<128x128xf32>
    %91 = tpu.matmul %89, %90, %cst_44 {dimension_numbers = #tpu.dot_dimension_numbers<[0], [0], [1], [1], [0, 1, 1, 1], [], []>} : vector<128x128xbf16>, vector<128x128xbf16>, vector<128x128xf32> -> vector<128x128xf32>
    %c0_45 = arith.constant 0 : index
    %c0_46 = arith.constant 0 : index
    %92 = vector.load %arg8[%c0_45, %c0_46] : memref<128x128xf32, #tpu.memory_space<vmem>>, vector<128x128xf32>
    %93 = arith.addf %91, %92 : vector<128x128xf32>
    %cst_47 = arith.constant dense<0xFF800000> : vector<128xf32>
    %94 = vector.multi_reduction <maximumf>, %93, %cst_47 [0] : vector<128x128xf32> to vector<128xf32>
    %95 = vector.shape_cast %94 : vector<128xf32> to vector<1x128xf32>
    %96 = vector.broadcast %95 : vector<1x128xf32> to vector<128x128xf32>
    %97 = arith.subf %93, %96 : vector<128x128xf32>
    %98 = math.exp %97 : vector<128x128xf32>
    %cst_48 = arith.constant dense<0.000000e+00> : vector<128xf32>
    %99 = vector.multi_reduction <add>, %98, %cst_48 [0] : vector<128x128xf32> to vector<128xf32>
    %100 = vector.shape_cast %99 : vector<128xf32> to vector<1x128xf32>
    %101 = tpu.reciprocal %100 {approx = true} : vector<1x128xf32> -> vector<1x128xf32>
    %102 = vector.broadcast %101 : vector<1x128xf32> to vector<128x128xf32>
    %103 = arith.mulf %98, %102 : vector<128x128xf32>
    %104 = arith.truncf %103 : vector<128x128xf32> to vector<128x128xbf16>
    %c0_49 = arith.constant 0 : index
    %c0_50 = arith.constant 0 : index
    %105 = vector.load %arg11[%c0_49, %c0_50] : memref<128x128xbf16, #tpu.memory_space<vmem>>, vector<128x128xbf16>
    %cst_51 = arith.constant dense<0.000000e+00> : vector<128x128xf32>
    %106 = tpu.matmul %105, %104, %cst_51 {dimension_numbers = #tpu.dot_dimension_numbers<[1], [0], [0], [1], [0, 0, 1, 1], [], []>} : vector<128x128xbf16>, vector<128x128xbf16>, vector<128x128xf32> -> vector<128x128xf32>
    %c0_52 = arith.constant 0 : index
    %c0_53 = arith.constant 0 : index
    %107 = vector.load %arg2[%c0_52, %c0_53] : memref<128x128xf32, #tpu.memory_space<vmem>>, vector<128x128xf32>
    %108 = arith.truncf %106 : vector<128x128xf32> to vector<128x128xbf16>
    %c0_54 = arith.constant 0 : index
    %c128_55 = arith.constant 128 : index
    %109 = vector.load %arg6[%c0_54, %c128_55] : memref<128x256xbf16, #tpu.memory_space<vmem>>, vector<128x128xbf16>
    %cst_56 = arith.constant dense<0.000000e+00> : vector<128x128xf32>
    %110 = tpu.matmul %108, %109, %cst_56 {dimension_numbers = #tpu.dot_dimension_numbers<[1], [0], [0], [1], [0, 0, 1, 1], [], []>} : vector<128x128xbf16>, vector<128x128xbf16>, vector<128x128xf32> -> vector<128x128xf32>
    %111 = arith.addf %107, %110 : vector<128x128xf32>
    %112 = vector.extract_strided_slice %0 {offsets = [4, 0], sizes = [1, 128], strides = [1, 1]} : vector<16x128xf32> to vector<1x128xf32>
    %113 = vector.broadcast %112 : vector<1x128xf32> to vector<128x128xf32>
    %114 = arith.addf %111, %113 : vector<128x128xf32>
    %cst_57 = arith.constant dense<0.000000e+00> : vector<128xf32>
    %115 = vector.multi_reduction <add>, %114, %cst_57 [1] : vector<128x128xf32> to vector<128xf32>
    %116 = vector.shape_cast %115 : vector<128xf32> to vector<128x1xf32>
    %cst_58 = arith.constant 1.280000e+02 : f32
    %117 = vector.broadcast %cst_58 : f32 to vector<128x1xf32>
    %118 = arith.divf %116, %117 : vector<128x1xf32>
    %119 = vector.broadcast %118 : vector<128x1xf32> to vector<128x128xf32>
    %120 = arith.subf %114, %119 : vector<128x128xf32>
    %121 = arith.mulf %120, %120 : vector<128x128xf32>
    %cst_59 = arith.constant dense<0.000000e+00> : vector<128xf32>
    %122 = vector.multi_reduction <add>, %121, %cst_59 [1] : vector<128x128xf32> to vector<128xf32>
    %123 = vector.shape_cast %122 : vector<128xf32> to vector<128x1xf32>
    %cst_60 = arith.constant 1.280000e+02 : f32
    %124 = vector.broadcast %cst_60 : f32 to vector<128x1xf32>
    %125 = arith.divf %123, %124 : vector<128x1xf32>
    %126 = vector.broadcast %118 : vector<128x1xf32> to vector<128x128xf32>
    %127 = arith.subf %114, %126 : vector<128x128xf32>
    %cst_61 = arith.constant 9.99999974E-6 : f32
    %128 = vector.broadcast %cst_61 : f32 to vector<128x1xf32>
    %129 = arith.addf %125, %128 : vector<128x1xf32>
    %130 = math.rsqrt %129 : vector<128x1xf32>
    %131 = vector.broadcast %130 : vector<128x1xf32> to vector<128x128xf32>
    %132 = arith.mulf %127, %131 : vector<128x128xf32>
    %133 = vector.extract_strided_slice %0 {offsets = [7, 0], sizes = [1, 128], strides = [1, 1]} : vector<16x128xf32> to vector<1x128xf32>
    %134 = vector.broadcast %133 : vector<1x128xf32> to vector<128x128xf32>
    %135 = arith.mulf %132, %134 : vector<128x128xf32>
    %136 = vector.extract_strided_slice %0 {offsets = [8, 0], sizes = [1, 128], strides = [1, 1]} : vector<16x128xf32> to vector<1x128xf32>
    %137 = vector.broadcast %136 : vector<1x128xf32> to vector<128x128xf32>
    %138 = arith.addf %135, %137 : vector<128x128xf32>
    %c0_62 = arith.constant 0 : index
    %c0_63 = arith.constant 0 : index
    %139 = vector.load %arg10[%c0_62, %c0_63] : memref<128x128xf32, #tpu.memory_space<vmem>>, vector<128x128xf32>
    tpu.vector_store %arg10[%c0_62, %c0_63], %138 {strides = array<i32>} : memref<128x128xf32, #tpu.memory_space<vmem>>, vector<128x128xf32>,
    return
  }
  func.func @transform_0(%arg0: i32) -> (i32, i32) {
    %c0_i32 = arith.constant 0 : i32
    %c0_i32_0 = arith.constant 0 : i32
    return %arg0, %c0_i32 : i32, i32
  }
  func.func @transform_1(%arg0: i32) -> (i32, i32) {
    %c0_i32 = arith.constant 0 : i32
    %c0_i32_0 = arith.constant 0 : i32
    return %arg0, %c0_i32 : i32, i32
  }
  func.func @transform_2(%arg0: i32) -> (i32, i32) {
    %c0_i32 = arith.constant 0 : i32
    %c0_i32_0 = arith.constant 0 : i32
    return %arg0, %c0_i32 : i32, i32
  }
  func.func @transform_3(%arg0: i32) -> (i32, i32) {
    %c0_i32 = arith.constant 0 : i32
    %c0_i32_0 = arith.constant 0 : i32
    %c0_i32_1 = arith.constant 0 : i32
    return %c0_i32, %c0_i32_0 : i32, i32
  }
  func.func @transform_4(%arg0: i32) -> (i32, i32) {
    %c0_i32 = arith.constant 0 : i32
    %c0_i32_0 = arith.constant 0 : i32
    %c0_i32_1 = arith.constant 0 : i32
    return %c0_i32, %c0_i32_0 : i32, i32
  }
  func.func @transform_5(%arg0: i32) -> (i32, i32) {
    %c0_i32 = arith.constant 0 : i32
    %c0_i32_0 = arith.constant 0 : i32
    %c0_i32_1 = arith.constant 0 : i32
    return %c0_i32, %c0_i32_0 : i32, i32
  }
  func.func @transform_6(%arg0: i32) -> (i32, i32) {
    %c0_i32 = arith.constant 0 : i32
    %c0_i32_0 = arith.constant 0 : i32
    %c0_i32_1 = arith.constant 0 : i32
    return %c0_i32, %c0_i32_0 : i32, i32
  }
  func.func @transform_7(%arg0: i32) -> (i32, i32) {
    %c0_i32 = arith.constant 0 : i32
    %c0_i32_0 = arith.constant 0 : i32
    %c0_i32_1 = arith.constant 0 : i32
    return %c0_i32, %c0_i32_0 : i32, i32
  }
  func.func @transform_8(%arg0: i32) -> (i32, i32) {
    %c0_i32 = arith.constant 0 : i32
    %c0_i32_0 = arith.constant 0 : i32
    return %arg0, %c0_i32 : i32, i32
  }
  func.func @transform_9(%arg0: i32) -> (i32, i32) {
    %c0_i32 = arith.constant 0 : i32
    %c0_i32_0 = arith.constant 0 : i32
    return %arg0, %c0_i32 : i32, i32
  }
}

</mosaic_0001>

<bundles_post_ra>
// kernel: tpu_custom_call.1
= control target key start
LH: loop header
LB: loop body
LE: loop exit
PB: predicated region body
PF: predicated region fallthrough
CT: control target
= control target key end

     0   :  { %s6086_s0 = inlined_call_operand.hbm [shape: f32[256,128], index: 0, kind: input, shape index: {}]   ;;  %s6087_s1 = inlined_call_operand.hbm [shape: f32[256,128], index: 1, kind: input, shape index: {}]   ;;  %s6088_s2 = inlined_call_operand.hbm [shape: f32[256,128], index: 2, kind: input, shape index: {}]   ;;  %s6089_s3 = inlined_call_operand.hbm [shape: bf16[128,384], index: 3, kind: input, shape index: {}]   ;;  %s6090_s4 = inlined_call_operand.hbm [shape: bf16[128,512], index: 4, kind: input, shape index: {}]   ;;  %s6091_s5 = inlined_call_operand.hbm [shape: bf16[128,256], index: 5, kind: input, shape index: {}]   ;;  %s6092_s6 = inlined_call_operand.hbm [shape: f32[16,128], index: 6, kind: input, shape index: {}]   ;;  %s6093_s7 = inlined_call_operand.hbm [shape: f32[128,128], index: 7, kind: input, shape index: {}]   ;;  %s6094_s8 = inlined_call_operand.hbm [shape: f32[256,128], index: 8, kind: output, shape index: {0}]   ;;  %s6095_s9 = inlined_call_operand.hbm [shape: f32[256,128], index: 9, kind: output, shape index: {1}]  }
   0x1   :  { %6108 = sst [smem:[#allocation32_spill]] %s6087_s1 }
   0x2   :  { %6109 = sst [smem:[#allocation33_spill]] %s6089_s3 }
   0x3   :  { %6110 = sst [smem:[#allocation34_spill]] %s6091_s5 }
   0x4   :  { %6111 = sst [smem:[#allocation35_spill]] %s6095_s9 }
   0x5   :  { %15 = vsyncpa [#allocation4], 0 }
   0x6   :  { %17 = vsyncpa [#allocation4 + $0x1], 0 }
   0x7   :  { %18 = vsyncpa [#allocation7], 0 }
   0x8   :  { %20 = vsyncpa [#allocation7 + $0x1], 0 }
   0x9   :  { %21 = vsyncpa [#allocation10], 0 }
   0xa   :  { %22 = vsyncpa [#allocation13], 0 }
   0xb   :  { %23 = vsyncpa [#allocation16], 0 }
   0xc   :  { %24 = vsyncpa [#allocation5], 0 }
   0xd   :  { %26 = vsyncpa [#allocation5 + $0x1], 0 }
   0xe   :  { %27 = vsyncpa [#allocation19], 0 }
   0xf   :  { %29 = vsyncpa [#allocation19 + $0x1], 0  ;;  %s4852_s30 = smov 0   ;;  %s4854_s10 = smov 0  }
  0x10   :  { %s4856_s11 = smov 0   ;;  %s4858_s12 = smov 0  }
  0x11 LB: > { %6112 = sst [smem:[#allocation27_spill]] %s4772_s30  ;;  %s4876_s16 = sadd.s32 4294967295, %s4784_s12   ;;  %s4784_s12 = sphi %s4858_s12, %s6140_s12   ;;  %s4780_s11 = sphi %s4856_s11, %s6144_s11   ;;  %s4776_s10 = sphi %s4854_s10, %s6143_s10   ;;  %s4772_s30 = sphi %s4852_s30, %s6142_s30  }
  0x12   : > { %6113 = sst [smem:[#allocation28_spill]] %s4784_s12  ;;  %p3534_p0 = scmp.ge.s32.totalorder %s4784_s12, 1 }
  0x13   : > { %s6114_s3 = sld [smem:[#allocation33_spill]]  ;;  %p6104_p1 = scmp.eq.s32.totalorder %s4876_s16, 0 }
  0x14   : > { %p236_p2 = scmp.eq.s32.totalorder %s4876_s16, 1  ;;  %p275_p3 = scmp.lt.s32.totalorder %s4784_s12, 3 }
  0x15   : > { %s4786_s18 = smov [#allocation9]   ;;  %s6116_s5 = sld [smem:[#allocation34_spill]] }
  0x16   : > { %p4882_p4 = pnand %p3534_p0, %p275_p3  ;;  %s288_s19 = sshll.u32 %s4786_s18, 4  ;;  %s289_s19 = int_to_ptr.vmem [resolvable:$true] %s288_s19 }
  0x17   : > { %s4787_s24 = smov [#allocation12]   ;;  %s4788_s26 = smov 192  }
  0x18   : > { %p4171_p5 = pneg %p4882_p4  ;;  %s316_s25 = sshll.u32 %s4787_s24, 4  ;;  %s317_s25 = int_to_ptr.vmem [resolvable:$true] %s316_s25 }
  0x19   : > { %s286_s15 = sshll.u32 %s6114_s3, 4  ;;  %s4789_s27 = smov 12   ;;  %s287_s15 = int_to_ptr.hbm [resolvable:$true] %s286_s15 }
  0x1a   : > { %p4894_p7 = pnand %p4171_p5, %p6104_p1  ;;  %s6096_s28 = smov 128  }
  0x1b   : > { %s314_s22 = sshll.u32 %s6116_s5, 4  ;;  %s6098_s29 = smov 8   ;;  %s315_s22 = int_to_ptr.hbm [resolvable:$true] %s314_s22 }
  0x1c   : > { %4174 = dma.hbm_to_vmem [thread:$0]  (!%p4894_p7), %s287_s15, 3072, %s289_s19, [#allocation10], %s4788_s26, %s4788_s26, %s4789_s27  }
  0x1d   : > { %4180 = dma.hbm_to_vmem [thread:$0]  (!%p4894_p7), %s315_s22, 2048, %s317_s25, [#allocation13], %s6096_s28, %s6096_s28, %s6098_s29  }
  0x1e   : > { %s3533_s13 = sadd.s32 4294967294, %s4784_s12   ;;  %s4907_s14 = sadd.s32 1, %s4784_s12  }
  0x1f   : > { %6118 = sst [smem:[#allocation29_spill]] %s4907_s14  ;;  %s42_s18 = sadd.s32 1, %s4780_s11 }
  0x20   : > { %s39_s20 = ssub.s32 %s4784_s12, %s4907_s14  ;;  %p49_p8 = scmp.ne.s32.totalorder %s4780_s11, %s4776_s10 }
  0x21   : > { %p40_p9 = scmp.eq.s32.totalorder %s39_s20, 0  ;;  %p50_p10 = scmp.eq.s32.totalorder %s4784_s12, 0 }
  0x22   : > { %p55_p11 = scmp.ne.s32.totalorder %s4776_s10, %s4772_s30  ;;  %p4919_p12 = por %p236_p2, %p49_p8 }
  0x23   : > { %s4924_s19 = scalar_select %p40_p9, %s4780_s11, %s42_s18  }
  0x24   : > { %p51_p13 = por %p50_p10, %p49_p8  ;;  %p4928_p0 = por %p6104_p1, %p55_p11 }
  0x25   : > { %6120 = sst [smem:[#allocation30_spill]] %s4924_s19  ;;  %p242_p3 = scmp.eq.s32.totalorder %s3533_s13, 1 }
  0x26   : > { %p4209_p5 = scmp.lt.s32.totalorder %s4784_s12, 2  ;;  %s6100_s22 = sand.u32 1, %s4780_s11  }
  0x27   : > { %s4935_s24 = sshll.u32 %s4784_s12, 7  ;;  %p4937_p6 = por %p242_p3, %p55_p11 }
  0x28   : > { %s4943_s26 = sshll.u32 %s6100_s22, 7  ;;  %p4945_p2 = pnand %p4209_p5, %p51_p13 }
  0x29   : > { %s6122_s25 = scalar_select %p4937_p6, 1, 0 }
  0x2a   : > { %s380_s13 = sand.u32 1, %s4784_s12   ;;  %s6125_s1 = sld [smem:[#allocation32_spill]] }
  0x2b   : > { %6123 = sst [smem:[#allocation31_spill]] %s6122_s25  ;;  %s384_s3 = scalar_lea.vmem [#allocation6], %s4943_s26 }
  0x2c   : > { %s392_s5 = sshll.u32 %s384_s3, 4  ;;  %s4955_s19 = scalar_lea.sflag [#allocation7], %s380_s13  ;;  %s393_s5 = int_to_ptr.vmem [resolvable:$true] %s392_s5 }
  0x2d   : > { %p4494_p9 = pneg %p4945_p2 }
  0x30   : > { %s389_s28 = scalar_lea.hbm %s6125_s1, %s4935_s24 }
  0x31   : > { %s390_s29 = sshll.u32 %s389_s28, 4  ;;  %s4497_s28 = scalar_lea.hbm %s6125_s1, 256  ;;  %s391_s29 = int_to_ptr.hbm [resolvable:$true] %s390_s29 }
  0x32   : > { %s4490_s22 = sshra.s32 %s391_s29, 4  ;;  %s4491_s22 = int_to_ptr.hbm [resolvable:$true] %s4490_s22 }
  0x33   : > { %s4492_s14 = scalar_lea.hbm %s4491_s22, 128  ;;  %p4498_p13 = scmp.lt.s32.totalorder %s4491_s22, %s6125_s1 }
  0x34   : > { %p4493_p8 = scmp.ne.s32.totalorder %s4491_s22, %s4492_s14  ;;  %p4499_p3 = scmp.lt.s32.totalorder %s4497_s28, %s4492_s14 }
  0x36   : > { %p4495_p10 = pnand %p4494_p9, %p4493_p8  ;;  %p4500_p5 = por %p4499_p3, %p4498_p13 }
  0x38   : > { %p4496_p11 = pneg %p4495_p10 }
  0x3a   : > { %p4501_p1 = pnand %p4500_p5, %p4496_p11 }
  0x3c   : > { %4504 = shalt.err (!%p4501_p1)
}
  0x3d   : > { %s6126_s13 = smov 8   ;;  %s6127_s25 = smov 128  }
  0x3e   : > { %4193 = dma.hbm_to_vmem [thread:$0]  (!%p4945_p2), %s391_s29, 2048, %s393_s5, %s4955_s19, %s6127_s25, %s6127_s25, %s6126_s13  }
  0x3f   : > { %s300_s12 = sshll.u32 %s6090_s4, 4  ;;  %s4792_s18 = smov [#allocation11]   ;;  %s301_s12 = int_to_ptr.hbm [resolvable:$true] %s300_s12 }
  0x40   : > { %s302_s22 = sshll.u32 %s4792_s18, 4  ;;  %s328_s20 = sshll.u32 %s6092_s6, 4  ;;  %s303_s22 = int_to_ptr.vmem [resolvable:$true] %s302_s22  ;;  %s329_s20 = int_to_ptr.hbm [resolvable:$true] %s328_s20 }
  0x41   : > { %s4793_s3 = smov 256   ;;  %s4794_s1 = smov 16  }
  0x42   : > { %4177 = dma.hbm_to_vmem [thread:$0]  (!%p4894_p7), %s301_s12, 4096, %s303_s22, [#allocation10], %s4793_s3, %s4793_s3, %s4794_s1  }
  0x43   : > { %s4795_s5 = smov [#allocation14]   ;;  %s342_s18 = sshll.u32 %s6093_s7, 4  ;;  %s343_s18 = int_to_ptr.hbm [resolvable:$true] %s342_s18 }
  0x44   : > { %s330_s9 = sshll.u32 %s4795_s5, 4  ;;  %s4796_s14 = smov [#allocation15]   ;;  %s331_s9 = int_to_ptr.vmem [resolvable:$true] %s330_s9 }
  0x45   : > { %4183 = dma.hbm_to_vmem [thread:$0]  (!%p4894_p7), %s329_s20, 256, %s331_s9, [#allocation13], %s6127_s25, %s6127_s25, %s6126_s13  }
  0x46   : > { %s344_s28 = sshll.u32 %s4796_s14, 4  ;;  %s367_s22 = scalar_lea.hbm %s6086_s0, %s4935_s24  ;;  %s345_s28 = int_to_ptr.vmem [resolvable:$true] %s344_s28 }
  0x47   : > { %4186 = dma.hbm_to_vmem [thread:$0]  (!%p4894_p7), %s343_s18, 2048, %s345_s28, [#allocation16], %s6127_s25, %s6127_s25, %s6126_s13  }
  0x48   : > { %s368_s3 = sshll.u32 %s367_s22, 4  ;;  %s362_s5 = scalar_lea.vmem [#allocation3], %s4943_s26  ;;  %s369_s3 = int_to_ptr.hbm [resolvable:$true] %s368_s3 }
  0x49   : > { %s370_s30 = sshll.u32 %s362_s5, 4  ;;  %s6128_s29 = sand.u32 1, %s4780_s11   ;;  %s371_s30 = int_to_ptr.vmem [resolvable:$true] %s370_s30 }
  0x4a   : > { %s359_s20 = scalar_lea.sflag [#allocation4], %s6128_s29  ;;  %s4610_s9 = sshra.s32 %s369_s3, 4  ;;  %s4611_s9 = int_to_ptr.hbm [resolvable:$true] %s4610_s9 }
  0x4b   : > { %s4612_s14 = scalar_lea.hbm %s4611_s9, 128  ;;  %s4617_s12 = scalar_lea.hbm %s6086_s0, 256 }
  0x4c   : > { %p4613_p1 = scmp.ne.s32.totalorder %s4611_s9, %s4612_s14  ;;  %p4618_p7 = scmp.lt.s32.totalorder %s4611_s9, %s6086_s0 }
  0x4d   : > { %p4619_p11 = scmp.lt.s32.totalorder %s4617_s12, %s4612_s14 }
  0x4e   : > { %p4615_p8 = pnand %p4613_p1, %p4494_p9 }
  0x4f   : > { %p4620_p13 = por %p4619_p11, %p4618_p7 }
  0x50   : > { %p4616_p10 = pneg %p4615_p8 }
  0x52   : > { %p4621_p3 = pnand %p4620_p13, %p4616_p10 }
  0x54   : > { %4624 = shalt.err (!%p4621_p3)
}
  0x55   : > { %4190 = dma.hbm_to_vmem [thread:$0]  (!%p4945_p2), %s369_s3, 2048, %s371_s30, %s359_s20, %s6127_s25, %s6127_s25, %s6126_s13  }
  0x56   : > { %s411_s29 = scalar_lea.hbm %s6088_s2, %s4935_s24  ;;  %s406_s1 = scalar_lea.vmem [#allocation8], %s4943_s26 }
  0x57   : > { %s412_s23 = sshll.u32 %s411_s29, 4  ;;  %s414_s9 = sshll.u32 %s406_s1, 4  ;;  %s413_s23 = int_to_ptr.hbm [resolvable:$true] %s412_s23  ;;  %s415_s9 = int_to_ptr.vmem [resolvable:$true] %s414_s9 }
  0x58   : > { %s4640_s14 = sshra.s32 %s413_s23, 4  ;;  %s4647_s3 = scalar_lea.hbm %s6088_s2, 256  ;;  %s4641_s14 = int_to_ptr.hbm [resolvable:$true] %s4640_s14 }
  0x59   : > { %s4642_s12 = scalar_lea.hbm %s4641_s14, 128  ;;  %p4648_p10 = scmp.lt.s32.totalorder %s4641_s14, %s6088_s2 }
  0x5a   : > { %p4643_p5 = scmp.ne.s32.totalorder %s4641_s14, %s4642_s12  ;;  %p4649_p7 = scmp.lt.s32.totalorder %s4647_s3, %s4642_s12 }
  0x5c   : > { %p4645_p1 = pnand %p4643_p5, %p4494_p9  ;;  %p4650_p11 = por %p4649_p7, %p4648_p10 }
  0x5e   : > { %p4646_p8 = pneg %p4645_p1 }
  0x60   : > { %p4651_p13 = pnand %p4650_p11, %p4646_p8 }
  0x62   : > { %4654 = shalt.err (!%p4651_p13)
}
  0x63   : > { %4196 = dma.hbm_to_vmem [thread:$0]  (!%p4945_p2), %s413_s23, 2048, %s415_s9, %s4955_s19, %s6127_s25, %s6127_s25, %s6126_s13  }
  0x64   : > { %426 = sbr.rel (%p4882_p4) target bundleno = 2544 (0x9f0), region = 52  ;;  %s5039_s24 = sand.u32 (!%p4882_p4), 1, %s4776_s10  }
  0x65   : > { %s5042_s26 = sshll.u32 (!%p4882_p4), %s5039_s24, 7  ;;  %s429_s22 = scalar_lea.sflag (!%p4882_p4), [#allocation4], %s5039_s24 }
  0x66   : > { %s5046_s5 = scalar_lea.vmem (!%p4882_p4), [#allocation3], %s5042_s26 }
  0x69   : > { %4743 = dma.done.wait (%p4928_p0), %s429_s22, 2048  }
  0x6a   : > { %4745 = vsyncadd (%p4928_p0), %s429_s22, 4294965248  ;;  %s438_s17 = sand.u32 1, %s4876_s16   ;;  %s5054_s25 = scalar_lea.vmem [#allocation6], %s5042_s26 }
  0x6b   : > { %s439_s19 = scalar_lea.sflag [#allocation7], %s438_s17 }
  0x6c   : > { %4747 = dma.done.wait (%p4928_p0), %s439_s19, 4096  }
  0x6d   : > { %4749 = vsyncadd (%p4928_p0), %s439_s19, 4294963200  ;;  %s5061_s27 = scalar_lea.vmem [#allocation8], %s5042_s26  ;;  %p6129_p4 = scmp.eq.s32.totalorder %s4876_s16, 0 }
  0x6f   : > { %4751 = dma.done.wait (%p6129_p4), [#allocation10], 7168   ;;  %p6130_p2 = pmov %p6129_p4 }
  0x71   : > { %4753 = vsyncadd (%p6130_p2), [#allocation10], 4294960128  ;;  %p6131_p9 = pmov %p6130_p2 }
  0x72   : > { %p6132_p3 = pmov %p6130_p2 }
  0x73   : > { %4755 = dma.done.wait (%p6131_p9), [#allocation13], 2304  }
  0x74   : > { %4757 = vsyncadd (%p6132_p3), [#allocation13], 4294964992  ;;  %p6133_p5 = pmov %p6130_p2 }
  0x75   : > { %p6134_p0 = pmov %p6130_p2 }
  0x76   : > { %4759 = dma.done.wait (%p6133_p5), [#allocation16], 2048  }
  0x77   : > { %4761 = vsyncadd (%p6134_p0), [#allocation16], 4294965248  ;;  %v3591_v0 = vld [vmem:[#allocation9 + $0xb0] sm:$0xf]  ;;  %v3931_v1 = vld [vmem:[#allocation9 + $0xb8] sm:$0xf0] }
  0x78   : > { %v3587_v2 = vld [vmem:[#allocation9 + $0x98] sm:$0xf]  ;;  %v3592_v3 = vor.u32 %v3931_v1, %v3591_v0  ;;  %v3930_v4 = vld [vmem:[#allocation9 + $0xa0] sm:$0xf0]  ;;  %v3583_v6 = vld [vmem:[#allocation9 + $0x80] sm:$0xf] }
  0x79   : > { %v3588_v5 = vor.u32 %v3930_v4, %v3587_v2  ;;  %v3929_v7 = vld [vmem:[#allocation9 + $0x88] sm:$0xf0]  ;;  %v3579_v9 = vld [vmem:[#allocation9 + $0x68] sm:$0xf]  ;;  %v3928_v10 = vld [vmem:[#allocation9 + $0x70] sm:$0xf0] }
  0x7a   : > { %4061 = vmatpush.bf16.msra.mxu1 %v3592_v3  ;;  %4062 = vmatpush.bf16.msra.mxu2 %v3592_v3  ;;  %v3584_v8 = vor.u32 %v3929_v7, %v3583_v6  ;;  %v3580_v11 = vor.u32 %v3928_v10, %v3579_v9  ;;  %v3575_v12 = vld [vmem:[#allocation9 + $0x50] sm:$0xf]  ;;  %v3927_v13 = vld [vmem:[#allocation9 + $0x58] sm:$0xf0]  ;;  %v3571_v15 = vld [vmem:[#allocation9 + $0x38] sm:$0xf] }
  0x7b   : > { %4063 = vmatpush.bf16.msra.mxu3 %v3592_v3  ;;  %624 = vmatpush.bf16.msra.mxu0 %v3592_v3  ;;  %v3576_v14 = vor.u32 %v3927_v13, %v3575_v12  ;;  %v3926_v16 = vld [vmem:[#allocation9 + $0x40] sm:$0xf0]  ;;  %v3567_v18 = vld [vmem:[#allocation9 + $0x20] sm:$0xf]  ;;  %v3925_v19 = vld [vmem:[#allocation9 + $0x28] sm:$0xf0] }
  0x7c   : > { %v3572_v17 = vor.u32 %v3926_v16, %v3571_v15  ;;  %v3568_v20 = vor.u32 %v3925_v19, %v3567_v18  ;;  %v3563_v21 = vld [vmem:[#allocation9 + $0x8] sm:$0xf]  ;;  %v3924_v22 = vld [vmem:[#allocation9 + $0x10] sm:$0xf0]  ;;  %v539_v26 = vld [vmem:[%s5061_s27 + $0x20] sm:$0xff]  ;;  %s5540_s21 = scalar_lea.vmem [#allocation17], %s5042_s26 }
  0x7d   : > { %v3623_v23 = vld [vmem:[#allocation9 + $0xa8] sm:$0xf]  ;;  %v3939_v24 = vld [vmem:[#allocation9 + $0xb0] sm:$0xf0]  ;;  %v3564_v25 = vor.u32 %v3924_v22, %v3563_v21  ;;  %v3619_v29 = vld [vmem:[#allocation9 + $0x90] sm:$0xf] }
  0x7e   : > { %4064 = vmatpush.bf16.msra.mxu1 %v3588_v5  ;;  %4065 = vmatpush.bf16.msra.mxu2 %v3588_v5  ;;  %v540_v27 = vld [vmem:[%s5061_s27 + $0x28] sm:$0xff]  ;;  %v3624_v28 = vor.u32 %v3939_v24, %v3623_v23  ;;  %v3938_v30 = vld [vmem:[#allocation9 + $0x98] sm:$0xf0]  ;;  %v3615_v33 = vld [vmem:[#allocation9 + $0x78] sm:$0xf]  ;;  %s4012_s13 = sshll.u32 %s4876_s16, 7 }
  0x7f   : > { %4066 = vmatpush.bf16.msra.mxu3 %v3588_v5  ;;  %625 = vmatpush.bf16.msra.mxu0 %v3588_v5  ;;  %v553_v31 = vpack.c.bf16 %v540_v27, %v539_v26  ;;  %v3620_v32 = vor.u32 %v3938_v30, %v3619_v29  ;;  %v3937_v34 = vld [vmem:[#allocation9 + $0x80] sm:$0xf0]  ;;  %v3611_v36 = vld [vmem:[#allocation9 + $0x60] sm:$0xf]  ;;  %v3936_v37 = vld [vmem:[#allocation9 + $0x68] sm:$0xf0]  ;;  %s3315_s1 = scalar_lea.hbm %s6094_s8, %s4012_s13 }
  0x80   : > { %v3616_v35 = vor.u32 %v3937_v34, %v3615_v33  ;;  %v3612_v38 = vor.u32 %v3936_v37, %v3611_v36  ;;  %v3607_v39 = vld [vmem:[#allocation9 + $0x48] sm:$0xf]  ;;  %v3935_v40 = vld [vmem:[#allocation9 + $0x50] sm:$0xf0]  ;;  %v542_v42 = vld [vmem:[%s5061_s27 + $0x38] sm:$0xff]  ;;  %s5940_s9 = scalar_lea.vmem [#allocation18], %s5042_s26 }
  0x81   : > { %v541_v41 = vld [vmem:[%s5061_s27 + $0x30] sm:$0xff]  ;;  %v3608_v43 = vor.u32 %v3935_v40, %v3607_v39  ;;  %v3934_v45 = vld [vmem:[#allocation9 + $0x38] sm:$0xf0]  ;;  %v3599_v48 = vld [vmem:[#allocation9 + $0x18] sm:$0xf]  ;;  %s3316_s14 = sshll.u32 %s5540_s21, 4  ;;  %s5948_s14 = int_to_ptr.vmem [resolvable:$true] %s3316_s14 }
  0x82   : > { %4067 = vmatpush.bf16.msra.mxu1 %v3584_v8  ;;  %4068 = vmatpush.bf16.msra.mxu2 %v3584_v8  ;;  %v3603_v44 = vld [vmem:[#allocation9 + $0x30] sm:$0xf]  ;;  %v554_v46 = vpack.c.bf16 %v542_v42, %v541_v41  ;;  %v3933_v49 = vld [vmem:[#allocation9 + $0x20] sm:$0xf0]  ;;  %v3595_v51 = vld [vmem:[#allocation9] sm:$0xf] }
  0x83   : > { %4069 = vmatpush.bf16.msra.mxu3 %v3584_v8  ;;  %626 = vmatpush.bf16.msra.mxu0 %v3584_v8  ;;  %v3604_v47 = vor.u32 %v3934_v45, %v3603_v44  ;;  %v3600_v50 = vor.u32 %v3933_v49, %v3599_v48  ;;  %v3932_v52 = vld [vmem:[#allocation9 + $0x8] sm:$0xf0]  ;;  %v721_v54 = vld [vmem:[%s5046_s5] sm:$0xff]  ;;  %v723_v57 = vld [vmem:[%s5046_s5 + $0x10] sm:$0xff]  ;;  %s3318_s12 = sshll.u32 %s3315_s1, 4  ;;  %s3299_s18 = scalar_lea.sflag [#allocation5], %s5039_s24  ;;  %s5950_s12 = int_to_ptr.hbm [resolvable:$true] %s3318_s12 }
  0x84   : > { %v3596_v53 = vor.u32 %v3932_v52, %v3595_v51  ;;  %v722_v55 = vld [vmem:[%s5046_s5 + $0x8] sm:$0xff]  ;;  %v724_v58 = vld [vmem:[%s5046_s5 + $0x18] sm:$0xff]  ;;  %v725_v60 = vld [vmem:[%s5046_s5 + $0x20] sm:$0xff]  ;;  %s4684_s28 = sshra.s32 %s5950_s12, 4  ;;  %s4690_s26 = scalar_lea.hbm %s6094_s8, 256  ;;  %s4685_s28 = int_to_ptr.hbm [resolvable:$true] %s4684_s28 }
  0x85   : > { %v737_v56 = vpack.c.bf16 %v722_v55, %v721_v54  ;;  %v738_v59 = vpack.c.bf16 %v724_v58, %v723_v57  ;;  %v726_v61 = vld [vmem:[%s5046_s5 + $0x28] sm:$0xff]  ;;  %v727_v63 = vld [vmem:[%s5046_s5 + $0x30] sm:$0xff]  ;;  %v728_v0 = vld [vmem:[%s5046_s5 + $0x38] sm:$0xff]  ;;  %s4686_s3 = scalar_lea.hbm %s4685_s28, 128  ;;  %p4691_p7 = scmp.lt.s32.totalorder %s4685_s28, %s6094_s8 }
  0x86   : > { %4070 = vmatpush.bf16.msra.mxu1 %v3580_v11  ;;  %4071 = vmatpush.bf16.msra.mxu2 %v3580_v11  ;;  %v739_v62 = vpack.c.bf16 %v726_v61, %v725_v60  ;;  %v740_v1 = vpack.c.bf16 %v728_v0, %v727_v63  ;;  %v729_v2 = vld [vmem:[%s5046_s5 + $0x40] sm:$0xff]  ;;  %v730_v3 = vld [vmem:[%s5046_s5 + $0x48] sm:$0xff]  ;;  %v732_v12 = vld [vmem:[%s5046_s5 + $0x58] sm:$0xff]  ;;  %p4687_p1 = scmp.ne.s32.totalorder %s4685_s28, %s4686_s3  ;;  %p4692_p11 = scmp.lt.s32.totalorder %s4690_s26, %s4686_s3 }
  0x87   : > { %4072 = vmatpush.bf16.msra.mxu3 %v3580_v11  ;;  %627 = vmatpush.bf16.msra.mxu0 %v3580_v11  ;;  %v741_v4 = vpack.c.bf16 %v730_v3, %v729_v2  ;;  %v543_v5 = vld [vmem:[%s5061_s27 + $0x40] sm:$0xff]  ;;  %v544_v6 = vld [vmem:[%s5061_s27 + $0x48] sm:$0xff]  ;;  %v731_v11 = vld [vmem:[%s5046_s5 + $0x50] sm:$0xff] }
  0x88   : > { %v547_v7 = vld [vmem:[%s5061_s27 + $0x60] sm:$0xff]  ;;  %v555_v8 = vpack.c.bf16 %v544_v6, %v543_v5  ;;  %v548_v9 = vld [vmem:[%s5061_s27 + $0x68] sm:$0xff]  ;;  %v742_v18 = vpack.c.bf16 %v732_v12, %v731_v11  ;;  %v3953_v21 = vld [vmem:[#allocation11 + $0xcc] sm:$0xf0]  ;;  %p4688_p8 = pnand %p4687_p1, %p4919_p12  ;;  %p4693_p13 = por %p4692_p11, %p4691_p7 }
  0x89   : > { %v557_v10 = vpack.c.bf16 %v548_v9, %v547_v7  ;;  %v3683_v13 = vld [vmem:[#allocation11 + $0xe0] sm:$0xf]  ;;  %v3954_v15 = vld [vmem:[#allocation11 + $0xe4] sm:$0xf]  ;;  %v3677_v24 = vld [vmem:[#allocation11 + $0xd0] sm:$0xf0] }
  0x8a   : > { %4073 = vmatpush.bf16.msra.mxu1 %v3576_v14  ;;  %4074 = vmatpush.bf16.msra.mxu2 %v3576_v14  ;;  %v3952_v22 = vld [vmem:[#allocation11 + $0xc4] sm:$0xf]  ;;  %v545_v26 = vld [vmem:[%s5061_s27 + $0x50] sm:$0xff]  ;;  %v546_v27 = vld [vmem:[%s5061_s27 + $0x58] sm:$0xff]  ;;  %p4689_p10 = pneg %p4688_p8 }
  0x8b   : > { %4075 = vmatpush.bf16.msra.mxu3 %v3576_v14  ;;  %628 = vmatpush.bf16.msra.mxu0 %v3576_v14  ;;  %v3955_v14 = vld [vmem:[#allocation11 + $0xec] sm:$0xf0]  ;;  %v556_v29 = vpack.c.bf16 %v546_v27, %v545_v26  ;;  %v550_v30 = vld [vmem:[%s5061_s27 + $0x78] sm:$0xff]  ;;  %v3950_v34 = vld [vmem:[#allocation11 + $0xa4] sm:$0xf] }
  0x8c   : > { %v3684_v16 = vor.u32 %v3955_v14, %v3683_v13  ;;  %v3951_v33 = vld [vmem:[#allocation11 + $0xac] sm:$0xf0]  ;;  %v3669_v36 = vld [vmem:[#allocation11 + $0xb0] sm:$0xf0]  ;;  %v3948_v40 = vld [vmem:[#allocation11 + $0x84] sm:$0xf]  ;;  %p4694_p4 = pnand %p4693_p13, %p4689_p10 }
  0x8d   : > { %v3672_v37 = vor.u32 %v3950_v34, %v3669_v36  ;;  %v3949_v39 = vld [vmem:[#allocation11 + $0x8c] sm:$0xf0]  ;;  %v3661_v42 = vld [vmem:[#allocation11 + $0x90] sm:$0xf0]  ;;  %v733_v44 = vld [vmem:[%s5046_s5 + $0x60] sm:$0xff] }
  0x8e   : > { %4076 = vmatpush.bf16.msra.mxu1 %v3572_v17  ;;  %4077 = vmatpush.bf16.msra.mxu2 %v3572_v17  ;;  %v734_v45 = vld [vmem:[%s5046_s5 + $0x68] sm:$0xff]  ;;  %v3946_v48 = vld [vmem:[#allocation11 + $0x64] sm:$0xf]  ;;  %v3643_v55 = vld [vmem:[#allocation11 + $0x40] sm:$0xf] }
  0x8f   : > { %4078 = vmatpush.bf16.msra.mxu3 %v3572_v17  ;;  %629 = vmatpush.bf16.msra.mxu0 %v3572_v17  ;;  %v3685_v17 = vld [vmem:[#allocation11 + $0xf0] sm:$0xf0]  ;;  %v743_v51 = vpack.c.bf16 %v734_v45, %v733_v44  ;;  %v3944_v57 = vld [vmem:[#allocation11 + $0x44] sm:$0xf]  ;;  %v3943_v63 = vld [vmem:[#allocation11 + $0x2c] sm:$0xf0] }
  0x90   : > { %v3688_v19 = vor.u32 %v3954_v15, %v3685_v17  ;;  %v3942_v0 = vld [vmem:[#allocation11 + $0x24] sm:$0xf]  ;;  %v3637_v2 = vld [vmem:[#allocation11 + $0x30] sm:$0xf0]  ;;  %v3627_v7 = vld [vmem:[#allocation11] sm:$0xf] }
  0x91   : > { %v3940_v9 = vld [vmem:[#allocation11 + $0x4] sm:$0xf]  ;;  %v3629_v11 = vld [vmem:[#allocation11 + $0x10] sm:$0xf0] }
  0x92   : > { %4079 = vmatpush.bf16.msra.mxu1 %v3568_v20  ;;  %4080 = vmatpush.bf16.msra.mxu2 %v3568_v20  ;;  %v3632_v14 = vor.u32 %v3940_v9, %v3629_v11  ;;  %v735_v15 = vld [vmem:[%s5046_s5 + $0x70] sm:$0xff] }
  0x93   : > { %4081 = vmatpush.bf16.msra.mxu3 %v3568_v20  ;;  %630 = vmatpush.bf16.msra.mxu0 %v3568_v20  ;;  %v3675_v20 = vld [vmem:[#allocation11 + $0xc0] sm:$0xf] }
  0x94   : > { %v3676_v23 = vor.u32 %v3953_v21, %v3675_v20 }
  0x96   : > { %4082 = vmatpush.bf16.msra.mxu1 %v3564_v25  ;;  %4083 = vmatpush.bf16.msra.mxu2 %v3564_v25 }
  0x97   : > { %4084 = vmatpush.bf16.msra.mxu3 %v3564_v25  ;;  %631 = vmatpush.bf16.msra.mxu0 %v3564_v25  ;;  %v3680_v25 = vor.u32 %v3952_v22, %v3677_v24 }
  0x99   : > { %642 = vmatmul.bf16.vlgmr.msra.gmra.mxu1 %v553_v31  ;;  %652 = vmatmul.bf16.vlgmr.msra.gmra.mxu2 %v555_v8  ;;  %v3941_v8 = vld [vmem:[#allocation11 + $0xc] sm:$0xf0] }
  0x9a   : > { %810 = vmatpush.bf16.msrb.mxu1 %v3624_v28  ;;  %662 = vmatmul.bf16.vlgmr.msra.gmra.mxu3 %v557_v10  ;;  %v549_v28 = vld [vmem:[%s5061_s27 + $0x70] sm:$0xff]  ;;  %v3628_v10 = vor.u32 %v3941_v8, %v3627_v7 }
  0x9b   : > { %979 = vmatpush.bf16.msra.mxu2 %v3684_v16  ;;  %1028 = vmatpush.bf16.msrb.mxu3 %v3688_v19  ;;  %v558_v31 = vpack.c.bf16 %v550_v30, %v549_v28  ;;  %v736_v16 = vld [vmem:[%s5046_s5 + $0x78] sm:$0xff] }
  0x9e   : > { %811 = vmatpush.bf16.msrb.mxu1 %v3620_v32  ;;  %v3667_v32 = vld [vmem:[#allocation11 + $0xa0] sm:$0xf] }
  0x9f   : > { %980 = vmatpush.bf16.msra.mxu2 %v3676_v23  ;;  %1029 = vmatpush.bf16.msrb.mxu3 %v3680_v25 }
  0xa2   : > { %812 = vmatpush.bf16.msrb.mxu1 %v3616_v35  ;;  %v3668_v35 = vor.u32 %v3951_v33, %v3667_v32 }
  0xa3   : > { %1030 = vmatpush.bf16.msrb.mxu3 %v3672_v37 }
  0xa4   : > { %981 = vmatpush.bf16.msra.mxu2 %v3668_v35 }
  0xa6   : > { %813 = vmatpush.bf16.msrb.mxu1 %v3612_v38  ;;  %v3659_v38 = vld [vmem:[#allocation11 + $0x80] sm:$0xf] }
  0xa7   : > { %v3660_v41 = vor.u32 %v3949_v39, %v3659_v38 }
  0xa9   : > { %647 = vmatmul.bf16.gmra.mxu1 %v554_v46  ;;  %657 = vmatmul.bf16.gmra.mxu2 %v556_v29  ;;  %v3651_v46 = vld [vmem:[#allocation11 + $0x60] sm:$0xf] }
  0xaa   : > { %814 = vmatpush.bf16.msrb.mxu1 %v3608_v43  ;;  %667 = vmatmul.bf16.gmra.mxu3 %v558_v31  ;;  %v3664_v43 = vor.u32 %v3948_v40, %v3661_v42 }
  0xab   : > { %982 = vmatpush.bf16.msra.mxu2 %v3660_v41 }
  0xac   : > { %1031 = vmatpush.bf16.msrb.mxu3 %v3664_v43 }
  0xae   : > { %815 = vmatpush.bf16.msrb.mxu1 %v3604_v47  ;;  %v3947_v47 = vld [vmem:[#allocation11 + $0x6c] sm:$0xf0] }
  0xaf   : > { %v3652_v49 = vor.u32 %v3947_v47, %v3651_v46 }
  0xb1   : > { %983 = vmatpush.bf16.msra.mxu2 %v3652_v49 }
  0xb2   : > { %816 = vmatpush.bf16.msrb.mxu1 %v3600_v50  ;;  %v3653_v50 = vld [vmem:[#allocation11 + $0x70] sm:$0xf0] }
  0xb3   : > { %v3656_v52 = vor.u32 %v3946_v48, %v3653_v50 }
  0xb5   : > { %1032 = vmatpush.bf16.msrb.mxu3 %v3656_v52 }
  0xb6   : > { %817 = vmatpush.bf16.msrb.mxu1 %v3596_v53  ;;  %v533_v53 = vld [vmem:[#allocation14] sm:$0xff] }
  0xb7   : > { %v5101_v60 = vperm.slane %v533_v53, 2  ;;  %v5109_v27 = vperm.slane %v533_v53, 0 }
  0xb9   : > { %818 = vmatmul.bf16.vlgmr.msrb.gmra.mxu1 %v737_v56  ;;  %v3945_v56 = vld [vmem:[#allocation11 + $0x4c] sm:$0xf0] }
  0xba   : > { %v3644_v58 = vor.u32 %v3945_v56, %v3643_v55 }
  0xbc   : > { %984 = vmatpush.bf16.msra.mxu2 %v3644_v58 }
  0xc9   : > { %823 = vmatmul.bf16.gmra.mxu1 %v738_v59  ;;  %v3645_v59 = vld [vmem:[#allocation11 + $0x50] sm:$0xf0] }
  0xca   : > { %v3648_v61 = vor.u32 %v3944_v57, %v3645_v59 }
  0xcc   : > { %1033 = vmatpush.bf16.msrb.mxu3 %v3648_v61 }
  0xd9   : > { %828 = vmatmul.bf16.gmra.mxu1 %v739_v62  ;;  %v3635_v62 = vld [vmem:[#allocation11 + $0x20] sm:$0xf] }
  0xe9   : > { %833 = vmatmul.bf16.gmra.mxu1 %v740_v1  ;;  %v3636_v1 = vor.u32 %v3943_v63, %v3635_v62 }
  0xeb   : > { %985 = vmatpush.bf16.msra.mxu2 %v3636_v1 }
  0xef   : > { %986 = vmatpush.bf16.msra.mxu2 %v3628_v10 }
  0xf9   : > { %838 = vmatmul.bf16.gmra.mxu1 %v741_v4  ;;  %v3640_v4 = vor.u32 %v3942_v0, %v3637_v2 }
  0xfb   : > { %1034 = vmatpush.bf16.msrb.mxu3 %v3640_v4 }
  0xff   : > { %1035 = vmatpush.bf16.msrb.mxu3 %v3632_v14 }
 0x109   : > { %843 = vmatmul.bf16.gmra.mxu1 %v742_v18  ;;  %v744_v18 = vpack.c.bf16 %v736_v16, %v735_v15 }
 0x116   : > { %v643_v54 = vpop.f32.mrf.mxu1 }
 0x117   : > { %v644_v3 = vadd.f32 %v643_v54, %v5101_v60 }
 0x119   : > { %848 = vmatmul.bf16.gmra.mxu1 %v743_v51  ;;  %v677_v12 = vmax.f32 %v644_v3, 0.0 }
 0x11c   : > { %v653_v59 = vpop.f32.mrf.mxu2 }
 0x11d   : > { %v663_v61 = vpop.f32.mrf.mxu3  ;;  %v654_v1 = vadd.f32 %v653_v59, %v5101_v60 }
 0x11e   : > { %v645_v5 = vpop.f32.mrf.mxu1  ;;  %v664_v2 = vadd.f32 %v663_v61, %v5101_v60 }
 0x11f   : > { %v646_v6 = vadd.f32 %v645_v5, %v5101_v60 }
 0x120   : > { %v685_v7 = vmax.f32 %v664_v2, 0.0 }
 0x121   : > { %v678_v13 = vmax.f32 %v646_v6, 0.0  ;;  %v681_v6 = vmax.f32 %v654_v1, 0.0 }
 0x123   : > { %v4027_v17 = vpack.c.bf16 %v678_v13, %v677_v12 }
 0x124   : > { %v655_v4 = vpop.f32.mrf.mxu2 }
 0x125   : > { %4055 = vst [vmem:[#allocation2 + $0x18] sm:$0xff] %v4027_v17   ;;  %v665_v5 = vpop.f32.mrf.mxu3  ;;  %v656_v8 = vadd.f32 %v655_v4, %v5101_v60 }
 0x126   : > { %v648_v19 = vpop.f32.mrf.mxu1  ;;  %v666_v9 = vadd.f32 %v665_v5, %v5101_v60 }
 0x127   : > { %v649_v20 = vadd.f32 %v648_v19, %v5101_v60  ;;  %v682_v10 = vmax.f32 %v656_v8, 0.0 }
 0x128   : > { %v686_v11 = vmax.f32 %v666_v9, 0.0 }
 0x129   : > { %853 = vmatmul.bf16.gmra.mxu1 %v744_v18  ;;  %v679_v23 = vmax.f32 %v649_v20, 0.0  ;;  %v4037_v13 = vpack.c.bf16 %v682_v10, %v681_v6 }
 0x12a   : > { %v4047_v14 = vpack.c.bf16 %v686_v11, %v685_v7 }
 0x12b   : > { %4057 = vst [vmem:[#allocation2 + $0x8] sm:$0xff] %v4037_v13   ;;  %v535_v13 = vld [vmem:[%s5061_s27] sm:$0xff] }
 0x12c   : > { %4059 = vst [vmem:[#allocation2 + $0x28] sm:$0xff] %v4047_v14   ;;  %v658_v17 = vpop.f32.mrf.mxu2  ;;  %v536_v14 = vld [vmem:[%s5061_s27 + $0x8] sm:$0xff] }
 0x12d   : > { %v668_v18 = vpop.f32.mrf.mxu3 }
 0x12e   : > { %v650_v21 = vpop.f32.mrf.mxu1 }
 0x12f   : > { %v651_v22 = vadd.f32 %v650_v21, %v5101_v60 }
 0x131   : > { %v680_v24 = vmax.f32 %v651_v22, 0.0  ;;  %v659_v22 = vadd.f32 %v658_v17, %v5101_v60 }
 0x133   : > { %v4032_v25 = vpack.c.bf16 %v680_v24, %v679_v23  ;;  %v669_v23 = vadd.f32 %v668_v18, %v5101_v60 }
 0x135   : > { %4056 = vst [vmem:[#allocation2 + $0x10] sm:$0xff] %v4032_v25   ;;  %v660_v25 = vpop.f32.mrf.mxu2 }
 0x136   : > { %v819_v26 = vpop.f32.mrf.mxu1 }
 0x137   : > { %v820_v28 = vadd.f32 %v819_v26, %v5109_v27  ;;  %v670_v26 = vpop.f32.mrf.mxu3 }
 0x139   : > { %v859_v31 = vmax.f32 %v820_v28, 0.0  ;;  %v683_v28 = vmax.f32 %v659_v22, 0.0 }
 0x13e   : > { %v821_v29 = vpop.f32.mrf.mxu1 }
 0x13f   : > { %v822_v30 = vadd.f32 %v821_v29, %v5109_v27  ;;  %v687_v29 = vmax.f32 %v669_v23, 0.0 }
 0x141   : > { %v860_v32 = vmax.f32 %v822_v30, 0.0  ;;  %v661_v30 = vadd.f32 %v660_v25, %v5101_v60 }
 0x143   : > { %v875_v33 = vpack.c.bf16 %v860_v32, %v859_v31  ;;  %v671_v31 = vadd.f32 %v670_v26, %v5101_v60  ;;  %v684_v32 = vmax.f32 %v661_v30, 0.0 }
 0x145   : > { %987 = vmatmul.bf16.vlgmr.msra.gmra.mxu2 %v875_v33  ;;  %1036 = vmatmul.bf16.vlgmr.msrb.gmra.mxu3 %v875_v33  ;;  %v688_v33 = vmax.f32 %v671_v31, 0.0 }
 0x146   : > { %v824_v34 = vpop.f32.mrf.mxu1 }
 0x147   : > { %v825_v35 = vadd.f32 %v824_v34, %v5109_v27 }
 0x149   : > { %v861_v38 = vmax.f32 %v825_v35, 0.0  ;;  %v4042_v35 = vpack.c.bf16 %v684_v32, %v683_v28 }
 0x14b   : > { %4058 = vst [vmem:[#allocation2 + $0x20] sm:$0xff] %v4042_v35  }
 0x14e   : > { %v826_v36 = vpop.f32.mrf.mxu1 }
 0x14f   : > { %v827_v37 = vadd.f32 %v826_v36, %v5109_v27  ;;  %v4052_v36 = vpack.c.bf16 %v688_v33, %v687_v29 }
 0x151   : > { %v862_v39 = vmax.f32 %v827_v37, 0.0  ;;  %4060 = vst [vmem:[#allocation2 + $0x38] sm:$0xff] %v4052_v36  }
 0x153   : > { %v876_v40 = vpack.c.bf16 %v862_v39, %v861_v38 }
 0x155   : > { %992 = vmatmul.bf16.gmra.mxu2 %v876_v40  ;;  %1041 = vmatmul.bf16.gmra.mxu3 %v876_v40 }
 0x156   : > { %v829_v41 = vpop.f32.mrf.mxu1 }
 0x157   : > { %v830_v42 = vadd.f32 %v829_v41, %v5109_v27 }
 0x159   : > { %v863_v45 = vmax.f32 %v830_v42, 0.0 }
 0x15e   : > { %v831_v43 = vpop.f32.mrf.mxu1 }
 0x15f   : > { %v832_v44 = vadd.f32 %v831_v43, %v5109_v27 }
 0x161   : > { %v864_v46 = vmax.f32 %v832_v44, 0.0 }
 0x163   : > { %v877_v47 = vpack.c.bf16 %v864_v46, %v863_v45 }
 0x165   : > { %997 = vmatmul.bf16.gmra.mxu2 %v877_v47  ;;  %1046 = vmatmul.bf16.gmra.mxu3 %v877_v47 }
 0x166   : > { %v834_v48 = vpop.f32.mrf.mxu1 }
 0x167   : > { %v835_v49 = vadd.f32 %v834_v48, %v5109_v27 }
 0x169   : > { %v865_v52 = vmax.f32 %v835_v49, 0.0 }
 0x16e   : > { %v836_v50 = vpop.f32.mrf.mxu1 }
 0x16f   : > { %v837_v51 = vadd.f32 %v836_v50, %v5109_v27 }
 0x171   : > { %v866_v53 = vmax.f32 %v837_v51, 0.0 }
 0x173   : > { %v878_v54 = vpack.c.bf16 %v866_v53, %v865_v52 }
 0x175   : > { %1002 = vmatmul.bf16.gmra.mxu2 %v878_v54  ;;  %1051 = vmatmul.bf16.gmra.mxu3 %v878_v54 }
 0x176   : > { %v839_v55 = vpop.f32.mrf.mxu1 }
 0x177   : > { %v840_v56 = vadd.f32 %v839_v55, %v5109_v27 }
 0x179   : > { %v867_v62 = vmax.f32 %v840_v56, 0.0 }
 0x17e   : > { %v841_v57 = vpop.f32.mrf.mxu1 }
 0x17f   : > { %v842_v58 = vadd.f32 %v841_v57, %v5109_v27 }
 0x181   : > { %v868_v63 = vmax.f32 %v842_v58, 0.0 }
 0x183   : > { %v879_v0 = vpack.c.bf16 %v868_v63, %v867_v62 }
 0x185   : > { %1007 = vmatmul.bf16.gmra.mxu2 %v879_v0  ;;  %1056 = vmatmul.bf16.gmra.mxu3 %v879_v0 }
 0x186   : > { %v844_v3 = vpop.f32.mrf.mxu1 }
 0x187   : > { %v845_v12 = vadd.f32 %v844_v3, %v5109_v27 }
 0x189   : > { %v869_v19 = vmax.f32 %v845_v12, 0.0 }
 0x18e   : > { %v846_v15 = vpop.f32.mrf.mxu1 }
 0x18f   : > { %v847_v16 = vadd.f32 %v846_v15, %v5109_v27  ;;  %v551_v15 = vpack.c.bf16 %v536_v14, %v535_v13 }
 0x191   : > { %v870_v20 = vmax.f32 %v847_v16, 0.0  ;;  %632 = vmatmul.bf16.vlgmr.msra.gmra.mxu0 %v551_v15 }
 0x193   : > { %v880_v21 = vpack.c.bf16 %v870_v20, %v869_v19 }
 0x195   : > { %1012 = vmatmul.bf16.gmra.mxu2 %v880_v21  ;;  %1061 = vmatmul.bf16.gmra.mxu3 %v880_v21 }
 0x196   : > { %v849_v24 = vpop.f32.mrf.mxu1 }
 0x197   : > { %v850_v34 = vadd.f32 %v849_v24, %v5109_v27 }
 0x199   : > { %v871_v39 = vmax.f32 %v850_v34, 0.0 }
 0x19e   : > { %v851_v37 = vpop.f32.mrf.mxu1 }
 0x19f   : > { %v852_v38 = vadd.f32 %v851_v37, %v5109_v27 }
 0x1a1   : > { %v872_v40 = vmax.f32 %v852_v38, 0.0  ;;  %v537_v38 = vld [vmem:[%s5061_s27 + $0x10] sm:$0xff] }
 0x1a3   : > { %v881_v41 = vpack.c.bf16 %v872_v40, %v871_v39  ;;  %v538_v39 = vld [vmem:[%s5061_s27 + $0x18] sm:$0xff] }
 0x1a5   : > { %1017 = vmatmul.bf16.gmra.mxu2 %v881_v41  ;;  %1066 = vmatmul.bf16.gmra.mxu3 %v881_v41 }
 0x1a6   : > { %v854_v42 = vpop.f32.mrf.mxu1 }
 0x1a7   : > { %v855_v43 = vadd.f32 %v854_v42, %v5109_v27  ;;  %v552_v42 = vpack.c.bf16 %v538_v39, %v537_v38 }
 0x1a9   : > { %v873_v46 = vmax.f32 %v855_v43, 0.0  ;;  %637 = vmatmul.bf16.gmra.mxu0 %v552_v42 }
 0x1ae   : > { %v856_v44 = vpop.f32.mrf.mxu1 }
 0x1af   : > { %v857_v45 = vadd.f32 %v856_v44, %v5109_v27 }
 0x1b1   : > { %v874_v47 = vmax.f32 %v857_v45, 0.0 }
 0x1b3   : > { %v882_v48 = vpack.c.bf16 %v874_v47, %v873_v46 }
 0x1b5   : > { %1022 = vmatmul.bf16.gmra.mxu2 %v882_v48  ;;  %1071 = vmatmul.bf16.gmra.mxu3 %v882_v48 }
 0x1c8   : > { %v988_v49 = vpop.f32.mrf.mxu2  ;;  %v1037_v50 = vpop.f32.mrf.mxu3 }
 0x1c9   : > { %v5135_v51 = vpack.c.bf16 %v1037_v50, %v988_v49 }
 0x1d0   : > { %v5137_v52 = vpop.f32.mrf.mxu2  ;;  %v5139_v53 = vpop.f32.mrf.mxu3 }
 0x1d8   : > { %v993_v54 = vpop.f32.mrf.mxu2  ;;  %v1042_v55 = vpop.f32.mrf.mxu3 }
 0x1d9   : > { %v5141_v56 = vpack.c.bf16 %v1042_v55, %v993_v54 }
 0x1e0   : > { %v5143_v57 = vpop.f32.mrf.mxu2  ;;  %v5145_v27 = vpop.f32.mrf.mxu3 }
 0x1e8   : > { %v998_v58 = vpop.f32.mrf.mxu2  ;;  %v1047_v59 = vpop.f32.mrf.mxu3 }
 0x1e9   : > { %v5147_v61 = vpack.c.bf16 %v1047_v59, %v998_v58 }
 0x1f0   : > { %v5149_v62 = vpop.f32.mrf.mxu2  ;;  %v5151_v63 = vpop.f32.mrf.mxu3 }
 0x1f8   : > { %v1003_v0 = vpop.f32.mrf.mxu2  ;;  %v1052_v1 = vpop.f32.mrf.mxu3 }
 0x1f9   : > { %v5153_v2 = vpack.c.bf16 %v1052_v1, %v1003_v0 }
 0x200   : > { %v1005_v3 = vpop.f32.mrf.mxu2  ;;  %v1054_v4 = vpop.f32.mrf.mxu3 }
 0x201   : > { %v1084_v55 = vpack.c.bf16 %v1054_v4, %v1005_v3  ;;  %v1131_v3 = vunpack.c.l.b16 %v5153_v2  ;;  %v1080_v4 = vpack.c.bf16 %v5145_v27, %v5143_v57  ;;  %v1127_v57 = vunpack.c.l.b16 %v5141_v56 }
 0x208   : > { %v1008_v5 = vpop.f32.mrf.mxu2  ;;  %v1057_v6 = vpop.f32.mrf.mxu3 }
 0x209   : > { %v1085_v49 = vpack.c.bf16 %v1057_v6, %v1008_v5  ;;  %v1132_v5 = vunpack.c.l.b16 %v1084_v55  ;;  %v1179_v6 = vunpack.c.h.b16 %v5153_v2 }
 0x20b   : > { %v1144_v15 = vpack.c.b16 %v1132_v5, %v1131_v3  ;;  %v1094_v5 = vld [vmem:[#allocation15 + $0x8] sm:$0xff] }
 0x20c   : > { %v1102_v3 = vld [vmem:[#allocation15 + $0x48] sm:$0xff] }
 0x210   : > { %v1010_v7 = vpop.f32.mrf.mxu2  ;;  %v1059_v8 = vpop.f32.mrf.mxu3 }
 0x211   : > { %v1086_v44 = vpack.c.bf16 %v1059_v8, %v1010_v7  ;;  %v1082_v7 = vpack.c.bf16 %v5151_v63, %v5149_v62  ;;  %v1180_v8 = vunpack.c.h.b16 %v1084_v55  ;;  %v1129_v62 = vunpack.c.l.b16 %v5147_v61 }
 0x212   : > { %v1078_v63 = vpack.c.bf16 %v5139_v53, %v5137_v52 }
 0x213   : > { %v1182_v58 = vunpack.c.h.b16 %v1086_v44  ;;  %v1134_v1 = vunpack.c.l.b16 %v1086_v44  ;;  %v1178_v13 = vunpack.c.h.b16 %v1082_v7  ;;  %v1192_v14 = vpack.c.b16 %v1180_v8, %v1179_v6  ;;  %v1097_v44 = vld [vmem:[#allocation15 + $0x20] sm:$0xff]  ;;  %v1100_v6 = vld [vmem:[#allocation15 + $0x38] sm:$0xff] }
 0x214   : > { %v1174_v27 = vunpack.c.h.b16 %v1078_v63 }
 0x218   : > { %v1013_v9 = vpop.f32.mrf.mxu2  ;;  %v1062_v10 = vpop.f32.mrf.mxu3 }
 0x219   : > { %v1087_v40 = vpack.c.bf16 %v1062_v10, %v1013_v9  ;;  %v1181_v9 = vunpack.c.h.b16 %v1085_v49  ;;  %v1133_v10 = vunpack.c.l.b16 %v1085_v49  ;;  %v1095_v49 = vld [vmem:[#allocation15 + $0x10] sm:$0xff] }
 0x21b   : > { %v1183_v50 = vunpack.c.h.b16 %v1087_v40  ;;  %v1135_v54 = vunpack.c.l.b16 %v1087_v40 }
 0x220   : > { %v1015_v11 = vpop.f32.mrf.mxu2  ;;  %v1064_v12 = vpop.f32.mrf.mxu3 }
 0x221   : > { %v1088_v33 = vpack.c.bf16 %v1064_v12, %v1015_v11  ;;  %v1193_v11 = vpack.c.b16 %v1182_v58, %v1181_v9  ;;  %v1145_v12 = vpack.c.b16 %v1134_v1, %v1133_v10 }
 0x223   : > { %v1184_v45 = vunpack.c.h.b16 %v1088_v33  ;;  %v1136_v48 = vunpack.c.l.b16 %v1088_v33 }
 0x225   : > { %v1194_v59 = vpack.c.b16 %v1184_v45, %v1183_v50  ;;  %v1146_v0 = vpack.c.b16 %v1136_v48, %v1135_v54  ;;  %v1099_v50 = vld [vmem:[#allocation15 + $0x30] sm:$0xff] }
 0x228   : > { %v1018_v16 = vpop.f32.mrf.mxu2  ;;  %v1067_v17 = vpop.f32.mrf.mxu3 }
 0x229   : > { %v1089_v28 = vpack.c.bf16 %v1067_v17, %v1018_v16  ;;  %v1130_v16 = vunpack.c.l.b16 %v1082_v7  ;;  %v1177_v17 = vunpack.c.h.b16 %v5147_v61  ;;  %v1173_v61 = vunpack.c.h.b16 %v5135_v51 }
 0x22b   : > { %v1185_v41 = vunpack.c.h.b16 %v1089_v28  ;;  %v1137_v43 = vunpack.c.l.b16 %v1089_v28  ;;  %v1143_v2 = vpack.c.b16 %v1130_v16, %v1129_v62  ;;  %v1189_v52 = vpack.c.b16 %v1174_v27, %v1173_v61  ;;  %v1103_v16 = vld [vmem:[#allocation15 + $0x50] sm:$0xff]  ;;  %v1106_v62 = vld [vmem:[#allocation15 + $0x68] sm:$0xff]  ;;  %v1108_v61 = vld [vmem:[#allocation15 + $0x78] sm:$0xff] }
 0x230   : > { %v1020_v18 = vpop.f32.mrf.mxu2  ;;  %v1069_v19 = vpop.f32.mrf.mxu3 }
 0x231   : > { %v1090_v25 = vpack.c.bf16 %v1069_v19, %v1020_v18  ;;  %v1176_v18 = vunpack.c.h.b16 %v1080_v4  ;;  %v1191_v19 = vpack.c.b16 %v1178_v13, %v1177_v17  ;;  %v1096_v13 = vld [vmem:[#allocation15 + $0x18] sm:$0xff] }
 0x232   : > { %v1104_v17 = vld [vmem:[#allocation15 + $0x58] sm:$0xff] }
 0x233   : > { %v1186_v34 = vunpack.c.h.b16 %v1090_v25  ;;  %v1138_v37 = vunpack.c.l.b16 %v1090_v25  ;;  %v1125_v25 = vunpack.c.l.b16 %v5135_v51 }
 0x235   : > { %v1195_v46 = vpack.c.b16 %v1186_v34, %v1185_v41  ;;  %v1147_v47 = vpack.c.b16 %v1138_v37, %v1137_v43  ;;  %v1093_v43 = vld [vmem:[#allocation15] sm:$0xff] }
 0x238   : > { %v1023_v20 = vpop.f32.mrf.mxu2  ;;  %v1072_v21 = vpop.f32.mrf.mxu3 }
 0x239   : > { %v1091_v22 = vpack.c.bf16 %v1072_v21, %v1023_v20  ;;  %v1128_v20 = vunpack.c.l.b16 %v1080_v4  ;;  %v1175_v21 = vunpack.c.h.b16 %v5141_v56  ;;  %v633_v56 = vpop.f32.mrf.mxu0 }
 0x23b   : > { %v1187_v29 = vunpack.c.h.b16 %v1091_v22  ;;  %v1139_v31 = vunpack.c.l.b16 %v1091_v22  ;;  %v1190_v22 = vpack.c.b16 %v1176_v18, %v1175_v21  ;;  %v1105_v21 = vld [vmem:[#allocation15 + $0x60] sm:$0xff] }
 0x240   : > { %v1025_v23 = vpop.f32.mrf.mxu2  ;;  %v1074_v24 = vpop.f32.mrf.mxu3 }
 0x241   : > { %v1092_v26 = vpack.c.bf16 %v1074_v24, %v1025_v23  ;;  %v1142_v23 = vpack.c.b16 %v1128_v20, %v1127_v57  ;;  %v1126_v24 = vunpack.c.l.b16 %v1078_v63  ;;  %v635_v28 = vpop.f32.mrf.mxu0  ;;  %v1107_v57 = vld [vmem:[#allocation15 + $0x70] sm:$0xff] }
 0x242   : > { %v636_v51 = vadd.f32 %v635_v28, %v5101_v60 }
 0x243   : > { %v1188_v30 = vunpack.c.h.b16 %v1092_v26  ;;  %v1140_v32 = vunpack.c.l.b16 %v1092_v26  ;;  %v1141_v53 = vpack.c.b16 %v1126_v24, %v1125_v25  ;;  %v634_v26 = vadd.f32 %v633_v56, %v5101_v60 }
 0x245   : > { %v1196_v35 = vpack.c.b16 %v1188_v30, %v1187_v29  ;;  %v1148_v36 = vpack.c.b16 %v1140_v32, %v1139_v31  ;;  %v673_v29 = vmax.f32 %v634_v26, 0.0  ;;  %v674_v30 = vmax.f32 %v636_v51, 0.0 }
 0x247   : > { %1205 = vmatpush.bf16.msra.mxu0 %v1196_v35  ;;  %v4017_v31 = vpack.c.bf16 %v674_v30, %v673_v29 }
 0x249   : > { %4018 = vst [vmem:[#allocation2 + $0x30] sm:$0xff] %v4017_v31   ;;  %v638_v32 = vpop.f32.mrf.mxu0 }
 0x24a   : > { %v639_v33 = vadd.f32 %v638_v32, %v5101_v60 }
 0x24b   : > { %4088 = vmatpush.lsf.bf16.msrb.mxu0 %v1148_v36 }
 0x24c   : > { %v675_v35 = vmax.f32 %v639_v33, 0.0 }
 0x24f   : > { %1206 = vmatpush.bf16.msra.mxu0 %v1195_v46 }
 0x251   : > { %v640_v34 = vpop.f32.mrf.mxu0 }
 0x252   : > { %v641_v36 = vadd.f32 %v640_v34, %v5101_v60 }
 0x253   : > { %4089 = vmatpush.lsf.bf16.msrb.mxu0 %v1147_v47 }
 0x254   : > { %v676_v37 = vmax.f32 %v641_v36, 0.0 }
 0x256   : > { %v4022_v38 = vpack.c.bf16 %v676_v37, %v675_v35 }
 0x257   : > { %1207 = vmatpush.bf16.msra.mxu0 %v1194_v59 }
 0x258   : > { %4054 = vst [vmem:[#allocation2] sm:$0xff] %v4022_v38  }
 0x25b   : > { %4090 = vmatpush.lsf.bf16.msrb.mxu0 %v1146_v0 }
 0x25f   : > { %1208 = vmatpush.bf16.msra.mxu0 %v1193_v11 }
 0x263   : > { %4091 = vmatpush.lsf.bf16.msrb.mxu0 %v1145_v12  ;;  %v1098_v12 = vld [vmem:[#allocation15 + $0x28] sm:$0xff] }
 0x267   : > { %1209 = vmatpush.bf16.msra.mxu0 %v1192_v14 }
 0x26b   : > { %4092 = vmatpush.lsf.bf16.msrb.mxu0 %v1144_v15  ;;  %v1101_v15 = vld [vmem:[#allocation15 + $0x40] sm:$0xff] }
 0x26f   : > { %1210 = vmatpush.bf16.msra.mxu0 %v1191_v19 }
 0x273   : > { %4093 = vmatpush.lsf.bf16.msrb.mxu0 %v1143_v2 }
 0x277   : > { %1211 = vmatpush.bf16.msra.mxu0 %v1190_v22 }
 0x27b   : > { %4094 = vmatpush.lsf.bf16.msrb.mxu0 %v1142_v23 }
 0x27f   : > { %1212 = vmatpush.bf16.msra.mxu0 %v1189_v52 }
 0x283   : > { %4095 = vmatpush.lsf.bf16.msrb.mxu0 %v1141_v53 }
 0x285   : > { %4096 = vllmr.16.mxu0 }
 0x2a6   : > { %4097 = vmatmul.lmr.bf16.vlgmr.msra.gmra.16.mxu0 }
 0x2ae   : > { %4098 = vmatmul.lmr.bf16.gmra.16.mxu0 }
 0x2b6   : > { %4099 = vmatmul.lmr.bf16.gmra.16.mxu0 }
 0x2be   : > { %4100 = vmatmul.lmr.bf16.gmra.16.mxu0 }
 0x2c6   : > { %4101 = vmatmul.lmr.bf16.gmra.16.mxu0 }
 0x2ce   : > { %4102 = vmatmul.lmr.bf16.gmra.16.mxu0 }
 0x2d6   : > { %4103 = vmatmul.lmr.bf16.gmra.16.mxu0 }
 0x2de   : > { %4104 = vmatmul.lmr.bf16.gmra.16.mxu0 }
 0x2e6   : > { %4105 = vmatmul.lmr.bf16.gmra.16.mxu0 }
 0x2ee   : > { %4106 = vmatmul.lmr.bf16.gmra.16.mxu0 }
 0x2f6   : > { %4107 = vmatmul.lmr.bf16.gmra.16.mxu0 }
 0x2fe   : > { %4108 = vmatmul.lmr.bf16.gmra.16.mxu0 }
 0x306   : > { %4109 = vmatmul.lmr.bf16.gmra.16.mxu0 }
 0x30e   : > { %4110 = vmatmul.lmr.bf16.gmra.16.mxu0 }
 0x316   : > { %4111 = vmatmul.lmr.bf16.gmra.16.mxu0 }
 0x31e   : > { %4112 = vmatmul.lmr.bf16.gmra.16.mxu0 }
 0x323   : > { %v1214_v39 = vpop.f32.mrf.mxu0 }
 0x324   : > { %v5177_v46 = vadd.f32 %v1214_v39, %v1093_v43 }
 0x32b   : > { %v1216_v40 = vpop.f32.mrf.mxu0 }
 0x32c   : > { %v1217_v63 = vadd.f32 %v1216_v40, %v1094_v5 }
 0x333   : > { %v1219_v41 = vpop.f32.mrf.mxu0 }
 0x334   : > { %v5183_v55 = vadd.f32 %v1219_v41, %v1095_v49 }
 0x33b   : > { %v1221_v42 = vpop.f32.mrf.mxu0 }
 0x33c   : > { %v1222_v2 = vadd.f32 %v1221_v42, %v1096_v13 }
 0x343   : > { %v1224_v45 = vpop.f32.mrf.mxu0 }
 0x344   : > { %v5179_v47 = vadd.f32 %v1224_v45, %v1097_v44 }
 0x346   : > { %v1254_v60 = vmax.f32 %v5177_v46, %v5179_v47 }
 0x34b   : > { %v1226_v48 = vpop.f32.mrf.mxu0 }
 0x34c   : > { %v1227_v14 = vadd.f32 %v1226_v48, %v1098_v12 }
 0x34e   : > { %v1255_v27 = vmax.f32 %v1217_v63, %v1227_v14 }
 0x353   : > { %v1229_v54 = vpop.f32.mrf.mxu0 }
 0x354   : > { %v5185_v58 = vadd.f32 %v1229_v54, %v1099_v50 }
 0x356   : > { %v1256_v59 = vmax.f32 %v5183_v55, %v5185_v58 }
 0x35b   : > { %v1231_v0 = vpop.f32.mrf.mxu0 }
 0x35c   : > { %v5189_v18 = vadd.f32 %v1231_v0, %v1100_v6 }
 0x35e   : > { %v1257_v25 = vmax.f32 %v1222_v2, %v5189_v18 }
 0x363   : > { %v1234_v1 = vpop.f32.mrf.mxu0 }
 0x364   : > { %v5193_v20 = vadd.f32 %v1234_v1, %v1101_v15  ;;  %v3779_v15 = vld [vmem:[#allocation9 + $0x94] sm:$0xf] }
 0x366   : > { %v1258_v26 = vmax.f32 %v1254_v60, %v5193_v20 }
 0x36b   : > { %v1236_v9 = vpop.f32.mrf.mxu0 }
 0x36c   : > { %v5191_v19 = vadd.f32 %v1236_v9, %v1102_v3 }
 0x36e   : > { %v1259_v52 = vmax.f32 %v1255_v27, %v5191_v19  ;;  %v3775_v27 = vld [vmem:[#allocation9 + $0x7c] sm:$0xf] }
 0x373   : > { %v1239_v10 = vpop.f32.mrf.mxu0 }
 0x374   : > { %v5195_v22 = vadd.f32 %v1239_v10, %v1103_v16  ;;  %v3978_v16 = vld [vmem:[#allocation9 + $0x9c] sm:$0xf0] }
 0x376   : > { %v1260_v29 = vmax.f32 %v1256_v59, %v5195_v22 }
 0x37b   : > { %v1241_v7 = vpop.f32.mrf.mxu0 }
 0x37c   : > { %v5197_v23 = vadd.f32 %v1241_v7, %v1104_v17  ;;  %v3979_v7 = vld [vmem:[#allocation9 + $0xb4] sm:$0xf0] }
 0x37e   : > { %v1261_v51 = vmax.f32 %v1257_v25, %v5197_v23 }
 0x383   : > { %v1244_v8 = vpop.f32.mrf.mxu0 }
 0x384   : > { %v5203_v53 = vadd.f32 %v1244_v8, %v1105_v21 }
 0x386   : > { %v1262_v32 = vmax.f32 %v1258_v26, %v5203_v53 }
 0x38b   : > { %v1246_v11 = vpop.f32.mrf.mxu0 }
 0x38c   : > { %v5199_v24 = vadd.f32 %v1246_v11, %v1106_v62 }
 0x38e   : > { %v1263_v30 = vmax.f32 %v1259_v52, %v5199_v24 }
 0x390   : > { %v1266_v35 = vmax.f32 %v1262_v32, %v1263_v30  ;;  %v3771_v32 = vld [vmem:[#allocation9 + $0x64] sm:$0xf] }
 0x393   : > { %v1249_v4 = vpop.f32.mrf.mxu0 }
 0x394   : > { %v5205_v56 = vadd.f32 %v1249_v4, %v1107_v57 }
 0x396   : > { %v1264_v33 = vmax.f32 %v1260_v29, %v5205_v56 }
 0x39b   : > { %v1251_v28 = vpop.f32.mrf.mxu0 }
 0x39c   : > { %v5211_v31 = vadd.f32 %v1251_v28, %v1108_v61  ;;  %v3977_v61 = vld [vmem:[#allocation9 + $0x84] sm:$0xf0] }
 0x39d   : > { %v3776_v26 = vor.u32 %v3977_v61, %v3775_v27  ;;  %v2015_v27 = vld [vmem:[%s5054_s25 + $0x10] sm:$0xff]  ;;  %v2016_v61 = vld [vmem:[%s5054_s25 + $0x18] sm:$0xff] }
 0x39e   : > { %v1265_v34 = vmax.f32 %v1261_v51, %v5211_v31 }
 0x3a0   : > { %v1267_v36 = vmax.f32 %v1264_v33, %v1265_v34  ;;  %v3976_v33 = vld [vmem:[#allocation9 + $0x6c] sm:$0xf0]  ;;  %v3767_v34 = vld [vmem:[#allocation9 + $0x4c] sm:$0xf] }
 0x3a2   : > { %v1268_v37 = vmax.f32 %v1266_v35, %v1267_v36 }
 0x3a4   : > { %v1269_v38 = vrot.slane %v1268_v37, 4 }
 0x3a6   : > { %v1270_v39 = vmax.f32 %v1268_v37, %v1269_v38  ;;  %v3772_v37 = vor.u32 %v3976_v33, %v3771_v32  ;;  %v3975_v38 = vld [vmem:[#allocation9 + $0x54] sm:$0xf0] }
 0x3a8   : > { %v1271_v40 = vrot.slane %v1270_v39, 2 }
 0x3aa   : > { %v1272_v41 = vmax.f32 %v1270_v39, %v1271_v40 }
 0x3ac   : > { %v1273_v42 = vrot.slane %v1272_v41, 1 }
 0x3ae   : > { %v5216_v43 = vmax.f32 %v1272_v41, %v1273_v42  ;;  %v3768_v42 = vor.u32 %v3975_v38, %v3767_v34 }
 0x3b0   : > { %v1275_v44 = vsub.f32 %v5177_v46, %v5216_v43  ;;  %v1276_v45 = vsub.f32 %v1217_v63, %v5216_v43  ;;  %v1277_v60 = vsub.f32 %v5183_v55, %v5216_v43  ;;  %v1279_v48 = vsub.f32 %v5179_v47, %v5216_v43 }
 0x3b1   : > { %v1281_v49 = vsub.f32 %v5185_v58, %v5216_v43  ;;  %v1278_v50 = vsub.f32 %v1222_v2, %v5216_v43  ;;  %v1280_v1 = vsub.f32 %v1227_v14, %v5216_v43  ;;  %v1282_v55 = vsub.f32 %v5189_v18, %v5216_v43  ;;  %v3783_v58 = vld [vmem:[#allocation9 + $0xac] sm:$0xf] }
 0x3b2   : > { %v1291_v54 = vmul.f32 1.442695, %v1275_v44  ;;  %v1293_v59 = vmul.f32 1.442695, %v1276_v45  ;;  %v1295_v0 = vmul.f32 1.442695, %v1277_v60  ;;  %v1283_v11 = vsub.f32 %v5193_v20, %v5216_v43 }
 0x3b3   : > { %v1297_v46 = vmul.f32 1.442695, %v1278_v50  ;;  %v1299_v9 = vmul.f32 1.442695, %v1279_v48  ;;  %v1301_v47 = vmul.f32 1.442695, %v1280_v1  ;;  %v3784_v5 = vor.u32 %v3979_v7, %v3783_v58 }
 0x3b4   : > { %4262 = vpow2.f32 %v1291_v54  ;;  %v1303_v12 = vmul.f32 1.442695, %v1281_v49  ;;  %v1284_v4 = vsub.f32 %v5191_v19, %v5216_v43  ;;  %v1305_v13 = vmul.f32 1.442695, %v1282_v55  ;;  %v3763_v45 = vld [vmem:[#allocation9 + $0x34] sm:$0xf] }
 0x3b5   : > { %4264 = vpow2.f32 %v1293_v59  ;;  %2102 = vmatpush.bf16.msra.mxu3 %v3784_v5  ;;  %v1285_v62 = vsub.f32 %v5195_v22, %v5216_v43  ;;  %v1307_v63 = vmul.f32 1.442695, %v1283_v11  ;;  %v3780_v18 = vor.u32 %v3978_v16, %v3779_v15  ;;  %v3974_v60 = vld [vmem:[#allocation9 + $0x3c] sm:$0xf0]  ;;  %v3759_v1 = vld [vmem:[#allocation9 + $0x1c] sm:$0xf] }
 0x3b6   : > { %4266 = vpow2.f32 %v1295_v0  ;;  %v1286_v19 = vsub.f32 %v5197_v23, %v5216_v43  ;;  %v1309_v21 = vmul.f32 1.442695, %v1284_v4  ;;  %v1287_v22 = vsub.f32 %v5203_v53, %v5216_v43  ;;  %v3755_v58 = vld [vmem:[#allocation9 + $0x4] sm:$0xf]  ;;  %v3972_v7 = vld [vmem:[#allocation9 + $0xc] sm:$0xf0] }
 0x3b7   : > { %4268 = vpow2.f32 %v1297_v46  ;;  %v1311_v52 = vmul.f32 1.442695, %v1285_v62  ;;  %v1288_v23 = vsub.f32 %v5199_v24, %v5216_v43  ;;  %v1289_v53 = vsub.f32 %v5205_v56, %v5216_v43  ;;  %v3973_v46 = vld [vmem:[#allocation9 + $0x24] sm:$0xf0]  ;;  %v2013_v4 = vld [vmem:[%s5054_s25] sm:$0xff] }
 0x3b8   : > { %4270 = vpow2.f32 %v1299_v9  ;;  %v1313_v51 = vmul.f32 1.442695, %v1286_v19  ;;  %v1315_v36 = vmul.f32 1.442695, %v1287_v22  ;;  %v1290_v40 = vsub.f32 %v5211_v31, %v5216_v43 }
 0x3b9   : > { %4272 = vpow2.f32 %v1301_v47  ;;  %2103 = vmatpush.bf16.msra.mxu3 %v3780_v18  ;;  %v1317_v41 = vmul.f32 1.442695, %v1288_v23  ;;  %v1319_v56 = vmul.f32 1.442695, %v1289_v53  ;;  %v3764_v59 = vor.u32 %v3974_v60, %v3763_v45 }
 0x3ba   : > { %v5231_v10 = vpop.eup %4262  ;;  %4274 = vpow2.f32 %v1303_v12  ;;  %v1321_v54 = vmul.f32 1.442695, %v1290_v40  ;;  %v3760_v55 = vor.u32 %v3973_v46, %v3759_v1  ;;  %v2030_v22 = vpack.c.bf16 %v2016_v61, %v2015_v27  ;;  %v2023_v1 = vld [vmem:[%s5054_s25 + $0x50] sm:$0xff]  ;;  %v2024_v46 = vld [vmem:[%s5054_s25 + $0x58] sm:$0xff] }
 0x3bb   : > { %v5233_v8 = vpop.eup %4264  ;;  %4276 = vpow2.f32 %v1305_v13  ;;  %v2014_v13 = vld [vmem:[%s5054_s25 + $0x8] sm:$0xff]  ;;  %v3987_v27 = vld [vmem:[#allocation11 + $0x74] sm:$0xf0] }
 0x3bc   : > { %v1323_v6 = vadd.f32 %v5233_v8, %v5231_v10  ;;  %v5239_v3 = vpop.eup %4266  ;;  %4278 = vpow2.f32 %v1307_v63  ;;  %v2029_v62 = vpack.c.bf16 %v2014_v13, %v2013_v4  ;;  %v3827_v13 = vld [vmem:[#allocation11 + $0xa8] sm:$0xf] }
 0x3bd   : > { %v5244_v17 = vpop.eup %4268  ;;  %4280 = vpow2.f32 %v1309_v21  ;;  %2104 = vmatpush.bf16.msra.mxu3 %v3776_v26 }
 0x3be   : > { %v1324_v14 = vadd.f32 %v5239_v3, %v1323_v6  ;;  %v5249_v20 = vpop.eup %4270  ;;  %4282 = vpow2.f32 %v1311_v52  ;;  %v3756_v6 = vor.u32 %v3972_v7, %v3755_v58  ;;  %v3959_v58 = vld [vmem:[#allocation2 + $0x10] sm:$0xff]  ;;  %v3843_v7 = vld [vmem:[#allocation11 + $0xe8] sm:$0xf] }
 0x3bf   : > { %v5254_v25 = vpop.eup %4272  ;;  %4284 = vpow2.f32 %v1313_v51 }
 0x3c0   : > { %v1325_v2 = vadd.f32 %v5244_v17, %v1324_v14  ;;  %v5259_v29 = vpop.eup %4274  ;;  %4286 = vpow2.f32 %v1315_v36 }
 0x3c1   : > { %v5264_v35 = vpop.eup %4276  ;;  %2105 = vmatpush.bf16.msra.mxu3 %v3772_v37  ;;  %4288 = vpow2.f32 %v1317_v41 }
 0x3c2   : > { %v1326_v57 = vadd.f32 %v5249_v20, %v1325_v2  ;;  %v4279_v24 = vpop.eup %4278  ;;  %4290 = vpow2.f32 %v1319_v56 }
 0x3c3   : > { %v4281_v48 = vpop.eup %4280  ;;  %4292 = vpow2.f32 %v1321_v54  ;;  %v2022_v54 = vld [vmem:[%s5054_s25 + $0x48] sm:$0xff] }
 0x3c4   : > { %v1327_v28 = vadd.f32 %v5254_v25, %v1326_v57  ;;  %v4283_v50 = vpop.eup %4282 }
 0x3c5   : > { %2106 = vmatpush.bf16.msra.mxu3 %v3768_v42  ;;  %v4285_v31 = vpop.eup %4284 }
 0x3c6   : > { %v1328_v30 = vadd.f32 %v5259_v29, %v1327_v28  ;;  %v4287_v9 = vpop.eup %4286 }
 0x3c7   : > { %v4289_v11 = vpop.eup %4288 }
 0x3c8   : > { %v1329_v39 = vadd.f32 %v5264_v35, %v1328_v30  ;;  %v4291_v5 = vpop.eup %4290 }
 0x3c9   : > { %2107 = vmatpush.bf16.msra.mxu3 %v3764_v59  ;;  %v4293_v15 = vpop.eup %4292 }
 0x3ca   : > { %v1330_v44 = vadd.f32 %v4279_v24, %v1329_v39 }
 0x3cc   : > { %v1331_v49 = vadd.f32 %v4281_v48, %v1330_v44 }
 0x3cd   : > { %2108 = vmatpush.bf16.msra.mxu3 %v3760_v55  ;;  %v2026_v55 = vld [vmem:[%s5054_s25 + $0x68] sm:$0xff] }
 0x3ce   : > { %v1332_v0 = vadd.f32 %v4283_v50, %v1331_v49  ;;  %v2017_v49 = vld [vmem:[%s5054_s25 + $0x20] sm:$0xff] }
 0x3d0   : > { %v1333_v43 = vadd.f32 %v4285_v31, %v1332_v0  ;;  %v3957_v0 = vld [vmem:[#allocation2] sm:$0xff] }
 0x3d1   : > { %2109 = vmatpush.bf16.msra.mxu3 %v3756_v6  ;;  %v3993_v6 = vld [vmem:[#allocation11 + $0xd4] sm:$0xf0] }
 0x3d2   : > { %v1334_v47 = vadd.f32 %v4287_v9, %v1333_v43  ;;  %v3958_v43 = vld [vmem:[#allocation2 + $0x18] sm:$0xff] }
 0x3d4   : > { %v1335_v12 = vadd.f32 %v4289_v11, %v1334_v47  ;;  %2110 = vmatmul.bf16.vlgmr.msra.gmra.mxu3 %v2029_v62 }
 0x3d6   : > { %v1336_v14 = vadd.f32 %v4291_v5, %v1335_v12  ;;  %v3835_v12 = vld [vmem:[#allocation11 + $0xc8] sm:$0xf] }
 0x3d7   : > { %v3836_v4 = vor.u32 %v3993_v6, %v3835_v12  ;;  %v3797_v12 = vld [vmem:[#allocation11 + $0x38] sm:$0xf0] }
 0x3d8   : > { %v1337_v16 = vadd.f32 %v4293_v15, %v1336_v14  ;;  %v3991_v14 = vld [vmem:[#allocation11 + $0xb4] sm:$0xf0] }
 0x3d9   : > { %v3828_v62 = vor.u32 %v3991_v14, %v3827_v13 }
 0x3da   : > { %v1338_v63 = vrot.slane %v1337_v16, 4 }
 0x3dc   : > { %v1339_v18 = vadd.f32 %v1338_v63, %v1337_v16  ;;  %v2028_v16 = vld [vmem:[%s5054_s25 + $0x78] sm:$0xff] }
 0x3de   : > { %v1340_v2 = vrot.slane %v1339_v18, 2 }
 0x3e0   : > { %v1341_v19 = vadd.f32 %v1340_v2, %v1339_v18  ;;  %v3819_v18 = vld [vmem:[#allocation11 + $0x88] sm:$0xf]  ;;  %v3989_v2 = vld [vmem:[#allocation11 + $0x94] sm:$0xf0] }
 0x3e2   : > { %v1342_v21 = vrot.slane %v1341_v19, 1 }
 0x3e4   : > { %v1343_v57 = vadd.f32 %v1342_v21, %v1341_v19  ;;  %2115 = vmatmul.bf16.gmra.mxu3 %v2030_v22  ;;  %v3820_v19 = vor.u32 %v3989_v2, %v3819_v18  ;;  %v3960_v21 = vld [vmem:[#allocation2 + $0x8] sm:$0xff] }
 0x3e5   : > { %v3994_v22 = vld [vmem:[#allocation11 + $0xec] sm:$0xf] }
 0x3e6   : > { %4294 = vrcp.f32 %v1343_v57  ;;  %v3811_v57 = vld [vmem:[#allocation11 + $0x68] sm:$0xf]  ;;  %v3980_v18 = vld [vmem:[#allocation11 + $0xc] sm:$0xf] }
 0x3e7   : > { %v3812_v61 = vor.u32 %v3987_v27, %v3811_v57  ;;  %v3962_v2 = vld [vmem:[#allocation2 + $0x28] sm:$0xff] }
 0x3ec   : > { %v4295_v52 = vpop.eup %4294 }
 0x3ed   : > { %v1359_v26 = vmul.f32 %v4295_v52, %v4291_v5  ;;  %v1360_v28 = vmul.f32 %v4295_v52, %v4293_v15  ;;  %v1357_v23 = vmul.f32 %v4295_v52, %v4287_v9  ;;  %v1358_v51 = vmul.f32 %v4295_v52, %v4289_v11  ;;  %v2025_v9 = vld [vmem:[%s5054_s25 + $0x60] sm:$0xff]  ;;  %v3995_v11 = vld [vmem:[#allocation11 + $0xf4] sm:$0xf0]  ;;  %v2027_v15 = vld [vmem:[%s5054_s25 + $0x70] sm:$0xff] }
 0x3ee   : > { %v1355_v30 = vmul.f32 %v4295_v52, %v4283_v50  ;;  %v1356_v32 = vmul.f32 %v4295_v52, %v4285_v31  ;;  %v1353_v33 = vmul.f32 %v4295_v52, %v4279_v24  ;;  %v1354_v34 = vmul.f32 %v4295_v52, %v4281_v48  ;;  %v2021_v50 = vld [vmem:[%s5054_s25 + $0x40] sm:$0xff] }
 0x3ef   : > { %v1368_v53 = vpack.c.bf16 %v1360_v28, %v1359_v26  ;;  %v1367_v36 = vpack.c.bf16 %v1358_v51, %v1357_v23  ;;  %v1351_v37 = vmul.f32 %v4295_v52, %v5259_v29  ;;  %v1352_v38 = vmul.f32 %v4295_v52, %v5264_v35  ;;  %v3803_v26 = vld [vmem:[#allocation11 + $0x48] sm:$0xf]  ;;  %v3985_v23 = vld [vmem:[#allocation11 + $0x54] sm:$0xf0]  ;;  %v3992_v51 = vld [vmem:[#allocation11 + $0xcc] sm:$0xf] }
 0x3f0   : > { %v1366_v39 = vpack.c.bf16 %v1356_v32, %v1355_v30  ;;  %v1365_v40 = vpack.c.bf16 %v1354_v34, %v1353_v33  ;;  %v1349_v41 = vmul.f32 %v4295_v52, %v5249_v20  ;;  %v1350_v42 = vmul.f32 %v4295_v52, %v5254_v25  ;;  %v2018_v20 = vld [vmem:[%s5054_s25 + $0x28] sm:$0xff]  ;;  %v3837_v30 = vld [vmem:[#allocation11 + $0xd8] sm:$0xf0]  ;;  %v3751_v33 = vld [vmem:[#allocation12 + $0x70] sm:$0xf] }
 0x3f1   : > { %1433 = vmatpush.bf16.msra.mxu1 %v1368_v53  ;;  %v1364_v44 = vpack.c.bf16 %v1352_v38, %v1351_v37  ;;  %v1347_v45 = vmul.f32 %v4295_v52, %v5239_v3  ;;  %v1348_v24 = vmul.f32 %v4295_v52, %v5244_v17  ;;  %v1345_v29 = vmul.f32 %v4295_v52, %v5231_v10  ;;  %v2019_v3 = vld [vmem:[%s5054_s25 + $0x30] sm:$0xff]  ;;  %v2020_v10 = vld [vmem:[%s5054_s25 + $0x38] sm:$0xff]  ;;  %v3795_v37 = vld [vmem:[#allocation11 + $0x28] sm:$0xf] }
 0x3f2   : > { %v1363_v60 = vpack.c.bf16 %v1350_v42, %v1349_v41  ;;  %v1346_v35 = vmul.f32 %v4295_v52, %v5233_v8  ;;  %v2031_v25 = vpack.c.bf16 %v2018_v20, %v2017_v49  ;;  %v2032_v17 = vpack.c.bf16 %v2020_v10, %v2019_v3  ;;  %v3956_v8 = vld [vmem:[#allocation2 + $0x30] sm:$0xff]  ;;  %v3845_v52 = vld [vmem:[#allocation11 + $0xf8] sm:$0xf0]  ;;  %v3971_v34 = vld [vmem:[#allocation12 + $0x74] sm:$0xf0] }
 0x3f3   : > { %v1362_v48 = vpack.c.bf16 %v1348_v24, %v1347_v45  ;;  %v2033_v59 = vpack.c.bf16 %v2022_v54, %v2021_v50  ;;  %v2034_v31 = vpack.c.bf16 %v2024_v46, %v2023_v1  ;;  %v2035_v47 = vpack.c.bf16 %v2026_v55, %v2025_v9  ;;  %v3983_v38 = vld [vmem:[#allocation11 + $0x34] sm:$0xf0]  ;;  %v3747_v41 = vld [vmem:[#allocation12 + $0x60] sm:$0xf]  ;;  %v3970_v42 = vld [vmem:[#allocation12 + $0x64] sm:$0xf0] }
 0x3f4   : > { %v1361_v56 = vpack.c.bf16 %v1346_v35, %v1345_v29  ;;  %2120 = vmatmul.bf16.gmra.mxu3 %v2031_v25  ;;  %v3844_v5 = vor.u32 %v3995_v11, %v3843_v7  ;;  %v2036_v63 = vpack.c.bf16 %v2028_v16, %v2027_v15  ;;  %v3848_v28 = vor.u32 %v3994_v22, %v3845_v52  ;;  %v3787_v29 = vld [vmem:[#allocation11 + $0x8] sm:$0xf]  ;;  %v3988_v35 = vld [vmem:[#allocation11 + $0x8c] sm:$0xf]  ;;  %v3961_v20 = vld [vmem:[#allocation2 + $0x20] sm:$0xff] }
 0x3f5   : > { %1434 = vmatpush.bf16.msra.mxu1 %v1367_v36  ;;  %v3804_v32 = vor.u32 %v3985_v23, %v3803_v26  ;;  %v3840_v53 = vor.u32 %v3992_v51, %v3837_v30  ;;  %v3752_v36 = vor.u32 %v3971_v34, %v3751_v33  ;;  %v3796_v45 = vor.u32 %v3983_v38, %v3795_v37  ;;  %v5295_v25 = vld [vmem:[#allocation14] sm:$0xff]  ;;  %v3986_v50 = vld [vmem:[#allocation11 + $0x6c] sm:$0xf]  ;;  %v3968_v1 = vld [vmem:[#allocation12 + $0x44] sm:$0xf0] }
 0x3f6   : > { %2271 = vmatpush.bf16.msra.mxu0 %v3844_v5  ;;  %v5298_v3 = vperm.slane %v5295_v25, 1  ;;  %v3982_v11 = vld [vmem:[#allocation11 + $0x2c] sm:$0xf]  ;;  %v3965_v22 = vld [vmem:[#allocation12 + $0x14] sm:$0xf0] }
 0x3f7   : > { %1554 = vmatpush.bf16.msra.mxu2 %v3752_v36  ;;  %v3800_v14 = vor.u32 %v3982_v11, %v3797_v12  ;;  %v3964_v23 = vld [vmem:[#allocation12 + $0x4] sm:$0xf0]  ;;  %v3963_v36 = vld [vmem:[#allocation2 + $0x38] sm:$0xff] }
 0x3f9   : > { %1435 = vmatpush.bf16.msra.mxu1 %v1366_v39  ;;  %v3990_v39 = vld [vmem:[#allocation11 + $0xac] sm:$0xf] }
 0x3fa   : > { %2272 = vmatpush.bf16.msra.mxu0 %v3836_v4 }
 0x3fd   : > { %1436 = vmatpush.bf16.msra.mxu1 %v1365_v40  ;;  %v3829_v40 = vld [vmem:[#allocation11 + $0xb8] sm:$0xf0] }
 0x3fe   : > { %2273 = vmatpush.bf16.msra.mxu0 %v3828_v62  ;;  %v3832_v24 = vor.u32 %v3990_v39, %v3829_v40  ;;  %v3731_v62 = vld [vmem:[#allocation12 + $0x20] sm:$0xf] }
 0x401   : > { %1437 = vmatpush.bf16.msra.mxu1 %v1364_v44  ;;  %v3748_v44 = vor.u32 %v3970_v42, %v3747_v41 }
 0x402   : > { %2274 = vmatpush.bf16.msra.mxu0 %v3820_v19 }
 0x403   : > { %1555 = vmatpush.bf16.msra.mxu2 %v3748_v44 }
 0x404   : > { %2125 = vmatmul.bf16.gmra.mxu3 %v2032_v17  ;;  %v3743_v17 = vld [vmem:[#allocation12 + $0x50] sm:$0xf] }
 0x405   : > { %1438 = vmatpush.bf16.msra.mxu1 %v1363_v60  ;;  %v3981_v60 = vld [vmem:[#allocation11 + $0x14] sm:$0xf0] }
 0x406   : > { %2275 = vmatpush.bf16.msra.mxu0 %v3812_v61  ;;  %v3727_v61 = vld [vmem:[#allocation12 + $0x10] sm:$0xf] }
 0x407   : > { %v3728_v52 = vor.u32 %v3965_v22, %v3727_v61 }
 0x409   : > { %1439 = vmatpush.bf16.msra.mxu1 %v1362_v48  ;;  %v3821_v48 = vld [vmem:[#allocation11 + $0x98] sm:$0xf0] }
 0x40a   : > { %2276 = vmatpush.bf16.msra.mxu0 %v3804_v32  ;;  %v3824_v49 = vor.u32 %v3988_v35, %v3821_v48 }
 0x40d   : > { %1440 = vmatpush.bf16.msra.mxu1 %v1361_v56  ;;  %v3788_v56 = vor.u32 %v3981_v60, %v3787_v29 }
 0x40e   : > { %2277 = vmatpush.bf16.msra.mxu0 %v3796_v45 }
 0x410   : > { %1441 = vmatmul.bf16.vlgmr.msra.gmra.mxu1 %v3956_v8  ;;  %v3969_v8 = vld [vmem:[#allocation12 + $0x54] sm:$0xf0] }
 0x411   : > { %2320 = vmatpush.bf16.msrb.mxu1 %v3848_v28  ;;  %v3744_v54 = vor.u32 %v3969_v8, %v3743_v17  ;;  %v3723_v28 = vld [vmem:[#allocation12] sm:$0xf] }
 0x412   : > { %2278 = vmatpush.bf16.msra.mxu0 %v3788_v56  ;;  %v3724_v30 = vor.u32 %v3964_v23, %v3723_v28 }
 0x413   : > { %1556 = vmatpush.bf16.msra.mxu2 %v3744_v54 }
 0x414   : > { %2130 = vmatmul.bf16.gmra.mxu3 %v2033_v59  ;;  %v3813_v59 = vld [vmem:[#allocation11 + $0x78] sm:$0xf0] }
 0x415   : > { %2321 = vmatpush.bf16.msrb.mxu1 %v3840_v53  ;;  %v3816_v46 = vor.u32 %v3986_v50, %v3813_v59 }
 0x419   : > { %2322 = vmatpush.bf16.msrb.mxu1 %v3832_v24 }
 0x41d   : > { %2323 = vmatpush.bf16.msrb.mxu1 %v3824_v49 }
 0x420   : > { %1446 = vmatmul.bf16.gmra.mxu1 %v3957_v0  ;;  %v3739_v0 = vld [vmem:[#allocation12 + $0x40] sm:$0xf] }
 0x421   : > { %v3740_v9 = vor.u32 %v3968_v1, %v3739_v0  ;;  %2324 = vmatpush.bf16.msrb.mxu1 %v3816_v46 }
 0x423   : > { %1557 = vmatpush.bf16.msra.mxu2 %v3740_v9 }
 0x424   : > { %2135 = vmatmul.bf16.gmra.mxu3 %v2034_v31  ;;  %v3984_v31 = vld [vmem:[#allocation11 + $0x4c] sm:$0xf] }
 0x430   : > { %1451 = vmatmul.bf16.gmra.mxu1 %v3958_v43  ;;  %v3805_v43 = vld [vmem:[#allocation11 + $0x58] sm:$0xf0] }
 0x431   : > { %v3808_v7 = vor.u32 %v3984_v31, %v3805_v43 }
 0x433   : > { %2325 = vmatpush.bf16.msrb.mxu1 %v3808_v7 }
 0x434   : > { %2140 = vmatmul.bf16.gmra.mxu3 %v2035_v47  ;;  %v3735_v47 = vld [vmem:[#allocation12 + $0x30] sm:$0xf] }
 0x437   : > { %2326 = vmatpush.bf16.msrb.mxu1 %v3800_v14 }
 0x440   : > { %1456 = vmatmul.bf16.gmra.mxu1 %v3959_v58  ;;  %v3967_v58 = vld [vmem:[#allocation12 + $0x34] sm:$0xf0] }
 0x441   : > { %v3736_v6 = vor.u32 %v3967_v58, %v3735_v47 }
 0x443   : > { %1558 = vmatpush.bf16.msra.mxu2 %v3736_v6 }
 0x444   : > { %2145 = vmatmul.bf16.gmra.mxu3 %v2036_v63  ;;  %v3966_v63 = vld [vmem:[#allocation12 + $0x24] sm:$0xf0] }
 0x445   : > { %v3732_v19 = vor.u32 %v3966_v63, %v3731_v62 }
 0x447   : > { %1559 = vmatpush.bf16.msra.mxu2 %v3732_v19 }
 0x44b   : > { %1560 = vmatpush.bf16.msra.mxu2 %v3728_v52 }
 0x44f   : > { %1561 = vmatpush.bf16.msra.mxu2 %v3724_v30 }
 0x450   : > { %1461 = vmatmul.bf16.gmra.mxu1 %v3960_v21  ;;  %v3789_v21 = vld [vmem:[#allocation11 + $0x18] sm:$0xf0] }
 0x451   : > { %v3792_v27 = vor.u32 %v3980_v18, %v3789_v21 }
 0x453   : > { %2327 = vmatpush.bf16.msrb.mxu1 %v3792_v27 }
 0x457   : > { %v2111_v10 = vpop.f32.mrf.mxu3 }
 0x458   : > { %v2112_v55 = vadd.f32 %v2111_v10, %v5298_v3 }
 0x45a   : > { %v2151_v4 = vmax.f32 %v2112_v55, 0.0 }
 0x45f   : > { %v2113_v5 = vpop.f32.mrf.mxu3 }
 0x460   : > { %1466 = vmatmul.bf16.gmra.mxu1 %v3961_v20  ;;  %v2114_v13 = vadd.f32 %v2113_v5, %v5298_v3 }
 0x462   : > { %v2152_v15 = vmax.f32 %v2114_v13, 0.0 }
 0x464   : > { %v2167_v16 = vpack.c.bf16 %v2152_v15, %v2151_v4 }
 0x466   : > { %2279 = vmatmul.bf16.vlgmr.msra.gmra.mxu0 %v2167_v16 }
 0x467   : > { %v2116_v57 = vpop.f32.mrf.mxu3 }
 0x468   : > { %v2117_v26 = vadd.f32 %v2116_v57, %v5298_v3 }
 0x46a   : > { %v2153_v32 = vmax.f32 %v2117_v26, 0.0 }
 0x46f   : > { %v2118_v51 = vpop.f32.mrf.mxu3 }
 0x470   : > { %1471 = vmatmul.bf16.gmra.mxu1 %v3962_v2  ;;  %v2119_v33 = vadd.f32 %v2118_v51, %v5298_v3 }
 0x472   : > { %v2154_v34 = vmax.f32 %v2119_v33, 0.0 }
 0x474   : > { %v2168_v53 = vpack.c.bf16 %v2154_v34, %v2153_v32 }
 0x476   : > { %2284 = vmatmul.bf16.gmra.mxu0 %v2168_v53 }
 0x477   : > { %v2121_v37 = vpop.f32.mrf.mxu3 }
 0x478   : > { %v2122_v38 = vadd.f32 %v2121_v37, %v5298_v3 }
 0x47a   : > { %v2155_v40 = vmax.f32 %v2122_v38, 0.0 }
 0x47f   : > { %v2123_v39 = vpop.f32.mrf.mxu3 }
 0x480   : > { %1476 = vmatmul.bf16.gmra.mxu1 %v3963_v36  ;;  %v2124_v41 = vadd.f32 %v2123_v39, %v5298_v3 }
 0x482   : > { %v2156_v42 = vmax.f32 %v2124_v41, 0.0 }
 0x484   : > { %v2169_v44 = vpack.c.bf16 %v2156_v42, %v2155_v40 }
 0x486   : > { %2289 = vmatmul.bf16.gmra.mxu0 %v2169_v44 }
 0x487   : > { %v2126_v24 = vpop.f32.mrf.mxu3 }
 0x488   : > { %v2127_v29 = vadd.f32 %v2126_v24, %v5298_v3 }
 0x48a   : > { %v2157_v56 = vmax.f32 %v2127_v29, 0.0 }
 0x48d   : > { %v1442_v45 = vpop.f32.mrf.mxu1 }
 0x48f   : > { %v2128_v48 = vpop.f32.mrf.mxu3 }
 0x490   : > { %2328 = vmatmul.bf16.vlgmr.msrb.gmra.mxu1 %v2167_v16  ;;  %v2129_v49 = vadd.f32 %v2128_v48, %v5298_v3 }
 0x492   : > { %v2158_v20 = vmax.f32 %v2129_v49, 0.0 }
 0x494   : > { %v2170_v10 = vpack.c.bf16 %v2158_v20, %v2157_v56 }
 0x495   : > { %v1444_v60 = vpop.f32.mrf.mxu1 }
 0x496   : > { %v1482_v35 = vpack.c.bf16 %v1444_v60, %v1442_v45  ;;  %2294 = vmatmul.bf16.gmra.mxu0 %v2170_v10 }
 0x497   : > { %v2131_v8 = vpop.f32.mrf.mxu3 }
 0x498   : > { %1562 = vmatmul.bf16.vlgmr.msra.gmra.mxu2 %v1482_v35  ;;  %v2132_v50 = vadd.f32 %v2131_v8, %v5298_v3 }
 0x49a   : > { %v2159_v1 = vmax.f32 %v2132_v50, 0.0 }
 0x49d   : > { %v1447_v17 = vpop.f32.mrf.mxu1 }
 0x49f   : > { %v2133_v0 = vpop.f32.mrf.mxu3 }
 0x4a0   : > { %2333 = vmatmul.bf16.gmra.mxu1 %v2168_v53  ;;  %v2134_v46 = vadd.f32 %v2133_v0, %v5298_v3 }
 0x4a2   : > { %v2160_v31 = vmax.f32 %v2134_v46, 0.0 }
 0x4a4   : > { %v2171_v43 = vpack.c.bf16 %v2160_v31, %v2159_v1 }
 0x4a5   : > { %v1449_v54 = vpop.f32.mrf.mxu1 }
 0x4a6   : > { %v1483_v59 = vpack.c.bf16 %v1449_v54, %v1447_v17  ;;  %2299 = vmatmul.bf16.gmra.mxu0 %v2171_v43  ;;  %v4397_v54 = vld [vmem:[%s5046_s5] sm:$0xff] }
 0x4a7   : > { %v2136_v55 = vpop.f32.mrf.mxu3 }
 0x4a8   : > { %1567 = vmatmul.bf16.gmra.mxu2 %v1483_v59  ;;  %v2137_v47 = vadd.f32 %v2136_v55, %v5298_v3 }
 0x4aa   : > { %v2161_v12 = vmax.f32 %v2137_v47, 0.0 }
 0x4ad   : > { %v1452_v9 = vpop.f32.mrf.mxu1 }
 0x4af   : > { %v2138_v11 = vpop.f32.mrf.mxu3 }
 0x4b0   : > { %2338 = vmatmul.bf16.gmra.mxu1 %v2169_v44  ;;  %v2139_v5 = vadd.f32 %v2138_v11, %v5298_v3 }
 0x4b2   : > { %v2162_v6 = vmax.f32 %v2139_v5, 0.0 }
 0x4b4   : > { %v2172_v4 = vpack.c.bf16 %v2162_v6, %v2161_v12 }
 0x4b5   : > { %v1454_v58 = vpop.f32.mrf.mxu1 }
 0x4b6   : > { %v1484_v7 = vpack.c.bf16 %v1454_v58, %v1452_v9  ;;  %2304 = vmatmul.bf16.gmra.mxu0 %v2172_v4  ;;  %v4398_v9 = vld [vmem:[%s5046_s5 + $0x8] sm:$0xff] }
 0x4b7   : > { %v2141_v14 = vpop.f32.mrf.mxu3 }
 0x4b8   : > { %1572 = vmatmul.bf16.gmra.mxu2 %v1484_v7  ;;  %v2142_v15 = vadd.f32 %v2141_v14, %v5298_v3 }
 0x4ba   : > { %v2163_v18 = vmax.f32 %v2142_v15, 0.0 }
 0x4bd   : > { %v1457_v13 = vpop.f32.mrf.mxu1 }
 0x4bf   : > { %v2143_v63 = vpop.f32.mrf.mxu3 }
 0x4c0   : > { %2343 = vmatmul.bf16.gmra.mxu1 %v2170_v10  ;;  %v2144_v2 = vadd.f32 %v2143_v63, %v5298_v3  ;;  %v5317_v10 = vperm.slane %v5295_v25, 3 }
 0x4c2   : > { %v2164_v19 = vmax.f32 %v2144_v2, 0.0 }
 0x4c4   : > { %v2173_v21 = vpack.c.bf16 %v2164_v19, %v2163_v18 }
 0x4c5   : > { %v1459_v16 = vpop.f32.mrf.mxu1 }
 0x4c6   : > { %v1485_v62 = vpack.c.bf16 %v1459_v16, %v1457_v13  ;;  %2309 = vmatmul.bf16.gmra.mxu0 %v2173_v21  ;;  %v4399_v16 = vld [vmem:[%s5046_s5 + $0x10] sm:$0xff] }
 0x4c7   : > { %v2146_v27 = vpop.f32.mrf.mxu3 }
 0x4c8   : > { %1577 = vmatmul.bf16.gmra.mxu2 %v1485_v62  ;;  %v2147_v61 = vadd.f32 %v2146_v27, %v5298_v3 }
 0x4ca   : > { %v2165_v28 = vmax.f32 %v2147_v61, 0.0 }
 0x4cd   : > { %v1462_v57 = vpop.f32.mrf.mxu1 }
 0x4cf   : > { %v2148_v26 = vpop.f32.mrf.mxu3 }
 0x4d0   : > { %2348 = vmatmul.bf16.gmra.mxu1 %v2171_v43  ;;  %v2149_v23 = vadd.f32 %v2148_v26, %v5298_v3 }
 0x4d2   : > { %v2166_v51 = vmax.f32 %v2149_v23, 0.0 }
 0x4d4   : > { %v2174_v30 = vpack.c.bf16 %v2166_v51, %v2165_v28 }
 0x4d5   : > { %v1464_v22 = vpop.f32.mrf.mxu1 }
 0x4d6   : > { %v1486_v52 = vpack.c.bf16 %v1464_v22, %v1462_v57  ;;  %2314 = vmatmul.bf16.gmra.mxu0 %v2174_v30 }
 0x4d8   : > { %1582 = vmatmul.bf16.gmra.mxu2 %v1486_v52 }
 0x4dd   : > { %v1467_v32 = vpop.f32.mrf.mxu1 }
 0x4e0   : > { %2353 = vmatmul.bf16.gmra.mxu1 %v2172_v4 }
 0x4e3   : > { %v2280_v36 = vpop.f32.mrf.mxu0 }
 0x4e5   : > { %v1469_v33 = vpop.f32.mrf.mxu1 }
 0x4e6   : > { %v1487_v34 = vpack.c.bf16 %v1469_v33, %v1467_v32 }
 0x4e8   : > { %1587 = vmatmul.bf16.gmra.mxu2 %v1487_v34  ;;  %v4401_v34 = vld [vmem:[%s5046_s5 + $0x20] sm:$0xff] }
 0x4eb   : > { %v2282_v39 = vpop.f32.mrf.mxu0 }
 0x4ed   : > { %v1472_v53 = vpop.f32.mrf.mxu1 }
 0x4f0   : > { %2358 = vmatmul.bf16.gmra.mxu1 %v2173_v21  ;;  %v4400_v21 = vld [vmem:[%s5046_s5 + $0x18] sm:$0xff] }
 0x4f3   : > { %v2285_v41 = vpop.f32.mrf.mxu0 }
 0x4f5   : > { %v1474_v37 = vpop.f32.mrf.mxu1 }
 0x4f6   : > { %v1488_v38 = vpack.c.bf16 %v1474_v37, %v1472_v53 }
 0x4f8   : > { %1592 = vmatmul.bf16.gmra.mxu2 %v1488_v38 }
 0x4fb   : > { %v2287_v45 = vpop.f32.mrf.mxu0 }
 0x4fd   : > { %v1477_v40 = vpop.f32.mrf.mxu1 }
 0x500   : > { %2363 = vmatmul.bf16.gmra.mxu1 %v2174_v30 }
 0x503   : > { %v2290_v35 = vpop.f32.mrf.mxu0 }
 0x505   : > { %v1479_v42 = vpop.f32.mrf.mxu1 }
 0x506   : > { %v1489_v3 = vpack.c.bf16 %v1479_v42, %v1477_v40 }
 0x508   : > { %1597 = vmatmul.bf16.gmra.mxu2 %v1489_v3 }
 0x50b   : > { %v2292_v31 = vpop.f32.mrf.mxu0 }
 0x50d   : > { %v2329_v44 = vpop.f32.mrf.mxu1 }
 0x50e   : > { %v2369_v24 = vpack.c.bf16 %v2329_v44, %v2280_v36 }
 0x510   : > { %v2417_v48 = vunpack.c.l.b16 %v2369_v24  ;;  %v2465_v56 = vunpack.c.h.b16 %v2369_v24 }
 0x513   : > { %v2295_v15 = vpop.f32.mrf.mxu0 }
 0x515   : > { %v2331_v29 = vpop.f32.mrf.mxu1 }
 0x516   : > { %v2370_v60 = vpack.c.bf16 %v2331_v29, %v2282_v39 }
 0x518   : > { %v2418_v49 = vunpack.c.l.b16 %v2370_v60  ;;  %v2466_v20 = vunpack.c.h.b16 %v2370_v60 }
 0x51a   : > { %v5319_v17 = vpack.c.b16 %v2466_v20, %v2465_v56  ;;  %v5321_v8 = vpack.c.b16 %v2418_v49, %v2417_v48 }
 0x51b   : > { %v1563_v50 = vpop.f32.mrf.mxu2  ;;  %v2297_v27 = vpop.f32.mrf.mxu0 }
 0x51c   : > { %v1603_v59 = vadd.f32 %v4397_v54, %v1563_v50  ;;  %v4403_v50 = vld [vmem:[%s5046_s5 + $0x30] sm:$0xff] }
 0x51d   : > { %v2334_v0 = vpop.f32.mrf.mxu1 }
 0x51e   : > { %v2371_v1 = vpack.c.bf16 %v2334_v0, %v2285_v41  ;;  %v5325_v46 = vadd.f32 %v5317_v10, %v1603_v59  ;;  %v4402_v41 = vld [vmem:[%s5046_s5 + $0x28] sm:$0xff] }
 0x520   : > { %1636 = vadd.xlane.f32.xlu0 %v5325_v46  ;;  %v2419_v11 = vunpack.c.l.b16 %v2371_v1  ;;  %v2467_v12 = vunpack.c.h.b16 %v2371_v1 }
 0x523   : > { %v1565_v43 = vpop.f32.mrf.mxu2  ;;  %v2300_v39 = vpop.f32.mrf.mxu0 }
 0x524   : > { %v1604_v55 = vadd.f32 %v4398_v9, %v1565_v43  ;;  %v4404_v9 = vld [vmem:[%s5046_s5 + $0x38] sm:$0xff] }
 0x525   : > { %v2336_v47 = vpop.f32.mrf.mxu1 }
 0x526   : > { %v2372_v58 = vpack.c.bf16 %v2336_v47, %v2287_v45  ;;  %v5330_v7 = vadd.f32 %v5317_v10, %v1604_v55 }
 0x528   : > { %v2420_v5 = vunpack.c.l.b16 %v2372_v58  ;;  %v2468_v6 = vunpack.c.h.b16 %v2372_v58  ;;  %1638 = vadd.xlane.f32.xlu0 %v5330_v7 }
 0x52a   : > { %v5333_v4 = vpack.c.b16 %v2468_v6, %v2467_v12  ;;  %v5335_v13 = vpack.c.b16 %v2420_v5, %v2419_v11  ;;  %v4405_v12 = vld [vmem:[%s5046_s5 + $0x40] sm:$0xff] }
 0x52b   : > { %v1568_v14 = vpop.f32.mrf.mxu2  ;;  %v5361_v48 = vpop.f32.mrf.mxu0 }
 0x52c   : > { %v1605_v62 = vadd.f32 %v4399_v16, %v1568_v14 }
 0x52d   : > { %v2339_v63 = vpop.f32.mrf.mxu1 }
 0x52e   : > { %v2373_v18 = vpack.c.bf16 %v2339_v63, %v2290_v35  ;;  %v5339_v2 = vadd.f32 %v5317_v10, %v1605_v62  ;;  %v4406_v62 = vld [vmem:[%s5046_s5 + $0x48] sm:$0xff] }
 0x530   : > { %1640 = vadd.xlane.f32.xlu1 %v5339_v2  ;;  %v2421_v26 = vunpack.c.l.b16 %v2373_v18  ;;  %v2469_v28 = vunpack.c.h.b16 %v2373_v18 }
 0x533   : > { %v1570_v19 = vpop.f32.mrf.mxu2 }
 0x534   : > { %v1606_v57 = vadd.f32 %v4400_v21, %v1570_v19 }
 0x535   : > { %v2341_v61 = vpop.f32.mrf.mxu1 }
 0x536   : > { %v2374_v22 = vpack.c.bf16 %v2341_v61, %v2292_v31  ;;  %v5344_v52 = vadd.f32 %v5317_v10, %v1606_v57  ;;  %v5374_v31 = vpop.f32.mrf.mxu0 }
 0x538   : > { %v2422_v23 = vunpack.c.l.b16 %v2374_v22  ;;  %v2470_v51 = vunpack.c.h.b16 %v2374_v22  ;;  %1642 = vadd.xlane.f32.xlu1 %v5344_v52 }
 0x53a   : > { %v5347_v30 = vpack.c.b16 %v2470_v51, %v2469_v28  ;;  %v5349_v32 = vpack.c.b16 %v2422_v23, %v2421_v26  ;;  %v4408_v51 = vld [vmem:[%s5046_s5 + $0x58] sm:$0xff] }
 0x53b   : > { %v1573_v33 = vpop.f32.mrf.mxu2 }
 0x53c   : > { %v1607_v53 = vadd.f32 %v4401_v34, %v1573_v33 }
 0x53d   : > { %v2344_v36 = vpop.f32.mrf.mxu1 }
 0x53e   : > { %v2375_v37 = vpack.c.bf16 %v2344_v36, %v2295_v15  ;;  %v5353_v38 = vadd.f32 %v5317_v10, %v1607_v53  ;;  %v2307_v6 = vpop.f32.mrf.mxu0  ;;  %v4797_v36 = vmov 128.0  }
 0x53f   : > { %4296 = vrcp.f32 %v4797_v36  ;;  %v4411_v36 = vld [vmem:[%s5046_s5 + $0x70] sm:$0xff] }
 0x540   : > { %1644 = vadd.xlane.f32.xlu2 %v5353_v38  ;;  %v2423_v24 = vunpack.c.l.b16 %v2375_v37  ;;  %v2471_v29 = vunpack.c.h.b16 %v2375_v37 }
 0x543   : > { %v1575_v40 = vpop.f32.mrf.mxu2 }
 0x544   : > { %v1608_v42 = vadd.f32 %v4402_v41, %v1575_v40  ;;  %v4409_v40 = vld [vmem:[%s5046_s5 + $0x60] sm:$0xff] }
 0x545   : > { %v2346_v3 = vpop.f32.mrf.mxu1 }
 0x546   : > { %v2376_v44 = vpack.c.bf16 %v2346_v3, %v2297_v27  ;;  %v5358_v45 = vadd.f32 %v5317_v10, %v1608_v42  ;;  %v2310_v21 = vpop.f32.mrf.mxu0  ;;  %v4407_v27 = vld [vmem:[%s5046_s5 + $0x50] sm:$0xff]  ;;  %v4297_v3 = vpop.eup %4296 }
 0x547   : > { %vm1673_vm0 = vweird.f32 %v4297_v3 }
 0x548   : > { %v2424_v60 = vunpack.c.l.b16 %v2376_v44  ;;  %v2472_v35 = vunpack.c.h.b16 %v2376_v44  ;;  %1646 = vadd.xlane.f32.xlu2 %v5358_v45 }
 0x54a   : > { %v5363_v56 = vpack.c.b16 %v2472_v35, %v2471_v29  ;;  %v5365_v49 = vpack.c.b16 %v2424_v60, %v2423_v24  ;;  %v1669_v24 = vmul.f32 128.0, %v4297_v3  ;;  %v4410_v35 = vld [vmem:[%s5046_s5 + $0x68] sm:$0xff] }
 0x54b   : > { %v1578_v20 = vpop.f32.mrf.mxu2 }
 0x54c   : > { %v1609_v54 = vadd.f32 %v4403_v50, %v1578_v20 }
 0x54d   : > { %v2349_v59 = vpop.f32.mrf.mxu1 }
 0x54e   : > { %v5368_v0 = vpack.c.bf16 %v2349_v59, %v2300_v39  ;;  %v5371_v1 = vadd.f32 %v5317_v10, %v1609_v54  ;;  %v2312_v28 = vpop.f32.mrf.mxu0  ;;  %v1670_v59 = vsub.f32 1.0, %v1669_v24 }
 0x550   : > { %1648 = vadd.xlane.f32.xlu0 %v5371_v1 }
 0x553   : > { %v1580_v43 = vpop.f32.mrf.mxu2 }
 0x554   : > { %v1610_v55 = vadd.f32 %v4404_v9, %v1580_v43 }
 0x555   : > { %v5377_v47 = vpop.f32.mrf.mxu1 }
 0x556   : > { %v5380_v58 = vadd.f32 %v5317_v10, %v1610_v55  ;;  %v2315_v37 = vpop.f32.mrf.mxu0 }
 0x558   : > { %1650 = vadd.xlane.f32.xlu1 %v5380_v58 }
 0x55b   : > { %v1583_v11 = vpop.f32.mrf.mxu2 }
 0x55c   : > { %v1611_v5 = vadd.f32 %v4405_v12, %v1583_v11 }
 0x55d   : > { %v2354_v14 = vpop.f32.mrf.mxu1 }
 0x55e   : > { %v5385_v15 = vadd.f32 %v5317_v10, %v1611_v5  ;;  %v2317_v50 = vpop.f32.mrf.mxu0 }
 0x560   : > { %1652 = vadd.xlane.f32.xlu2 %v5385_v15 }
 0x563   : > { %v1585_v16 = vpop.f32.mrf.mxu2 }
 0x564   : > { %v1612_v63 = vadd.f32 %v4406_v62, %v1585_v16 }
 0x565   : > { %v2356_v18 = vpop.f32.mrf.mxu1 }
 0x566   : > { %v5390_v19 = vadd.f32 %v5317_v10, %v1612_v63  ;;  %v1671_v63 = vmul.f32 %v4297_v3, %v1670_v59  ;;  %v4412_v59 = vld [vmem:[%s5046_s5 + $0x78] sm:$0xff] }
 0x568   : > { %1654 = vadd.xlane.f32.xlu0 %v5390_v19 }
 0x56b   : > { %v1588_v57 = vpop.f32.mrf.mxu2 }
 0x56c   : > { %v1613_v61 = vadd.f32 %v4407_v27, %v1588_v57  ;;  %v2380_v57 = vpack.c.bf16 %v2356_v18, %v2307_v6 }
 0x56d   : > { %v2359_v22 = vpop.f32.mrf.mxu1 }
 0x56e   : > { %v5395_v26 = vadd.f32 %v5317_v10, %v1613_v61  ;;  %v2381_v11 = vpack.c.bf16 %v2359_v22, %v2310_v21  ;;  %v2378_v21 = vpack.c.bf16 %v5377_v47, %v5361_v48  ;;  %v2428_v18 = vunpack.c.l.b16 %v2380_v57 }
 0x570   : > { %1656 = vadd.xlane.f32.xlu1 %v5395_v26  ;;  %v2429_v22 = vunpack.c.l.b16 %v2381_v11  ;;  %v2474_v48 = vunpack.c.h.b16 %v2378_v21 }
 0x573   : > { %v1590_v23 = vpop.f32.mrf.mxu2 }
 0x574   : > { %v1614_v33 = vadd.f32 %v4408_v51, %v1590_v23 }
 0x575   : > { %v2361_v34 = vpop.f32.mrf.mxu1 }
 0x576   : > { %v5400_v53 = vadd.f32 %v5317_v10, %v1614_v33  ;;  %v2382_v43 = vpack.c.bf16 %v2361_v34, %v2312_v28  ;;  %v2379_v28 = vpack.c.bf16 %v2354_v14, %v5374_v31  ;;  %v2477_v34 = vunpack.c.h.b16 %v2381_v11 }
 0x578   : > { %1658 = vadd.xlane.f32.xlu2 %v5400_v53  ;;  %v2478_v27 = vunpack.c.h.b16 %v2382_v43  ;;  %v2430_v51 = vunpack.c.l.b16 %v2382_v43  ;;  %v2475_v31 = vunpack.c.h.b16 %v2379_v28  ;;  %v2427_v14 = vunpack.c.l.b16 %v2379_v28 }
 0x57b   : > { %v1593_v39 = vpop.f32.mrf.mxu2 }
 0x57c   : > { %v1615_v41 = vadd.f32 %v4409_v40, %v1593_v39  ;;  %v1672_v39 = vadd.f32 %v4297_v3, %v1671_v63  ;;  %v2476_v40 = vunpack.c.h.b16 %v2380_v57 }
 0x57d   : > { %v2364_v42 = vpop.f32.mrf.mxu1 }
 0x57e   : > { %v5405_v44 = vadd.f32 %v5317_v10, %v1615_v41  ;;  %v2383_v60 = vpack.c.bf16 %v2364_v42, %v2315_v37  ;;  %v2487_v41 = vpack.c.b16 %v2478_v27, %v2477_v34  ;;  %v2439_v42 = vpack.c.b16 %v2430_v51, %v2429_v22 }
 0x57f   : > { %v5421_v24 = vsel %vm1673_vm0, %v4297_v3, %v1672_v39  ;;  %v2486_v47 = vpack.c.b16 %v2476_v40, %v2475_v31 }
 0x580   : > { %1660 = vadd.xlane.f32.xlu0 %v5405_v44  ;;  %v2479_v12 = vunpack.c.h.b16 %v2383_v60  ;;  %v2431_v16 = vunpack.c.l.b16 %v2383_v60 }
 0x583   : > { %v1595_v29 = vpop.f32.mrf.mxu2 }
 0x584   : > { %v1616_v20 = vadd.f32 %v4410_v35, %v1595_v29  ;;  %v2426_v29 = vunpack.c.l.b16 %v2378_v21 }
 0x585   : > { %v2366_v54 = vpop.f32.mrf.mxu1 }
 0x586   : > { %v2384_v9 = vpack.c.bf16 %v2366_v54, %v2317_v50  ;;  %v5410_v55 = vadd.f32 %v5317_v10, %v1616_v20  ;;  %v2438_v20 = vpack.c.b16 %v2428_v18, %v2427_v14  ;;  %v2473_v50 = vunpack.c.h.b16 %v5368_v0 }
 0x588   : > { %v2480_v5 = vunpack.c.h.b16 %v2384_v9  ;;  %1662 = vadd.xlane.f32.xlu1 %v5410_v55  ;;  %v2432_v62 = vunpack.c.l.b16 %v2384_v9  ;;  %v2425_v9 = vunpack.c.l.b16 %v5368_v0  ;;  %v2485_v3 = vpack.c.b16 %v2474_v48, %v2473_v50 }
 0x58a   : > { %v2488_v61 = vpack.c.b16 %v2480_v5, %v2479_v12  ;;  %v2440_v23 = vpack.c.b16 %v2432_v62, %v2431_v16  ;;  %v2437_v5 = vpack.c.b16 %v2426_v29, %v2425_v9 }
 0x58b   : > { %v1598_v33 = vpop.f32.mrf.mxu2 }
 0x58c   : > { %v1617_v37 = vadd.f32 %v4411_v36, %v1598_v33  ;;  %2497 = vmatpush.bf16.msra.mxu2 %v2488_v61 }
 0x58e   : > { %v5418_v6 = vadd.f32 %v5317_v10, %v1617_v37 }
 0x590   : > { %4116 = vmatpush.lsf.bf16.msrb.mxu2 %v2440_v23  ;;  %1664 = vadd.xlane.f32.xlu2 %v5418_v6 }
 0x593   : > { %v1637_v60 = vpop.xlane.xlu0 %1636  ;;  %v1600_v35 = vpop.f32.mrf.mxu2 }
 0x594   : > { %2498 = vmatpush.bf16.msra.mxu2 %v2487_v41  ;;  %v1675_v54 = vmul.f32 %v5421_v24, %v1637_v60  ;;  %v1618_v43 = vadd.f32 %v4412_v59, %v1600_v35 }
 0x596   : > { %v5428_v11 = vsub.f32 %v5325_v46, %v1675_v54  ;;  %v5431_v12 = vadd.f32 %v5317_v10, %v1618_v43 }
 0x598   : > { %4117 = vmatpush.lsf.bf16.msrb.mxu2 %v2439_v42  ;;  %1666 = vadd.xlane.f32.xlu0 %v5431_v12  ;;  %v1707_v16 = vmul.f32 %v5428_v11, %v5428_v11 }
 0x59a   : > { %1723 = vadd.xlane.f32.xlu1 %v1707_v16 }
 0x59b   : > { %v1639_v62 = vpop.xlane.xlu0 %1638 }
 0x59c   : > { %2499 = vmatpush.bf16.msra.mxu2 %v2486_v47  ;;  %v1676_v0 = vmul.f32 %v5421_v24, %v1639_v62 }
 0x59e   : > { %v5440_v46 = vsub.f32 %v5330_v7, %v1676_v0 }
 0x5a0   : > { %4118 = vmatpush.lsf.bf16.msrb.mxu2 %v2438_v20  ;;  %v1708_v10 = vmul.f32 %v5440_v46, %v5440_v46 }
 0x5a2   : > { %1725 = vadd.xlane.f32.xlu2 %v1708_v10 }
 0x5a3   : > { %v1641_v63 = vpop.xlane.xlu1 %1640 }
 0x5a4   : > { %2500 = vmatpush.bf16.msra.mxu2 %v2485_v3  ;;  %v1677_v57 = vmul.f32 %v5421_v24, %v1641_v63 }
 0x5a8   : > { %4119 = vmatpush.lsf.bf16.msrb.mxu2 %v2437_v5 }
 0x5ac   : > { %2501 = vmatpush.bf16.msra.mxu2 %v5363_v56  ;;  %v5450_v56 = vsub.f32 %v5339_v2, %v1677_v57 }
 0x5ae   : > { %v1709_v7 = vmul.f32 %v5450_v56, %v5450_v56 }
 0x5b0   : > { %4120 = vmatpush.lsf.bf16.msrb.mxu2 %v5365_v49  ;;  %1727 = vadd.xlane.f32.xlu0 %v1709_v7 }
 0x5b4   : > { %2502 = vmatpush.bf16.msra.mxu2 %v5347_v30  ;;  %v1643_v30 = vpop.xlane.xlu1 %1642 }
 0x5b8   : > { %4121 = vmatpush.lsf.bf16.msrb.mxu2 %v5349_v32  ;;  %v1678_v32 = vmul.f32 %v5421_v24, %v1643_v30 }
 0x5ba   : > { %v5458_v49 = vsub.f32 %v5344_v52, %v1678_v32 }
 0x5bc   : > { %2503 = vmatpush.bf16.msra.mxu2 %v5333_v4  ;;  %v1710_v4 = vmul.f32 %v5458_v49, %v5458_v49 }
 0x5be   : > { %1729 = vadd.xlane.f32.xlu1 %v1710_v4 }
 0x5c0   : > { %4122 = vmatpush.lsf.bf16.msrb.mxu2 %v5335_v13  ;;  %v1645_v13 = vpop.xlane.xlu2 %1644 }
 0x5c3   : > { %v1649_v51 = vpop.xlane.xlu0 %1648 }
 0x5c4   : > { %2504 = vmatpush.bf16.msra.mxu2 %v5319_v17  ;;  %v1679_v17 = vmul.f32 %v5421_v24, %v1645_v13  ;;  %v1681_v33 = vmul.f32 %v5421_v24, %v1649_v51  ;;  %v5533_v51 = vperm.slane %v5295_v25, 6 }
 0x5c6   : > { %v5464_v2 = vsub.f32 %v5353_v38, %v1679_v17  ;;  %v5476_v38 = vsub.f32 %v5371_v1, %v1681_v33 }
 0x5c8   : > { %4123 = vmatpush.lsf.bf16.msrb.mxu2 %v5321_v8  ;;  %v1711_v8 = vmul.f32 %v5464_v2, %v5464_v2  ;;  %v1647_v27 = vpop.xlane.xlu2 %1646  ;;  %v1713_v28 = vmul.f32 %v5476_v38, %v5476_v38 }
 0x5c9   : > { %v1680_v61 = vmul.f32 %v5421_v24, %v1647_v27  ;;  %v5530_v27 = vperm.slane %v5295_v25, 5 }
 0x5ca   : > { %4124 = vllmr.16.mxu2  ;;  %1731 = vadd.xlane.f32.xlu2 %v1711_v8 }
 0x5cb   : > { %v5470_v52 = vsub.f32 %v5358_v45, %v1680_v61  ;;  %1735 = vadd.xlane.f32.xlu1 %v1713_v28  ;;  %v1651_v34 = vpop.xlane.xlu1 %1650 }
 0x5cc   : > { %v1682_v36 = vmul.f32 %v5421_v24, %v1651_v34 }
 0x5cd   : > { %v1712_v23 = vmul.f32 %v5470_v52, %v5470_v52 }
 0x5ce   : > { %v5482_v45 = vsub.f32 %v5380_v58, %v1682_v36 }
 0x5cf   : > { %1733 = vadd.xlane.f32.xlu0 %v1712_v23 }
 0x5d0   : > { %v1714_v37 = vmul.f32 %v5482_v45, %v5482_v45 }
 0x5d2   : > { %1737 = vadd.xlane.f32.xlu2 %v1714_v37 }
 0x5d3   : > { %v1653_v21 = vpop.xlane.xlu2 %1652 }
 0x5d4   : > { %v1683_v22 = vmul.f32 %v5421_v24, %v1653_v21 }
 0x5d6   : > { %v5488_v1 = vsub.f32 %v5385_v15, %v1683_v22 }
 0x5d8   : > { %v1715_v39 = vmul.f32 %v5488_v1, %v5488_v1 }
 0x5da   : > { %1739 = vadd.xlane.f32.xlu0 %v1715_v39 }
 0x5db   : > { %v1655_v40 = vpop.xlane.xlu0 %1654 }
 0x5dc   : > { %v1684_v41 = vmul.f32 %v5421_v24, %v1655_v40 }
 0x5de   : > { %v5494_v58 = vsub.f32 %v5390_v19, %v1684_v41 }
 0x5e0   : > { %v1716_v18 = vmul.f32 %v5494_v58, %v5494_v58 }
 0x5e2   : > { %1741 = vadd.xlane.f32.xlu1 %v1716_v18 }
 0x5e3   : > { %v1657_v42 = vpop.xlane.xlu1 %1656 }
 0x5e4   : > { %v1685_v31 = vmul.f32 %v5421_v24, %v1657_v42 }
 0x5e6   : > { %v5500_v15 = vsub.f32 %v5395_v26, %v1685_v31 }
 0x5e8   : > { %v1717_v14 = vmul.f32 %v5500_v15, %v5500_v15 }
 0x5ea   : > { %1743 = vadd.xlane.f32.xlu0 %v1717_v14 }
 0x5eb   : > { %4125 = vmatmul.lmr.bf16.vlgmr.msra.gmra.16.mxu2  ;;  %v1659_v48 = vpop.xlane.xlu2 %1658 }
 0x5ec   : > { %v1686_v47 = vmul.f32 %v5421_v24, %v1659_v48 }
 0x5ee   : > { %v5506_v19 = vsub.f32 %v5400_v53, %v1686_v47 }
 0x5f0   : > { %v1718_v29 = vmul.f32 %v5506_v19, %v5506_v19 }
 0x5f2   : > { %1745 = vadd.xlane.f32.xlu1 %v1718_v29 }
 0x5f3   : > { %4126 = vmatmul.lmr.bf16.gmra.16.mxu2  ;;  %v1661_v60 = vpop.xlane.xlu0 %1660 }
 0x5f4   : > { %v1687_v35 = vmul.f32 %v5421_v24, %v1661_v60 }
 0x5f6   : > { %v5512_v26 = vsub.f32 %v5405_v44, %v1687_v35 }
 0x5f8   : > { %v1719_v20 = vmul.f32 %v5512_v26, %v5512_v26 }
 0x5fa   : > { %1747 = vadd.xlane.f32.xlu2 %v1719_v20 }
 0x5fb   : > { %4127 = vmatmul.lmr.bf16.gmra.16.mxu2  ;;  %v1663_v50 = vpop.xlane.xlu1 %1662 }
 0x5fc   : > { %v1688_v54 = vmul.f32 %v5421_v24, %v1663_v50 }
 0x5fe   : > { %v5518_v53 = vsub.f32 %v5410_v55, %v1688_v54 }
 0x600   : > { %v1720_v59 = vmul.f32 %v5518_v53, %v5518_v53 }
 0x602   : > { %1749 = vadd.xlane.f32.xlu0 %v1720_v59 }
 0x603   : > { %4128 = vmatmul.lmr.bf16.gmra.16.mxu2  ;;  %v5522_v43 = vpop.xlane.xlu2 %1664 }
 0x60b   : > { %4129 = vmatmul.lmr.bf16.gmra.16.mxu2  ;;  %v5525_v5 = vpop.xlane.xlu0 %1666 }
 0x60d   : > { %v1724_v44 = vpop.xlane.xlu1 %1723 }
 0x60e   : > { %v1755_v9 = vmul.f32 %v1724_v44, %v5421_v24 }
 0x610   : > { %v1771_v3 = vadd.f32 1e-05, %v1755_v9 }
 0x612   : > { %4298 = vrsqrt.f32 %v1771_v3  ;;  %vm1793_vm2 = vweird.f32 %v1771_v3 }
 0x613   : > { %4130 = vmatmul.lmr.bf16.gmra.16.mxu2 }
 0x615   : > { %v1726_v16 = vpop.xlane.xlu2 %1725 }
 0x616   : > { %v1756_v55 = vmul.f32 %v1726_v16, %v5421_v24 }
 0x618   : > { %v4299_v62 = vpop.eup %4298  ;;  %v1772_v0 = vadd.f32 1e-05, %v1756_v55 }
 0x619   : > { %v1788_v10 = vmul.f32 %v4299_v62, %v1771_v3  ;;  %vm1794_vm1 = vweird.f32 %v4299_v62 }
 0x61a   : > { %4300 = vrsqrt.f32 %v1772_v0  ;;  %vm1795_vm3 = vmor %vm1793_vm2, %vm1794_vm1  ;;  %vm1803_vm5 = vweird.f32 %v1772_v0 }
 0x61b   : > { %4131 = vmatmul.lmr.bf16.gmra.16.mxu2  ;;  %v1789_v63 = vmul.f32 %v4299_v62, %v1788_v10 }
 0x61d   : > { %v1790_v57 = vmul.f32 0.5, %v1789_v63 }
 0x61f   : > { %v1791_v32 = vsub.f32 1.5, %v1790_v57 }
 0x620   : > { %v4301_v4 = vpop.eup %4300 }
 0x621   : > { %v1792_v17 = vmul.f32 %v4299_v62, %v1791_v32  ;;  %v1798_v8 = vmul.f32 %v4301_v4, %v1772_v0  ;;  %vm1804_vm4 = vweird.f32 %v4301_v4 }
 0x622   : > { %vm1805_vm6 = vmor %vm1803_vm5, %vm1804_vm4 }
 0x623   : > { %4132 = vmatmul.lmr.bf16.gmra.16.mxu2  ;;  %v1728_v7 = vpop.xlane.xlu0 %1727  ;;  %v1796_v61 = vsel %vm1795_vm3, %v4299_v62, %v1792_v17  ;;  %v1799_v23 = vmul.f32 %v4301_v4, %v1798_v8 }
 0x624   : > { %v1757_v30 = vmul.f32 %v1728_v7, %v5421_v24  ;;  %v1947_v33 = vmul.f32 %v1796_v61, %v5428_v11 }
 0x625   : > { %v1800_v28 = vmul.f32 0.5, %v1799_v23 }
 0x626   : > { %v1773_v13 = vadd.f32 1e-05, %v1757_v30  ;;  %v1964_v36 = vmul.f32 %v5530_v27, %v1947_v33 }
 0x627   : > { %v1801_v21 = vsub.f32 1.5, %v1800_v28 }
 0x628   : > { %4302 = vrsqrt.f32 %v1773_v13  ;;  %v1981_v39 = vadd.f32 %v5533_v51, %v1964_v36  ;;  %vm1813_vm8 = vweird.f32 %v1773_v13 }
 0x629   : > { %v1802_v41 = vmul.f32 %v4301_v4, %v1801_v21 }
 0x62a   : > { %1997 = vst [vmem:[%s5540_s21] sm:$0xff] %v1981_v39 }
 0x62b   : > { %4133 = vmatmul.lmr.bf16.gmra.16.mxu2  ;;  %v1806_v25 = vsel %vm1805_vm6, %v4301_v4, %v1802_v41 }
 0x62c   : > { %v1948_v42 = vmul.f32 %v1806_v25, %v5440_v46 }
 0x62e   : > { %v4303_v22 = vpop.eup %4302  ;;  %v1965_v48 = vmul.f32 %v5530_v27, %v1948_v42 }
 0x62f   : > { %v1808_v18 = vmul.f32 %v4303_v22, %v1773_v13  ;;  %vm1814_vm7 = vweird.f32 %v4303_v22 }
 0x630   : > { %v1982_v35 = vadd.f32 %v5533_v51, %v1965_v48  ;;  %vm1815_vm9 = vmor %vm1813_vm8, %vm1814_vm7 }
 0x631   : > { %v1730_v34 = vpop.xlane.xlu1 %1729  ;;  %v1809_v11 = vmul.f32 %v4303_v22, %v1808_v18 }
 0x632   : > { %v1758_v37 = vmul.f32 %v1730_v34, %v5421_v24  ;;  %1998 = vst [vmem:[%s5540_s21 + $0x8] sm:$0xff] %v1982_v35 }
 0x633   : > { %4134 = vmatmul.lmr.bf16.gmra.16.mxu2  ;;  %v1810_v31 = vmul.f32 0.5, %v1809_v11 }
 0x634   : > { %v1774_v40 = vadd.f32 1e-05, %v1758_v37 }
 0x635   : > { %v1811_v29 = vsub.f32 1.5, %v1810_v31 }
 0x636   : > { %4304 = vrsqrt.f32 %v1774_v40  ;;  %vm1823_vm11 = vweird.f32 %v1774_v40 }
 0x637   : > { %v1812_v50 = vmul.f32 %v4303_v22, %v1811_v29 }
 0x639   : > { %v1816_v46 = vsel %vm1815_vm9, %v4303_v22, %v1812_v50 }
 0x63a   : > { %v1949_v44 = vmul.f32 %v1816_v46, %v5450_v56 }
 0x63b   : > { %4135 = vmatmul.lmr.bf16.gmra.16.mxu2 }
 0x63c   : > { %v4305_v60 = vpop.eup %4304  ;;  %v1966_v16 = vmul.f32 %v5530_v27, %v1949_v44 }
 0x63d   : > { %v1732_v14 = vpop.xlane.xlu2 %1731  ;;  %v1818_v54 = vmul.f32 %v4305_v60, %v1774_v40  ;;  %vm1824_vm10 = vweird.f32 %v4305_v60 }
 0x63e   : > { %v1759_v47 = vmul.f32 %v1732_v14, %v5421_v24  ;;  %v1983_v10 = vadd.f32 %v5533_v51, %v1966_v16  ;;  %vm1825_vm12 = vmor %vm1823_vm11, %vm1824_vm10  ;;  %v1736_v13 = vpop.xlane.xlu1 %1735 }
 0x63f   : > { %v1819_v59 = vmul.f32 %v4305_v60, %v1818_v54  ;;  %v1761_v8 = vmul.f32 %v1736_v13, %v5421_v24 }
 0x640   : > { %v1775_v20 = vadd.f32 1e-05, %v1759_v47  ;;  %1999 = vst [vmem:[%s5540_s21 + $0x10] sm:$0xff] %v1983_v10 }
 0x641   : > { %v1820_v9 = vmul.f32 0.5, %v1819_v59  ;;  %v1777_v28 = vadd.f32 1e-05, %v1761_v8 }
 0x642   : > { %4306 = vrsqrt.f32 %v1775_v20  ;;  %v1734_v3 = vpop.xlane.xlu0 %1733  ;;  %vm1833_vm14 = vweird.f32 %v1775_v20 }
 0x643   : > { %4136 = vmatmul.lmr.bf16.gmra.16.mxu2  ;;  %v1760_v55 = vmul.f32 %v1734_v3, %v5421_v24  ;;  %v1821_v62 = vsub.f32 1.5, %v1820_v9  ;;  %vm1853_vm4 = vweird.f32 %v1777_v28 }
 0x645   : > { %v1776_v63 = vadd.f32 1e-05, %v1760_v55  ;;  %v1822_v57 = vmul.f32 %v4305_v60, %v1821_v62  ;;  %v1738_v39 = vpop.xlane.xlu2 %1737 }
 0x646   : > { %v1762_v41 = vmul.f32 %v1738_v39, %v5421_v24 }
 0x647   : > { %4308 = vrsqrt.f32 %v1776_v63  ;;  %v1826_v56 = vsel %vm1825_vm12, %v4305_v60, %v1822_v57  ;;  %vm1843_vm1 = vweird.f32 %v1776_v63 }
 0x648   : > { %v4307_v0 = vpop.eup %4306  ;;  %v1950_v32 = vmul.f32 %v1826_v56, %v5458_v49  ;;  %4310 = vrsqrt.f32 %v1777_v28  ;;  %v1778_v42 = vadd.f32 1e-05, %v1762_v41 }
 0x649   : > { %v1828_v7 = vmul.f32 %v4307_v0, %v1775_v20  ;;  %vm1834_vm13 = vweird.f32 %v4307_v0 }
 0x64a   : > { %v1967_v17 = vmul.f32 %v5530_v27, %v1950_v32  ;;  %vm1835_vm15 = vmor %vm1833_vm14, %vm1834_vm13  ;;  %4312 = vrsqrt.f32 %v1778_v42  ;;  %vm1863_vm7 = vweird.f32 %v1778_v42 }
 0x64b   : > { %4137 = vmatmul.lmr.bf16.gmra.16.mxu2  ;;  %v1829_v30 = vmul.f32 %v4307_v0, %v1828_v7 }
 0x64c   : > { %v1984_v33 = vadd.f32 %v5533_v51, %v1967_v17 }
 0x64d   : > { %v1830_v4 = vmul.f32 0.5, %v1829_v30  ;;  %v4309_v23 = vpop.eup %4308  ;;  %v1740_v60 = vpop.xlane.xlu0 %1739 }
 0x64e   : > { %v1838_v36 = vmul.f32 %v4309_v23, %v1776_v63  ;;  %2000 = vst [vmem:[%s5540_s21 + $0x18] sm:$0xff] %v1984_v33  ;;  %vm1844_vm0 = vweird.f32 %v4309_v23  ;;  %v4311_v25 = vpop.eup %4310  ;;  %v1763_v20 = vmul.f32 %v1740_v60, %v5421_v24 }
 0x64f   : > { %v1831_v61 = vsub.f32 1.5, %v1830_v4  ;;  %v1848_v14 = vmul.f32 %v4311_v25, %v1777_v28  ;;  %vm1845_vm2 = vmor %vm1843_vm1, %vm1844_vm0  ;;  %vm1854_vm3 = vweird.f32 %v4311_v25 }
 0x650   : > { %v1839_v37 = vmul.f32 %v4309_v23, %v1838_v36  ;;  %v4313_v46 = vpop.eup %4312  ;;  %v1779_v44 = vadd.f32 1e-05, %v1763_v20  ;;  %vm1855_vm5 = vmor %vm1853_vm4, %vm1854_vm3 }
 0x651   : > { %v1832_v34 = vmul.f32 %v4307_v0, %v1831_v61  ;;  %v1849_v48 = vmul.f32 %v4311_v25, %v1848_v14  ;;  %v1858_v3 = vmul.f32 %v4313_v46, %v1778_v42  ;;  %vm1864_vm6 = vweird.f32 %v4313_v46 }
 0x652   : > { %v1840_v22 = vmul.f32 0.5, %v1839_v37  ;;  %4314 = vrsqrt.f32 %v1779_v44  ;;  %vm1865_vm8 = vmor %vm1863_vm7, %vm1864_vm6  ;;  %vm1873_vm10 = vweird.f32 %v1779_v44 }
 0x653   : > { %4138 = vmatmul.lmr.bf16.gmra.16.mxu2  ;;  %v1836_v49 = vsel %vm1835_vm15, %v4307_v0, %v1832_v34  ;;  %v1850_v29 = vmul.f32 0.5, %v1849_v48  ;;  %v1859_v16 = vmul.f32 %v4313_v46, %v1858_v3 }
 0x654   : > { %v1951_v21 = vmul.f32 %v1836_v49, %v5464_v2  ;;  %v1841_v18 = vsub.f32 1.5, %v1840_v22 }
 0x655   : > { %v1851_v50 = vsub.f32 1.5, %v1850_v29  ;;  %v1860_v62 = vmul.f32 0.5, %v1859_v16  ;;  %v1742_v0 = vpop.xlane.xlu1 %1741 }
 0x656   : > { %v1968_v40 = vmul.f32 %v5530_v27, %v1951_v21  ;;  %v1842_v31 = vmul.f32 %v4309_v23, %v1841_v18  ;;  %v1764_v63 = vmul.f32 %v1742_v0, %v5421_v24 }
 0x657   : > { %v1852_v9 = vmul.f32 %v4311_v25, %v1851_v50  ;;  %v1861_v57 = vsub.f32 1.5, %v1860_v62  ;;  %v2385_v50 = vld [vmem:[#allocation15] sm:$0xff] }
 0x658   : > { %v1985_v11 = vadd.f32 %v5533_v51, %v1968_v40  ;;  %v1846_v2 = vsel %vm1845_vm2, %v4309_v23, %v1842_v31  ;;  %v4315_v56 = vpop.eup %4314  ;;  %v1780_v32 = vadd.f32 1e-05, %v1764_v63 }
 0x659   : > { %v1952_v47 = vmul.f32 %v1846_v2, %v5470_v52  ;;  %v1856_v52 = vsel %vm1855_vm5, %v4311_v25, %v1852_v9  ;;  %v1862_v4 = vmul.f32 %v4313_v46, %v1861_v57  ;;  %v1868_v13 = vmul.f32 %v4315_v56, %v1779_v44  ;;  %v2389_v44 = vld [vmem:[#allocation15 + $0x20] sm:$0xff] }
 0x65a   : > { %2001 = vst [vmem:[%s5540_s21 + $0x20] sm:$0xff] %v1985_v11  ;;  %v1953_v55 = vmul.f32 %v1856_v52, %v5476_v38  ;;  %4316 = vrsqrt.f32 %v1780_v32  ;;  %vm1874_vm9 = vweird.f32 %v4315_v56  ;;  %vm1883_vm13 = vweird.f32 %v1780_v32 }
 0x65b   : > { %4139 = vmatmul.lmr.bf16.gmra.16.mxu2  ;;  %v1969_v35 = vmul.f32 %v5530_v27, %v1952_v47  ;;  %v1866_v38 = vsel %vm1865_vm8, %v4313_v46, %v1862_v4  ;;  %v1869_v17 = vmul.f32 %v4315_v56, %v1868_v13  ;;  %vm1875_vm11 = vmor %vm1873_vm10, %vm1874_vm9 }
 0x65c   : > { %v1970_v10 = vmul.f32 %v5530_v27, %v1953_v55  ;;  %v1954_v8 = vmul.f32 %v1866_v38, %v5482_v45 }
 0x65d   : > { %v1986_v59 = vadd.f32 %v5533_v51, %v1969_v35  ;;  %v1870_v61 = vmul.f32 0.5, %v1869_v17  ;;  %v1744_v23 = vpop.xlane.xlu0 %1743  ;;  %v2390_v17 = vld [vmem:[#allocation15 + $0x28] sm:$0xff] }
 0x65e   : > { %v1987_v30 = vadd.f32 %v5533_v51, %v1970_v10  ;;  %v1971_v33 = vmul.f32 %v5530_v27, %v1954_v8  ;;  %v1765_v28 = vmul.f32 %v1744_v23, %v5421_v24 }
 0x65f   : > { %2002 = vst [vmem:[%s5540_s21 + $0x28] sm:$0xff] %v1986_v59  ;;  %v1871_v34 = vsub.f32 1.5, %v1870_v61 }
 0x660   : > { %2003 = vst [vmem:[%s5540_s21 + $0x30] sm:$0xff] %v1987_v30  ;;  %v4317_v49 = vpop.eup %4316  ;;  %v1988_v37 = vadd.f32 %v5533_v51, %v1971_v33  ;;  %v1781_v21 = vadd.f32 1e-05, %v1765_v28 }
 0x661   : > { %v1872_v22 = vmul.f32 %v4315_v56, %v1871_v34  ;;  %v1878_v39 = vmul.f32 %v4317_v49, %v1780_v32  ;;  %vm1884_vm12 = vweird.f32 %v4317_v49 }
 0x662   : > { %2004 = vst [vmem:[%s5540_s21 + $0x38] sm:$0xff] %v1988_v37  ;;  %4318 = vrsqrt.f32 %v1781_v21  ;;  %vm1885_vm14 = vmor %vm1883_vm13, %vm1884_vm12  ;;  %vm1893_vm0 = vweird.f32 %v1781_v21 }
 0x663   : > { %4140 = vmatmul.lmr.bf16.gmra.16.mxu2  ;;  %v1876_v45 = vsel %vm1875_vm11, %v4315_v56, %v1872_v22  ;;  %v1879_v40 = vmul.f32 %v4317_v49, %v1878_v39 }
 0x664   : > { %v1955_v41 = vmul.f32 %v1876_v45, %v5488_v1 }
 0x665   : > { %v1880_v18 = vmul.f32 0.5, %v1879_v40  ;;  %v1746_v25 = vpop.xlane.xlu1 %1745 }
 0x666   : > { %v1972_v11 = vmul.f32 %v5530_v27, %v1955_v41  ;;  %v1766_v42 = vmul.f32 %v1746_v25, %v5421_v24  ;;  %v2387_v41 = vld [vmem:[#allocation15 + $0x10] sm:$0xff] }
 0x667   : > { %v1881_v31 = vsub.f32 1.5, %v1880_v18  ;;  %v2391_v25 = vld [vmem:[#allocation15 + $0x30] sm:$0xff] }
 0x668   : > { %v4319_v2 = vpop.eup %4318  ;;  %v1989_v48 = vadd.f32 %v5533_v51, %v1972_v11  ;;  %v1782_v47 = vadd.f32 1e-05, %v1766_v42 }
 0x669   : > { %v1882_v29 = vmul.f32 %v4317_v49, %v1881_v31  ;;  %v1888_v60 = vmul.f32 %v4319_v2, %v1781_v21  ;;  %vm1894_vm15 = vweird.f32 %v4319_v2 }
 0x66a   : > { %2005 = vst [vmem:[%s5540_s21 + $0x40] sm:$0xff] %v1989_v48  ;;  %4320 = vrsqrt.f32 %v1782_v47  ;;  %vm1895_vm1 = vmor %vm1893_vm0, %vm1894_vm15  ;;  %vm1903_vm3 = vweird.f32 %v1782_v47 }
 0x66b   : > { %v1886_v1 = vsel %vm1885_vm14, %v4317_v49, %v1882_v29  ;;  %v1889_v35 = vmul.f32 %v4319_v2, %v1888_v60 }
 0x66c   : > { %v1956_v20 = vmul.f32 %v1886_v1, %v5494_v58 }
 0x66d   : > { %v1890_v46 = vmul.f32 0.5, %v1889_v35  ;;  %v1748_v59 = vpop.xlane.xlu2 %1747 }
 0x66e   : > { %v5566_v54 = vpop.f32.mrf.mxu2  ;;  %v1973_v9 = vmul.f32 %v5530_v27, %v1956_v20  ;;  %v1767_v3 = vmul.f32 %v1748_v59, %v5421_v24 }
 0x66f   : > { %v1891_v52 = vsub.f32 1.5, %v1890_v46  ;;  %v5595_v62 = vadd.f32 %v5566_v54, %v2385_v50  ;;  %v2386_v54 = vld [vmem:[#allocation15 + $0x8] sm:$0xff] }
 0x670   : > { %v4321_v55 = vpop.eup %4320  ;;  %v1990_v0 = vadd.f32 %v5533_v51, %v1973_v9  ;;  %v1783_v10 = vadd.f32 1e-05, %v1767_v3 }
 0x671   : > { %v1892_v63 = vmul.f32 %v4319_v2, %v1891_v52  ;;  %v1898_v57 = vmul.f32 %v4321_v55, %v1782_v47  ;;  %vm1904_vm2 = vweird.f32 %v4321_v55 }
 0x672   : > { %2006 = vst [vmem:[%s5540_s21 + $0x48] sm:$0xff] %v1990_v0  ;;  %4322 = vrsqrt.f32 %v1783_v10  ;;  %vm1905_vm4 = vmor %vm1903_vm3, %vm1904_vm2  ;;  %vm1913_vm6 = vweird.f32 %v1783_v10 }
 0x673   : > { %v1896_v30 = vsel %vm1895_vm1, %v4319_v2, %v1892_v63  ;;  %v1899_v32 = vmul.f32 %v4321_v55, %v1898_v57 }
 0x674   : > { %v1957_v4 = vmul.f32 %v1896_v30, %v5500_v15 }
 0x675   : > { %v1900_v13 = vmul.f32 0.5, %v1899_v32  ;;  %v1750_v38 = vpop.xlane.xlu0 %1749  ;;  %v2393_v32 = vld [vmem:[#allocation15 + $0x40] sm:$0xff] }
 0x676   : > { %v5573_v7 = vpop.f32.mrf.mxu2  ;;  %v1974_v8 = vmul.f32 %v5530_v27, %v1957_v4  ;;  %v1768_v61 = vmul.f32 %v1750_v38, %v5421_v24  ;;  %v2394_v4 = vld [vmem:[#allocation15 + $0x48] sm:$0xff] }
 0x677   : > { %v1901_v23 = vsub.f32 1.5, %v1900_v13  ;;  %v5607_v34 = vadd.f32 %v5573_v7, %v2386_v54  ;;  %v2397_v54 = vld [vmem:[#allocation15 + $0x60] sm:$0xff] }
 0x678   : > { %v4323_v28 = vpop.eup %4322  ;;  %v1991_v49 = vadd.f32 %v5533_v51, %v1974_v8  ;;  %v1784_v37 = vadd.f32 1e-05, %v1768_v61 }
 0x679   : > { %v1902_v21 = vmul.f32 %v4321_v55, %v1901_v23  ;;  %v1908_v22 = vmul.f32 %v4323_v28, %v1783_v10  ;;  %vm1914_vm5 = vweird.f32 %v4323_v28 }
 0x67a   : > { %2007 = vst [vmem:[%s5540_s21 + $0x50] sm:$0xff] %v1991_v49  ;;  %4324 = vrsqrt.f32 %v1784_v37  ;;  %vm1915_vm7 = vmor %vm1913_vm6, %vm1914_vm5  ;;  %vm1923_vm9 = vweird.f32 %v1784_v37 }
 0x67b   : > { %v1906_v45 = vsel %vm1905_vm4, %v4321_v55, %v1902_v21  ;;  %v1909_v40 = vmul.f32 %v4323_v28, %v1908_v22  ;;  %v2392_v21 = vld [vmem:[#allocation15 + $0x38] sm:$0xff] }
 0x67c   : > { %v1958_v7 = vmul.f32 %v1906_v45, %v5506_v19  ;;  %v2388_v45 = vld [vmem:[#allocation15 + $0x18] sm:$0xff] }
 0x67d   : > { %v1910_v18 = vmul.f32 0.5, %v1909_v40  ;;  %v2395_v40 = vld [vmem:[#allocation15 + $0x50] sm:$0xff] }
 0x67e   : > { %v5580_v36 = vpop.f32.mrf.mxu2  ;;  %v1975_v11 = vmul.f32 %v5530_v27, %v1958_v7  ;;  %v2396_v7 = vld [vmem:[#allocation15 + $0x58] sm:$0xff] }
 0x67f   : > { %v1911_v42 = vsub.f32 1.5, %v1910_v18  ;;  %v5618_v48 = vadd.f32 %v5580_v36, %v2387_v41  ;;  %v2399_v18 = vld [vmem:[#allocation15 + $0x70] sm:$0xff] }
 0x680   : > { %v4325_v2 = vpop.eup %4324  ;;  %v1992_v47 = vadd.f32 %v5533_v51, %v1975_v11 }
 0x681   : > { %v1912_v60 = vmul.f32 %v4323_v28, %v1911_v42  ;;  %v1918_v19 = vmul.f32 %v4325_v2, %v1784_v37  ;;  %vm1924_vm8 = vweird.f32 %v4325_v2 }
 0x682   : > { %2008 = vst [vmem:[%s5540_s21 + $0x58] sm:$0xff] %v1992_v47  ;;  %vm1925_vm10 = vmor %vm1923_vm9, %vm1924_vm8 }
 0x683   : > { %v1916_v35 = vsel %vm1915_vm7, %v4323_v28, %v1912_v60  ;;  %v1919_v20 = vmul.f32 %v4325_v2, %v1918_v19 }
 0x684   : > { %v1959_v50 = vmul.f32 %v1916_v35, %v5512_v26 }
 0x685   : > { %v1920_v36 = vmul.f32 0.5, %v1919_v20 }
 0x686   : > { %v5587_v14 = vpop.f32.mrf.mxu2  ;;  %v1976_v46 = vmul.f32 %v5530_v27, %v1959_v50 }
 0x687   : > { %v1921_v59 = vsub.f32 1.5, %v1920_v36 }
 0x688   : > { %v1993_v9 = vadd.f32 %v5533_v51, %v1976_v46 }
 0x689   : > { %v1922_v3 = vmul.f32 %v4325_v2, %v1921_v59 }
 0x68a   : > { %2009 = vst [vmem:[%s5540_s21 + $0x60] sm:$0xff] %v1993_v9 }
 0x68b   : > { %v1926_v52 = vsel %vm1925_vm10, %v4325_v2, %v1922_v3 }
 0x68e   : > { %v2516_v16 = vpop.f32.mrf.mxu2 }
 0x68f   : > { %v5598_v58 = vadd.f32 %v2516_v16, %v2389_v44  ;;  %v1960_v16 = vmul.f32 %v1926_v52, %v5518_v53 }
 0x691   : > { %v2546_v56 = vmax.f32 %v5595_v62, %v5598_v58  ;;  %v1977_v55 = vmul.f32 %v5530_v27, %v1960_v16 }
 0x693   : > { %v1994_v26 = vadd.f32 %v5533_v51, %v1977_v55 }
 0x695   : > { %2010 = vst [vmem:[%s5540_s21 + $0x68] sm:$0xff] %v1994_v26 }
 0x696   : > { %v2518_v33 = vpop.f32.mrf.mxu2 }
 0x697   : > { %v5610_v15 = vadd.f32 %v2518_v33, %v2390_v17  ;;  %v2398_v17 = vld [vmem:[#allocation15 + $0x68] sm:$0xff] }
 0x699   : > { %v2547_v39 = vmax.f32 %v5607_v34, %v5610_v15 }
 0x69e   : > { %v2521_v31 = vpop.f32.mrf.mxu2 }
 0x69f   : > { %v5621_v29 = vadd.f32 %v2521_v31, %v2391_v25  ;;  %v2514_v25 = vadd.f32 %v5587_v14, %v2388_v45 }
 0x6a1   : > { %v2548_v1 = vmax.f32 %v5618_v48, %v5621_v29 }
 0x6a6   : > { %v2523_v44 = vpop.f32.mrf.mxu2 }
 0x6a7   : > { %v2524_v41 = vadd.f32 %v2523_v44, %v2392_v21 }
 0x6a9   : > { %v2549_v42 = vmax.f32 %v2514_v25, %v2524_v41 }
 0x6ae   : > { %v2526_v0 = vpop.f32.mrf.mxu2 }
 0x6af   : > { %v5634_v13 = vadd.f32 %v2526_v0, %v2393_v32 }
 0x6b1   : > { %v2550_v61 = vmax.f32 %v2546_v56, %v5634_v13 }
 0x6b6   : > { %v2528_v10 = vpop.f32.mrf.mxu2 }
 0x6b7   : > { %v5636_v38 = vadd.f32 %v2528_v10, %v2394_v4 }
 0x6b9   : > { %v2551_v23 = vmax.f32 %v2547_v39, %v5636_v38  ;;  %v2400_v39 = vld [vmem:[#allocation15 + $0x78] sm:$0xff] }
 0x6be   : > { %v2531_v63 = vpop.f32.mrf.mxu2 }
 0x6bf   : > { %v2532_v11 = vadd.f32 %v2531_v63, %v2395_v40 }
 0x6c1   : > { %v2552_v47 = vmax.f32 %v2548_v1, %v2532_v11 }
 0x6c6   : > { %v2533_v57 = vpop.f32.mrf.mxu2 }
 0x6c7   : > { %v5650_v56 = vadd.f32 %v2533_v57, %v2396_v7 }
 0x6c9   : > { %v2553_v60 = vmax.f32 %v2549_v42, %v5650_v56 }
 0x6ce   : > { %v2536_v30 = vpop.f32.mrf.mxu2 }
 0x6cf   : > { %v5638_v8 = vadd.f32 %v2536_v30, %v2397_v54 }
 0x6d1   : > { %v2554_v28 = vmax.f32 %v2550_v61, %v5638_v8 }
 0x6d6   : > { %v2538_v53 = vpop.f32.mrf.mxu2 }
 0x6d7   : > { %v5645_v33 = vadd.f32 %v2538_v53, %v2398_v17 }
 0x6d9   : > { %v2555_v49 = vmax.f32 %v2551_v23, %v5645_v33 }
 0x6db   : > { %v2558_v37 = vmax.f32 %v2554_v28, %v2555_v49 }
 0x6de   : > { %v2541_v22 = vpop.f32.mrf.mxu2 }
 0x6df   : > { %v5652_v31 = vadd.f32 %v2541_v22, %v2399_v18 }
 0x6e1   : > { %v2556_v35 = vmax.f32 %v2552_v47, %v5652_v31 }
 0x6e6   : > { %v2543_v2 = vpop.f32.mrf.mxu2 }
 0x6e7   : > { %v5655_v19 = vadd.f32 %v2543_v2, %v2400_v39 }
 0x6e9   : > { %v2557_v20 = vmax.f32 %v2553_v60, %v5655_v19 }
 0x6eb   : > { %v2559_v50 = vmax.f32 %v2556_v35, %v2557_v20 }
 0x6ed   : > { %v2560_v36 = vmax.f32 %v2558_v37, %v2559_v50 }
 0x6ef   : > { %v2561_v14 = vrot.slane %v2560_v36, 4 }
 0x6f1   : > { %v2562_v46 = vmax.f32 %v2560_v36, %v2561_v14 }
 0x6f3   : > { %v2563_v59 = vrot.slane %v2562_v46, 2 }
 0x6f5   : > { %v2564_v44 = vmax.f32 %v2562_v46, %v2563_v59 }
 0x6f7   : > { %v2565_v9 = vrot.slane %v2564_v44, 1 }
 0x6f9   : > { %v5659_v3 = vmax.f32 %v2564_v44, %v2565_v9 }
 0x6fb   : > { %v2567_v1 = vsub.f32 %v5595_v62, %v5659_v3  ;;  %v2568_v52 = vsub.f32 %v5607_v34, %v5659_v3  ;;  %v2569_v16 = vsub.f32 %v5618_v48, %v5659_v3  ;;  %v2570_v55 = vsub.f32 %v2514_v25, %v5659_v3 }
 0x6fc   : > { %v2571_v0 = vsub.f32 %v5598_v58, %v5659_v3  ;;  %v2572_v26 = vsub.f32 %v5610_v15, %v5659_v3  ;;  %v2573_v10 = vsub.f32 %v5621_v29, %v5659_v3  ;;  %v2574_v48 = vsub.f32 %v2524_v41, %v5659_v3 }
 0x6fd   : > { %v2583_v63 = vmul.f32 1.442695, %v2567_v1  ;;  %v2585_v57 = vmul.f32 1.442695, %v2568_v52  ;;  %v2587_v62 = vmul.f32 1.442695, %v2569_v16  ;;  %v2575_v15 = vsub.f32 %v5634_v13, %v5659_v3 }
 0x6fe   : > { %v2589_v34 = vmul.f32 1.442695, %v2570_v55  ;;  %v2591_v30 = vmul.f32 1.442695, %v2571_v0  ;;  %v2593_v32 = vmul.f32 1.442695, %v2572_v26  ;;  %v2576_v53 = vsub.f32 %v5636_v38, %v5659_v3 }
 0x6ff   : > { %4326 = vpow2.f32 %v2583_v63  ;;  %v2595_v29 = vmul.f32 1.442695, %v2573_v10  ;;  %v2597_v61 = vmul.f32 1.442695, %v2574_v48  ;;  %v2577_v49 = vsub.f32 %v2532_v11, %v5659_v3 }
 0x700   : > { %4328 = vpow2.f32 %v2585_v57  ;;  %v2599_v13 = vmul.f32 1.442695, %v2575_v15  ;;  %v2578_v22 = vsub.f32 %v5650_v56, %v5659_v3  ;;  %v2601_v45 = vmul.f32 1.442695, %v2576_v53 }
 0x701   : > { %4330 = vpow2.f32 %v2587_v62  ;;  %v2579_v7 = vsub.f32 %v5638_v8, %v5659_v3  ;;  %v2603_v41 = vmul.f32 1.442695, %v2577_v49  ;;  %v2580_v11 = vsub.f32 %v5645_v33, %v5659_v3 }
 0x702   : > { %4332 = vpow2.f32 %v2589_v34  ;;  %v2605_v39 = vmul.f32 1.442695, %v2578_v22  ;;  %v2581_v2 = vsub.f32 %v5652_v31, %v5659_v3  ;;  %v2582_v8 = vsub.f32 %v5655_v19, %v5659_v3 }
 0x703   : > { %4334 = vpow2.f32 %v2591_v30  ;;  %v2607_v47 = vmul.f32 1.442695, %v2579_v7  ;;  %v2609_v20 = vmul.f32 1.442695, %v2580_v11 }
 0x704   : > { %4336 = vpow2.f32 %v2593_v32  ;;  %v2611_v33 = vmul.f32 1.442695, %v2581_v2  ;;  %v2613_v59 = vmul.f32 1.442695, %v2582_v8 }
 0x705   : > { %v5675_v4 = vpop.eup %4326  ;;  %4338 = vpow2.f32 %v2595_v29 }
 0x706   : > { %v5677_v58 = vpop.eup %4328  ;;  %4340 = vpow2.f32 %v2597_v61 }
 0x707   : > { %v2615_v54 = vadd.f32 %v5677_v58, %v5675_v4  ;;  %v5683_v17 = vpop.eup %4330  ;;  %4342 = vpow2.f32 %v2599_v13 }
 0x708   : > { %v5688_v28 = vpop.eup %4332  ;;  %4344 = vpow2.f32 %v2601_v45 }
 0x709   : > { %v2616_v23 = vadd.f32 %v5683_v17, %v2615_v54  ;;  %v5692_v21 = vpop.eup %4334  ;;  %4346 = vpow2.f32 %v2603_v41 }
 0x70a   : > { %v5697_v40 = vpop.eup %4336  ;;  %4348 = vpow2.f32 %v2605_v39 }
 0x70b   : > { %v2617_v37 = vadd.f32 %v5688_v28, %v2616_v23  ;;  %v4339_v25 = vpop.eup %4338  ;;  %4350 = vpow2.f32 %v2607_v47 }
 0x70c   : > { %v4341_v42 = vpop.eup %4340  ;;  %4352 = vpow2.f32 %v2609_v20  ;;  %v4001_v20 = vld [vmem:[#allocation2 + $0x20] sm:$0xff] }
 0x70d   : > { %v2618_v38 = vadd.f32 %v5692_v21, %v2617_v37  ;;  %v4343_v35 = vpop.eup %4342  ;;  %4354 = vpow2.f32 %v2611_v33  ;;  %v3903_v33 = vld [vmem:[#allocation12 + $0x54] sm:$0xf] }
 0x70e   : > { %v4345_v36 = vpop.eup %4344  ;;  %4356 = vpow2.f32 %v2613_v59 }
 0x70f   : > { %v2619_v18 = vadd.f32 %v5697_v40, %v2618_v38  ;;  %v4347_v46 = vpop.eup %4346 }
 0x710   : > { %v4349_v9 = vpop.eup %4348 }
 0x711   : > { %v2620_v56 = vadd.f32 %v4339_v25, %v2619_v18  ;;  %v4351_v1 = vpop.eup %4350 }
 0x712   : > { %v4353_v16 = vpop.eup %4352 }
 0x713   : > { %v2621_v60 = vadd.f32 %v4341_v42, %v2620_v56  ;;  %v4355_v19 = vpop.eup %4354 }
 0x714   : > { %v4357_v0 = vpop.eup %4356 }
 0x715   : > { %v2622_v50 = vadd.f32 %v4343_v35, %v2621_v60 }
 0x717   : > { %v2623_v14 = vadd.f32 %v4345_v36, %v2622_v50  ;;  %v3907_v50 = vld [vmem:[#allocation12 + $0x64] sm:$0xf] }
 0x719   : > { %v2624_v44 = vadd.f32 %v4347_v46, %v2623_v14 }
 0x71b   : > { %v2625_v31 = vadd.f32 %v4349_v9, %v2624_v44  ;;  %v3899_v44 = vld [vmem:[#allocation12 + $0x44] sm:$0xf] }
 0x71d   : > { %v2626_v52 = vadd.f32 %v4351_v1, %v2625_v31 }
 0x71f   : > { %v2627_v55 = vadd.f32 %v4353_v16, %v2626_v52  ;;  %v4007_v52 = vld [vmem:[#allocation12 + $0x38] sm:$0xf0] }
 0x721   : > { %v2628_v3 = vadd.f32 %v4355_v19, %v2627_v55  ;;  %v4002_v55 = vld [vmem:[#allocation2 + $0x28] sm:$0xff] }
 0x723   : > { %v2629_v26 = vadd.f32 %v4357_v0, %v2628_v3  ;;  %v4006_v3 = vld [vmem:[#allocation12 + $0x28] sm:$0xf0] }
 0x725   : > { %v2630_v10 = vrot.slane %v2629_v26, 4 }
 0x727   : > { %v2631_v63 = vadd.f32 %v2630_v10, %v2629_v26  ;;  %v4005_v10 = vld [vmem:[#allocation12 + $0x18] sm:$0xf0] }
 0x729   : > { %v2632_v57 = vrot.slane %v2631_v63, 2 }
 0x72b   : > { %v2633_v62 = vadd.f32 %v2632_v57, %v2631_v63  ;;  %v3883_v57 = vld [vmem:[#allocation12 + $0x4] sm:$0xf] }
 0x72d   : > { %v2634_v34 = vrot.slane %v2633_v62, 1 }
 0x72f   : > { %v2635_v30 = vadd.f32 %v2634_v34, %v2633_v62  ;;  %v4004_v62 = vld [vmem:[#allocation12 + $0x8] sm:$0xf0] }
 0x730   : > { %v3884_v34 = vor.u32 %v4004_v62, %v3883_v57 }
 0x731   : > { %4358 = vrcp.f32 %v2635_v30  ;;  %v4003_v30 = vld [vmem:[#allocation2 + $0x38] sm:$0xff] }
 0x737   : > { %v4359_v48 = vpop.eup %4358 }
 0x738   : > { %v2651_v32 = vmul.f32 %v4359_v48, %v4355_v19  ;;  %v2652_v15 = vmul.f32 %v4359_v48, %v4357_v0  ;;  %v2649_v29 = vmul.f32 %v4359_v48, %v4351_v1  ;;  %v2650_v54 = vmul.f32 %v4359_v48, %v4353_v16  ;;  %v3895_v1 = vld [vmem:[#allocation12 + $0x34] sm:$0xf]  ;;  %v3891_v19 = vld [vmem:[#allocation12 + $0x24] sm:$0xf] }
 0x739   : > { %v2647_v53 = vmul.f32 %v4359_v48, %v4347_v46  ;;  %v2648_v61 = vmul.f32 %v4359_v48, %v4349_v9  ;;  %v2645_v23 = vmul.f32 %v4359_v48, %v4343_v35  ;;  %v2646_v49 = vmul.f32 %v4359_v48, %v4345_v36  ;;  %v4010_v36 = vld [vmem:[#allocation12 + $0x68] sm:$0xf0]  ;;  %v4009_v46 = vld [vmem:[#allocation12 + $0x58] sm:$0xf0]  ;;  %v3887_v0 = vld [vmem:[#allocation12 + $0x14] sm:$0xf] }
 0x73a   : > { %v2660_v13 = vpack.c.bf16 %v2652_v15, %v2651_v32  ;;  %v2659_v37 = vpack.c.bf16 %v2650_v54, %v2649_v29  ;;  %v2643_v22 = vmul.f32 %v4359_v48, %v4339_v25  ;;  %v2644_v45 = vmul.f32 %v4359_v48, %v4341_v42  ;;  %v4011_v42 = vld [vmem:[#allocation12 + $0x78] sm:$0xf0]  ;;  %v4008_v9 = vld [vmem:[#allocation12 + $0x48] sm:$0xf0] }
 0x73b   : > { %v2658_v38 = vpack.c.bf16 %v2648_v61, %v2647_v53  ;;  %v2657_v7 = vpack.c.bf16 %v2646_v49, %v2645_v23  ;;  %v2641_v41 = vmul.f32 %v4359_v48, %v5692_v21  ;;  %v2642_v18 = vmul.f32 %v4359_v48, %v5697_v40  ;;  %v3996_v21 = vld [vmem:[#allocation2 + $0x30] sm:$0xff]  ;;  %v3997_v40 = vld [vmem:[#allocation2] sm:$0xff] }
 0x73c   : > { %2725 = vmatpush.bf16.msrb.mxu3 %v2660_v13  ;;  %v2656_v11 = vpack.c.bf16 %v2644_v45, %v2643_v22  ;;  %v2639_v39 = vmul.f32 %v4359_v48, %v5683_v17  ;;  %v2640_v56 = vmul.f32 %v4359_v48, %v5688_v28  ;;  %v2637_v2 = vmul.f32 %v4359_v48, %v5675_v4  ;;  %v3998_v17 = vld [vmem:[#allocation2 + $0x18] sm:$0xff]  ;;  %v3999_v28 = vld [vmem:[#allocation2 + $0x10] sm:$0xff]  ;;  %v4000_v4 = vld [vmem:[#allocation2 + $0x8] sm:$0xff] }
 0x73d   : > { %v2655_v47 = vpack.c.bf16 %v2642_v18, %v2641_v41  ;;  %v2638_v60 = vmul.f32 %v4359_v48, %v5677_v58  ;;  %v3911_v58 = vld [vmem:[#allocation12 + $0x74] sm:$0xf]  ;;  %v3908_v14 = vor.u32 %v4010_v36, %v3907_v50  ;;  %v3904_v59 = vor.u32 %v4009_v46, %v3903_v33 }
 0x73e   : > { %v2654_v35 = vpack.c.bf16 %v2640_v56, %v2639_v39  ;;  %v3912_v8 = vor.u32 %v4011_v42, %v3911_v58  ;;  %v3900_v31 = vor.u32 %v4008_v9, %v3899_v44  ;;  %v3896_v16 = vor.u32 %v4007_v52, %v3895_v1  ;;  %v4415_v42 = vld [vmem:[%s5054_s25 + $0x8] sm:$0xff]  ;;  %v4416_v36 = vld [vmem:[%s5054_s25 + $0x10] sm:$0xff]  ;;  %v4418_v1 = vld [vmem:[%s5054_s25 + $0x20] sm:$0xff] }
 0x73f   : > { %v2653_v25 = vpack.c.bf16 %v2638_v60, %v2637_v2  ;;  %v3892_v26 = vor.u32 %v4006_v3, %v3891_v19  ;;  %v3888_v63 = vor.u32 %v4005_v10, %v3887_v0  ;;  %v4419_v19 = vld [vmem:[%s5054_s25 + $0x28] sm:$0xff]  ;;  %v4420_v10 = vld [vmem:[%s5054_s25 + $0x30] sm:$0xff] }
 0x740   : > { %2726 = vmatpush.bf16.msrb.mxu3 %v2659_v37  ;;  %2846 = vmatpush.bf16.msra.mxu0 %v3912_v8 }
 0x744   : > { %2727 = vmatpush.bf16.msrb.mxu3 %v2658_v38  ;;  %2847 = vmatpush.bf16.msra.mxu0 %v3908_v14 }
 0x748   : > { %2728 = vmatpush.bf16.msrb.mxu3 %v2657_v7  ;;  %2848 = vmatpush.bf16.msra.mxu0 %v3904_v59  ;;  %v4417_v59 = vld [vmem:[%s5054_s25 + $0x18] sm:$0xff] }
 0x74c   : > { %2729 = vmatpush.bf16.msrb.mxu3 %v2656_v11  ;;  %2849 = vmatpush.bf16.msra.mxu0 %v3900_v31 }
 0x750   : > { %2730 = vmatpush.bf16.msrb.mxu3 %v2655_v47  ;;  %2850 = vmatpush.bf16.msra.mxu0 %v3896_v16 }
 0x754   : > { %2731 = vmatpush.bf16.msrb.mxu3 %v2654_v35  ;;  %2851 = vmatpush.bf16.msra.mxu0 %v3892_v26 }
 0x758   : > { %2732 = vmatpush.bf16.msrb.mxu3 %v2653_v25  ;;  %2852 = vmatpush.bf16.msra.mxu0 %v3888_v63  ;;  %v5714_v25 = vld [vmem:[#allocation14] sm:$0xff] }
 0x75b   : > { %2733 = vmatmul.bf16.vlgmr.msrb.gmra.mxu3 %v3996_v21  ;;  %v5717_v21 = vperm.slane %v5714_v25, 4 }
 0x75c   : > { %2853 = vmatpush.bf16.msra.mxu0 %v3884_v34  ;;  %v4421_v34 = vld [vmem:[%s5054_s25 + $0x38] sm:$0xff] }
 0x76b   : > { %2738 = vmatmul.bf16.gmra.mxu3 %v3997_v40 }
 0x77b   : > { %2743 = vmatmul.bf16.gmra.mxu3 %v3998_v17  ;;  %v4414_v17 = vld [vmem:[%s5054_s25] sm:$0xff] }
 0x78b   : > { %2748 = vmatmul.bf16.gmra.mxu3 %v3999_v28 }
 0x79b   : > { %2753 = vmatmul.bf16.gmra.mxu3 %v4000_v4 }
 0x7ab   : > { %2758 = vmatmul.bf16.gmra.mxu3 %v4001_v20 }
 0x7bb   : > { %2763 = vmatmul.bf16.gmra.mxu3 %v4002_v55 }
 0x7cb   : > { %2768 = vmatmul.bf16.gmra.mxu3 %v4003_v30 }
 0x7de   : > { %v2734_v48 = vpop.f32.mrf.mxu3 }
 0x7e6   : > { %v2736_v32 = vpop.f32.mrf.mxu3 }
 0x7e7   : > { %v2774_v15 = vpack.c.bf16 %v2736_v32, %v2734_v48 }
 0x7e9   : > { %2854 = vmatmul.bf16.vlgmr.msra.gmra.mxu0 %v2774_v15  ;;  %v4422_v15 = vld [vmem:[%s5054_s25 + $0x40] sm:$0xff] }
 0x7ee   : > { %v2739_v29 = vpop.f32.mrf.mxu3 }
 0x7f6   : > { %v2741_v54 = vpop.f32.mrf.mxu3 }
 0x7f7   : > { %v2775_v53 = vpack.c.bf16 %v2741_v54, %v2739_v29 }
 0x7f9   : > { %2859 = vmatmul.bf16.gmra.mxu0 %v2775_v53 }
 0x7fe   : > { %v2744_v61 = vpop.f32.mrf.mxu3 }
 0x806   : > { %v2746_v23 = vpop.f32.mrf.mxu3 }
 0x807   : > { %v2776_v49 = vpack.c.bf16 %v2746_v23, %v2744_v61  ;;  %v4423_v61 = vld [vmem:[%s5054_s25 + $0x48] sm:$0xff] }
 0x809   : > { %2864 = vmatmul.bf16.gmra.mxu0 %v2776_v49 }
 0x80e   : > { %v2749_v13 = vpop.f32.mrf.mxu3 }
 0x816   : > { %v2751_v37 = vpop.f32.mrf.mxu3 }
 0x817   : > { %v2777_v22 = vpack.c.bf16 %v2751_v37, %v2749_v13  ;;  %v4424_v37 = vld [vmem:[%s5054_s25 + $0x50] sm:$0xff] }
 0x819   : > { %2869 = vmatmul.bf16.gmra.mxu0 %v2777_v22 }
 0x81e   : > { %v2754_v45 = vpop.f32.mrf.mxu3 }
 0x826   : > { %v2756_v38 = vpop.f32.mrf.mxu3 }
 0x827   : > { %v2778_v7 = vpack.c.bf16 %v2756_v38, %v2754_v45 }
 0x829   : > { %2874 = vmatmul.bf16.gmra.mxu0 %v2778_v7  ;;  %v4425_v7 = vld [vmem:[%s5054_s25 + $0x58] sm:$0xff] }
 0x82e   : > { %v2759_v41 = vpop.f32.mrf.mxu3 }
 0x836   : > { %v2761_v18 = vpop.f32.mrf.mxu3 }
 0x837   : > { %v2779_v11 = vpack.c.bf16 %v2761_v18, %v2759_v41 }
 0x839   : > { %2879 = vmatmul.bf16.gmra.mxu0 %v2779_v11 }
 0x83e   : > { %v2764_v39 = vpop.f32.mrf.mxu3 }
 0x846   : > { %v2766_v56 = vpop.f32.mrf.mxu3 }
 0x847   : > { %v2780_v2 = vpack.c.bf16 %v2766_v56, %v2764_v39  ;;  %v4426_v39 = vld [vmem:[%s5054_s25 + $0x60] sm:$0xff] }
 0x849   : > { %2884 = vmatmul.bf16.gmra.mxu0 %v2780_v2 }
 0x84e   : > { %v2769_v47 = vpop.f32.mrf.mxu3 }
 0x856   : > { %v2771_v60 = vpop.f32.mrf.mxu3 }
 0x857   : > { %v2781_v35 = vpack.c.bf16 %v2771_v60, %v2769_v47  ;;  %v4427_v60 = vld [vmem:[%s5054_s25 + $0x68] sm:$0xff] }
 0x859   : > { %2889 = vmatmul.bf16.gmra.mxu0 %v2781_v35 }
 0x866   : > { %v2855_v40 = vpop.f32.mrf.mxu0 }
 0x867   : > { %v2895_v28 = vadd.f32 %v4414_v17, %v2855_v40 }
 0x869   : > { %v5721_v4 = vadd.f32 %v5717_v21, %v2895_v28  ;;  %v4428_v28 = vld [vmem:[%s5054_s25 + $0x70] sm:$0xff] }
 0x86b   : > { %2928 = vadd.xlane.f32.xlu2 %v5721_v4 }
 0x86e   : > { %v2857_v58 = vpop.f32.mrf.mxu0 }
 0x86f   : > { %v2896_v8 = vadd.f32 %v4415_v42, %v2857_v58  ;;  %v1689_v42 = vmul.f32 %v5421_v24, %v5522_v43 }
 0x871   : > { %v5726_v20 = vadd.f32 %v5717_v21, %v2896_v8 }
 0x873   : > { %2930 = vadd.xlane.f32.xlu0 %v5726_v20 }
 0x876   : > { %v2860_v50 = vpop.f32.mrf.mxu0 }
 0x877   : > { %v2897_v33 = vadd.f32 %v4416_v36, %v2860_v50  ;;  %v5797_v50 = vsub.f32 %v5418_v6, %v1689_v42 }
 0x879   : > { %v5731_v14 = vadd.f32 %v5717_v21, %v2897_v33  ;;  %v1721_v43 = vmul.f32 %v5797_v50, %v5797_v50 }
 0x87b   : > { %2932 = vadd.xlane.f32.xlu1 %v5731_v14 }
 0x87e   : > { %v2862_v46 = vpop.f32.mrf.mxu0 }
 0x87f   : > { %v2898_v44 = vadd.f32 %v4417_v59, %v2862_v46  ;;  %v4429_v59 = vld [vmem:[%s5054_s25 + $0x78] sm:$0xff] }
 0x881   : > { %v5736_v9 = vadd.f32 %v5717_v21, %v2898_v44 }
 0x883   : > { %2934 = vadd.xlane.f32.xlu2 %v5736_v9 }
 0x886   : > { %v2865_v31 = vpop.f32.mrf.mxu0 }
 0x887   : > { %v2899_v52 = vadd.f32 %v4418_v1, %v2865_v31  ;;  %v1690_v31 = vmul.f32 %v5421_v24, %v5525_v5 }
 0x889   : > { %v5741_v16 = vadd.f32 %v5717_v21, %v2899_v52 }
 0x88b   : > { %2936 = vadd.xlane.f32.xlu0 %v5741_v16 }
 0x88e   : > { %v2867_v55 = vpop.f32.mrf.mxu0 }
 0x88f   : > { %v2900_v3 = vadd.f32 %v4419_v19, %v2867_v55  ;;  %v5815_v55 = vsub.f32 %v5431_v12, %v1690_v31 }
 0x891   : > { %v5746_v0 = vadd.f32 %v5717_v21, %v2900_v3 }
 0x893   : > { %2938 = vadd.xlane.f32.xlu1 %v5746_v0 }
 0x896   : > { %v2870_v26 = vpop.f32.mrf.mxu0 }
 0x897   : > { %v2901_v63 = vadd.f32 %v4420_v10, %v2870_v26 }
 0x899   : > { %v5751_v57 = vadd.f32 %v5717_v21, %v2901_v63 }
 0x89b   : > { %2940 = vadd.xlane.f32.xlu2 %v5751_v57 }
 0x89e   : > { %v2872_v62 = vpop.f32.mrf.mxu0 }
 0x89f   : > { %v2902_v30 = vadd.f32 %v4421_v34, %v2872_v62 }
 0x8a1   : > { %v5756_v48 = vadd.f32 %v5717_v21, %v2902_v30 }
 0x8a3   : > { %2942 = vadd.xlane.f32.xlu0 %v5756_v48 }
 0x8a6   : > { %v2875_v32 = vpop.f32.mrf.mxu0 }
 0x8a7   : > { %v2903_v29 = vadd.f32 %v4422_v15, %v2875_v32 }
 0x8a9   : > { %v5761_v54 = vadd.f32 %v5717_v21, %v2903_v29 }
 0x8ab   : > { %2944 = vadd.xlane.f32.xlu1 %v5761_v54 }
 0x8ae   : > { %v2877_v53 = vpop.f32.mrf.mxu0 }
 0x8af   : > { %v2904_v23 = vadd.f32 %v4423_v61, %v2877_v53 }
 0x8b1   : > { %v5766_v49 = vadd.f32 %v5717_v21, %v2904_v23 }
 0x8b3   : > { %2946 = vadd.xlane.f32.xlu2 %v5766_v49 }
 0x8b6   : > { %v2880_v13 = vpop.f32.mrf.mxu0 }
 0x8b7   : > { %v2905_v22 = vadd.f32 %v4424_v37, %v2880_v13 }
 0x8b9   : > { %v5771_v45 = vadd.f32 %v5717_v21, %v2905_v22 }
 0x8bb   : > { %2948 = vadd.xlane.f32.xlu0 %v5771_v45 }
 0x8be   : > { %v2882_v38 = vpop.f32.mrf.mxu0 }
 0x8bf   : > { %v2906_v41 = vadd.f32 %v4425_v7, %v2882_v38 }
 0x8c1   : > { %v5776_v18 = vadd.f32 %v5717_v21, %v2906_v41 }
 0x8c3   : > { %2950 = vadd.xlane.f32.xlu1 %v5776_v18 }
 0x8c6   : > { %v2885_v11 = vpop.f32.mrf.mxu0 }
 0x8c7   : > { %v2907_v56 = vadd.f32 %v4426_v39, %v2885_v11 }
 0x8c9   : > { %v5781_v2 = vadd.f32 %v5717_v21, %v2907_v56 }
 0x8cb   : > { %2952 = vadd.xlane.f32.xlu2 %v5781_v2 }
 0x8ce   : > { %v2887_v47 = vpop.f32.mrf.mxu0 }
 0x8cf   : > { %v2908_v35 = vadd.f32 %v4427_v60, %v2887_v47 }
 0x8d1   : > { %v5786_v40 = vadd.f32 %v5717_v21, %v2908_v35 }
 0x8d3   : > { %2954 = vadd.xlane.f32.xlu0 %v5786_v40 }
 0x8d6   : > { %v2890_v17 = vpop.f32.mrf.mxu0 }
 0x8d7   : > { %v2909_v58 = vadd.f32 %v4428_v28, %v2890_v17 }
 0x8d9   : > { %v5793_v8 = vadd.f32 %v5717_v21, %v2909_v58 }
 0x8db   : > { %2956 = vadd.xlane.f32.xlu1 %v5793_v8 }
 0x8de   : > { %v2929_v36 = vpop.xlane.xlu2 %2928  ;;  %v2892_v33 = vpop.f32.mrf.mxu0 }
 0x8df   : > { %v2960_v46 = vmul.f32 %v2929_v36, %v5421_v24  ;;  %v2910_v44 = vadd.f32 %v4429_v59, %v2892_v33 }
 0x8e1   : > { %v5804_v1 = vsub.f32 %v5721_v4, %v2960_v46  ;;  %v5809_v52 = vadd.f32 %v5717_v21, %v2910_v44  ;;  %v1722_v21 = vmul.f32 %v5815_v55, %v5815_v55 }
 0x8e3   : > { %1751 = vadd.xlane.f32.xlu1 %v1721_v43  ;;  %2958 = vadd.xlane.f32.xlu2 %v5809_v52  ;;  %v2992_v6 = vmul.f32 %v5804_v1, %v5804_v1 }
 0x8e5   : > { %3008 = vadd.xlane.f32.xlu0 %v2992_v6 }
 0x8e6   : > { %v2931_v5 = vpop.xlane.xlu0 %2930 }
 0x8e7   : > { %v2961_v4 = vmul.f32 %v2931_v5, %v5421_v24 }
 0x8e9   : > { %v5819_v19 = vsub.f32 %v5726_v20, %v2961_v4 }
 0x8eb   : > { %1753 = vadd.xlane.f32.xlu2 %v1722_v21  ;;  %v2993_v3 = vmul.f32 %v5819_v19, %v5819_v19 }
 0x8ed   : > { %3010 = vadd.xlane.f32.xlu1 %v2993_v3 }
 0x8ee   : > { %v2933_v26 = vpop.xlane.xlu1 %2932 }
 0x8ef   : > { %v2962_v10 = vmul.f32 %v2933_v26, %v5421_v24 }
 0x8f1   : > { %v5827_v12 = vsub.f32 %v5731_v14, %v2962_v10 }
 0x8f3   : > { %v2994_v63 = vmul.f32 %v5827_v12, %v5827_v12 }
 0x8f5   : > { %3012 = vadd.xlane.f32.xlu2 %v2994_v63 }
 0x8f6   : > { %v2935_v20 = vpop.xlane.xlu2 %2934 }
 0x8f7   : > { %v2963_v62 = vmul.f32 %v2935_v20, %v5421_v24 }
 0x8f9   : > { %v5833_v34 = vsub.f32 %v5736_v9, %v2963_v62 }
 0x8fb   : > { %v2995_v30 = vmul.f32 %v5833_v34, %v5833_v34 }
 0x8fd   : > { %3014 = vadd.xlane.f32.xlu0 %v2995_v30 }
 0x8fe   : > { %v2937_v32 = vpop.xlane.xlu0 %2936 }
 0x8ff   : > { %v2964_v15 = vmul.f32 %v2937_v32, %v5421_v24 }
 0x901   : > { %v5839_v14 = vsub.f32 %v5741_v16, %v2964_v15 }
 0x903   : > { %v2996_v29 = vmul.f32 %v5839_v14, %v5839_v14 }
 0x905   : > { %3016 = vadd.xlane.f32.xlu1 %v2996_v29 }
 0x906   : > { %v2939_v53 = vpop.xlane.xlu1 %2938 }
 0x907   : > { %v2965_v61 = vmul.f32 %v2939_v53, %v5421_v24 }
 0x909   : > { %v5845_v9 = vsub.f32 %v5746_v0, %v2965_v61 }
 0x90b   : > { %v2997_v23 = vmul.f32 %v5845_v9, %v5845_v9 }
 0x90d   : > { %3018 = vadd.xlane.f32.xlu2 %v2997_v23 }
 0x90e   : > { %v2941_v13 = vpop.xlane.xlu2 %2940 }
 0x90f   : > { %v2966_v37 = vmul.f32 %v2941_v13, %v5421_v24 }
 0x911   : > { %v5851_v16 = vsub.f32 %v5751_v57, %v2966_v37 }
 0x913   : > { %v2998_v22 = vmul.f32 %v5851_v16, %v5851_v16 }
 0x915   : > { %3020 = vadd.xlane.f32.xlu0 %v2998_v22 }
 0x916   : > { %v2943_v38 = vpop.xlane.xlu0 %2942 }
 0x917   : > { %v2967_v7 = vmul.f32 %v2943_v38, %v5421_v24 }
 0x919   : > { %v5857_v0 = vsub.f32 %v5756_v48, %v2967_v7 }
 0x91b   : > { %v2999_v41 = vmul.f32 %v5857_v0, %v5857_v0 }
 0x91d   : > { %3022 = vadd.xlane.f32.xlu1 %v2999_v41 }
 0x91e   : > { %v2945_v11 = vpop.xlane.xlu1 %2944 }
 0x91f   : > { %v2968_v39 = vmul.f32 %v2945_v11, %v5421_v24 }
 0x921   : > { %v5863_v57 = vsub.f32 %v5761_v54, %v2968_v39 }
 0x923   : > { %v3000_v56 = vmul.f32 %v5863_v57, %v5863_v57 }
 0x925   : > { %3024 = vadd.xlane.f32.xlu2 %v3000_v56 }
 0x926   : > { %v2947_v47 = vpop.xlane.xlu2 %2946 }
 0x927   : > { %v2969_v60 = vmul.f32 %v2947_v47, %v5421_v24 }
 0x929   : > { %v5869_v48 = vsub.f32 %v5766_v49, %v2969_v60 }
 0x92b   : > { %v3001_v35 = vmul.f32 %v5869_v48, %v5869_v48 }
 0x92d   : > { %3026 = vadd.xlane.f32.xlu0 %v3001_v35 }
 0x92e   : > { %v2949_v17 = vpop.xlane.xlu0 %2948 }
 0x92f   : > { %v2970_v28 = vmul.f32 %v2949_v17, %v5421_v24 }
 0x931   : > { %v5875_v54 = vsub.f32 %v5771_v45, %v2970_v28 }
 0x933   : > { %v3002_v58 = vmul.f32 %v5875_v54, %v5875_v54 }
 0x935   : > { %3028 = vadd.xlane.f32.xlu1 %v3002_v58 }
 0x936   : > { %v2951_v42 = vpop.xlane.xlu1 %2950 }
 0x937   : > { %v2971_v36 = vmul.f32 %v2951_v42, %v5421_v24 }
 0x939   : > { %v5881_v49 = vsub.f32 %v5776_v18, %v2971_v36 }
 0x93b   : > { %v3003_v33 = vmul.f32 %v5881_v49, %v5881_v49 }
 0x93d   : > { %3030 = vadd.xlane.f32.xlu2 %v3003_v33 }
 0x93e   : > { %v2953_v46 = vpop.xlane.xlu2 %2952 }
 0x93f   : > { %v2972_v59 = vmul.f32 %v2953_v46, %v5421_v24  ;;  %v534_v46 = vld [vmem:[#allocation14 + $0x8] sm:$0xff] }
 0x941   : > { %v5887_v45 = vsub.f32 %v5781_v2, %v2972_v59 }
 0x943   : > { %v3004_v44 = vmul.f32 %v5887_v45, %v5887_v45 }
 0x945   : > { %3032 = vadd.xlane.f32.xlu0 %v3004_v44 }
 0x946   : > { %v2955_v31 = vpop.xlane.xlu0 %2954 }
 0x947   : > { %v2973_v43 = vmul.f32 %v2955_v31, %v5421_v24 }
 0x949   : > { %v5893_v18 = vsub.f32 %v5786_v40, %v2973_v43 }
 0x94b   : > { %v3005_v6 = vmul.f32 %v5893_v18, %v5893_v18 }
 0x94d   : > { %3034 = vadd.xlane.f32.xlu1 %v3005_v6  ;;  %v5918_v6 = vperm.slane %v5714_v25, 7 }
 0x94e   : > { %v2957_v5 = vpop.xlane.xlu1 %2956 }
 0x94f   : > { %v2974_v4 = vmul.f32 %v2957_v5, %v5421_v24 }
 0x951   : > { %v5899_v2 = vsub.f32 %v5793_v8, %v2974_v4 }
 0x953   : > { %v3006_v21 = vmul.f32 %v5899_v2, %v5899_v2 }
 0x955   : > { %3036 = vadd.xlane.f32.xlu2 %v3006_v21 }
 0x956   : > { %v1752_v3 = vpop.xlane.xlu1 %1751  ;;  %v2959_v26 = vpop.xlane.xlu2 %2958 }
 0x957   : > { %v1769_v10 = vmul.f32 %v1752_v3, %v5421_v24  ;;  %v2975_v40 = vmul.f32 %v2959_v26, %v5421_v24  ;;  %v5922_v26 = vperm.slane %v534_v46, 0 }
 0x958   : > { %v3009_v63 = vpop.xlane.xlu0 %3008 }
 0x959   : > { %v1785_v20 = vadd.f32 1e-05, %v1769_v10  ;;  %v5906_v62 = vsub.f32 %v5809_v52, %v2975_v40  ;;  %v3040_v30 = vmul.f32 %v3009_v63, %v5421_v24 }
 0x95b   : > { %4360 = vrsqrt.f32 %v1785_v20  ;;  %v3056_v8 = vadd.f32 1e-05, %v3040_v30  ;;  %v3007_v32 = vmul.f32 %v5906_v62, %v5906_v62  ;;  %vm1933_vm12 = vweird.f32 %v1785_v20 }
 0x95d   : > { %4362 = vrsqrt.f32 %v3056_v8  ;;  %3038 = vadd.xlane.f32.xlu0 %v3007_v32  ;;  %vm3078_vm15 = vweird.f32 %v3056_v8 }
 0x95e   : > { %v1754_v15 = vpop.xlane.xlu2 %1753 }
 0x95f   : > { %v1770_v29 = vmul.f32 %v1754_v15, %v5421_v24 }
 0x960   : > { %v3011_v53 = vpop.xlane.xlu1 %3010 }
 0x961   : > { %v4361_v61 = vpop.eup %4360  ;;  %v1786_v23 = vadd.f32 1e-05, %v1770_v29  ;;  %v3041_v13 = vmul.f32 %v3011_v53, %v5421_v24 }
 0x962   : > { %v1928_v37 = vmul.f32 %v4361_v61, %v1785_v20  ;;  %vm1934_vm11 = vweird.f32 %v4361_v61 }
 0x963   : > { %v4363_v52 = vpop.eup %4362  ;;  %4364 = vrsqrt.f32 %v1786_v23  ;;  %v3057_v22 = vadd.f32 1e-05, %v3041_v13  ;;  %vm1935_vm14 = vmor %vm1933_vm12, %vm1934_vm11  ;;  %vm1943_vm2 = vweird.f32 %v1786_v23 }
 0x964   : > { %v1929_v38 = vmul.f32 %v4361_v61, %v1928_v37  ;;  %v3073_v7 = vmul.f32 %v4363_v52, %v3056_v8  ;;  %vm3079_vm13 = vweird.f32 %v4363_v52 }
 0x965   : > { %4366 = vrsqrt.f32 %v3057_v22  ;;  %vm3080_vm0 = vmor %vm3078_vm15, %vm3079_vm13  ;;  %vm3088_vm5 = vweird.f32 %v3057_v22 }
 0x966   : > { %v1930_v41 = vmul.f32 0.5, %v1929_v38  ;;  %v3074_v11 = vmul.f32 %v4363_v52, %v3073_v7 }
 0x968   : > { %v1931_v39 = vsub.f32 1.5, %v1930_v41  ;;  %v3075_v56 = vmul.f32 0.5, %v3074_v11  ;;  %v3013_v47 = vpop.xlane.xlu2 %3012 }
 0x969   : > { %v4365_v60 = vpop.eup %4364  ;;  %v3042_v35 = vmul.f32 %v3013_v47, %v5421_v24 }
 0x96a   : > { %v1932_v17 = vmul.f32 %v4361_v61, %v1931_v39  ;;  %v3076_v28 = vsub.f32 1.5, %v3075_v56  ;;  %v1938_v58 = vmul.f32 %v4365_v60, %v1786_v23  ;;  %vm1944_vm1 = vweird.f32 %v4365_v60 }
 0x96b   : > { %v4367_v42 = vpop.eup %4366  ;;  %v5914_v36 = vadd.f32 1e-05, %v3042_v35  ;;  %vm1945_vm4 = vmor %vm1943_vm2, %vm1944_vm1 }
 0x96c   : > { %v1936_v33 = vsel %vm1935_vm14, %v4361_v61, %v1932_v17  ;;  %v3077_v59 = vmul.f32 %v4363_v52, %v3076_v28  ;;  %v1939_v44 = vmul.f32 %v4365_v60, %v1938_v58  ;;  %v3083_v31 = vmul.f32 %v4367_v42, %v3057_v22 }
 0x96d   : > { %v1961_v43 = vmul.f32 %v1936_v33, %v5797_v50  ;;  %4368 = vrsqrt.f32 %v5914_v36  ;;  %vm3089_vm3 = vweird.f32 %v4367_v42  ;;  %vm3098_vm8 = vweird.f32 %v5914_v36 }
 0x96e   : > { %v3081_v5 = vsel %vm3080_vm0, %v4363_v52, %v3077_v59  ;;  %v1940_v4 = vmul.f32 0.5, %v1939_v44  ;;  %v3084_v21 = vmul.f32 %v4367_v42, %v3083_v31  ;;  %vm3090_vm6 = vmor %vm3088_vm5, %vm3089_vm3 }
 0x96f   : > { %v1978_v3 = vmul.f32 %v5530_v27, %v1961_v43  ;;  %v3232_v10 = vmul.f32 %v3081_v5, %v5804_v1 }
 0x970   : > { %v1941_v40 = vsub.f32 1.5, %v1940_v4  ;;  %v3085_v50 = vmul.f32 0.5, %v3084_v21  ;;  %v3015_v25 = vpop.xlane.xlu0 %3014 }
 0x971   : > { %v1995_v63 = vadd.f32 %v5533_v51, %v1978_v3  ;;  %v3249_v20 = vmul.f32 %v5918_v6, %v3232_v10  ;;  %v3043_v30 = vmul.f32 %v3015_v25, %v5421_v24 }
 0x972   : > { %v1942_v8 = vmul.f32 %v4365_v60, %v1941_v40  ;;  %v3086_v32 = vsub.f32 1.5, %v3085_v50 }
 0x973   : > { %v4369_v1 = vpop.eup %4368  ;;  %2011 = vst [vmem:[%s5540_s21 + $0x70] sm:$0xff] %v1995_v63  ;;  %v3266_v15 = vadd.f32 %v5922_v26, %v3249_v20  ;;  %v5936_v29 = vadd.f32 1e-05, %v3043_v30 }
 0x974   : > { %v1946_v53 = vsel %vm1945_vm4, %v4365_v60, %v1942_v8  ;;  %v3087_v61 = vmul.f32 %v4367_v42, %v3086_v32  ;;  %v3093_v23 = vmul.f32 %v4369_v1, %v5914_v36  ;;  %vm3099_vm7 = vweird.f32 %v4369_v1 }
 0x975   : > { %3282 = vst [vmem:[%s5940_s9] sm:$0xff] %v3266_v15  ;;  %v1962_v13 = vmul.f32 %v1946_v53, %v5815_v55  ;;  %4370 = vrsqrt.f32 %v5936_v29 }
 0x976   : > { %v3091_v37 = vsel %vm3090_vm6, %v4367_v42, %v3087_v61  ;;  %v3094_v52 = vmul.f32 %v4369_v1, %v3093_v23 }
 0x977   : > { %v1979_v38 = vmul.f32 %v5530_v27, %v1962_v13  ;;  %v3233_v22 = vmul.f32 %v3091_v37, %v5819_v19 }
 0x978   : > { %v3095_v7 = vmul.f32 0.5, %v3094_v52  ;;  %v3017_v41 = vpop.xlane.xlu1 %3016 }
 0x979   : > { %v1996_v55 = vadd.f32 %v5533_v51, %v1979_v38  ;;  %v3250_v11 = vmul.f32 %v5918_v6, %v3233_v22  ;;  %v3044_v39 = vmul.f32 %v3017_v41, %v5421_v24 }
 0x97a   : > { %v3096_v56 = vsub.f32 1.5, %v3095_v7 }
 0x97b   : > { %v4371_v27 = vpop.eup %4370  ;;  %2012 = vst [vmem:[%s5540_s21 + $0x78] sm:$0xff] %v1996_v55  ;;  %v3267_v19 = vadd.f32 %v5922_v26, %v3250_v11  ;;  %v3060_v47 = vadd.f32 1e-05, %v3044_v39 }
 0x97c   : > { %v3097_v60 = vmul.f32 %v4369_v1, %v3096_v56  ;;  %v3103_v35 = vmul.f32 %v4371_v27, %v5936_v29 }
 0x97d   : > { %4697 = shalt.err (!%p4694_p4)
}
 0x97e   : > { %s4798_s17 = smov 128   ;;  %s4799_s19 = smov 8   ;;  %3283 = vst [vmem:[%s5940_s9 + $0x8] sm:$0xff] %v3267_v19  ;;  %vm3100_vm9 = vmor %vm3098_vm8, %vm3099_vm7  ;;  %4372 = vrsqrt.f32 %v3060_v47  ;;  %v3104_v17 = vmul.f32 %v4371_v27, %v3103_v35  ;;  %vm3109_vm10 = vweird.f32 %v4371_v27  ;;  %vm3108_vm11 = vweird.f32 %v5936_v29 }
 0x97f   : > { %4167 = dma.vmem_to_hbm [thread:$0]  (%p4919_p12), %s5948_s14, 2048, %s5950_s12, %s3299_s18, %s4798_s17, %s4798_s17, %s4799_s19   ;;  %v3101_v51 = vsel %vm3100_vm9, %v4369_v1, %v3097_v60  ;;  %vm3110_vm12 = vmor %vm3108_vm11, %vm3109_vm10  ;;  %vm3118_vm14 = vweird.f32 %v3060_v47 }
 0x980   : > { %v3234_v28 = vmul.f32 %v3101_v51, %v5827_v12  ;;  %v3105_v58 = vmul.f32 0.5, %v3104_v17  ;;  %v3019_v42 = vpop.xlane.xlu2 %3018  ;;  %s6135_s21 = sld [smem:[#allocation35_spill]]  ;;  %s3333_s23 = sshll.u32 %s5940_s9, 4  ;;  %s3334_s23 = int_to_ptr.vmem [resolvable:$true] %s3333_s23 }
 0x981   : > { %v3045_v46 = vmul.f32 %v3019_v42, %v5421_v24  ;;  %s3304_s14 = scalar_lea.sflag [#allocation19], %s5039_s24 }
 0x982   : > { %v3251_v33 = vmul.f32 %v5918_v6, %v3234_v28  ;;  %v3106_v59 = vsub.f32 1.5, %v3105_v58 }
 0x983   : > { %v3061_v43 = vadd.f32 1e-05, %v3045_v46 }
 0x984   : > { %v4373_v44 = vpop.eup %4372  ;;  %v3268_v31 = vadd.f32 %v5922_v26, %v3251_v33  ;;  %v3107_v36 = vmul.f32 %v4371_v27, %v3106_v59 }
 0x985   : > { %v3113_v5 = vmul.f32 %v4373_v44, %v3060_v47  ;;  %4374 = vrsqrt.f32 %v3061_v43  ;;  %vm3119_vm13 = vweird.f32 %v4373_v44  ;;  %vm3128_vm1 = vweird.f32 %v3061_v43 }
 0x986   : > { %3284 = vst [vmem:[%s5940_s9 + $0x10] sm:$0xff] %v3268_v31  ;;  %v3111_v12 = vsel %vm3110_vm12, %v4371_v27, %v3107_v36  ;;  %vm3120_vm15 = vmor %vm3118_vm14, %vm3119_vm13  ;;  %s3332_s29 = scalar_lea.hbm %s6135_s21, %s4012_s13  ;;  %s4718_s28 = scalar_lea.hbm %s6135_s21, 256 }
 0x987   : > { %v3114_v4 = vmul.f32 %v4373_v44, %v3113_v5  ;;  %v3235_v21 = vmul.f32 %v3111_v12, %v5833_v34  ;;  %s3335_s1 = sshll.u32 %s3332_s29, 4  ;;  %s3336_s1 = int_to_ptr.hbm [resolvable:$true] %s3335_s1 }
 0x988   : > { %v3021_v10 = vpop.xlane.xlu0 %3020  ;;  %s4712_s12 = sshra.s32 %s3336_s1, 4  ;;  %s4713_s12 = int_to_ptr.hbm [resolvable:$true] %s4712_s12 }
 0x989   : > { %v3115_v3 = vmul.f32 0.5, %v3114_v4  ;;  %v3252_v40 = vmul.f32 %v5918_v6, %v3235_v21  ;;  %v3046_v50 = vmul.f32 %v3021_v10, %v5421_v24  ;;  %s4714_s16 = scalar_lea.hbm %s4713_s12, 128  ;;  %p4719_p5 = scmp.lt.s32.totalorder %s4713_s12, %s6135_s21 }
 0x98a   : > { %p4715_p2 = scmp.ne.s32.totalorder %s4713_s12, %s4714_s16  ;;  %p4720_p0 = scmp.lt.s32.totalorder %s4718_s28, %s4714_s16 }
 0x98b   : > { %v3116_v25 = vsub.f32 1.5, %v3115_v3  ;;  %v4375_v63 = vpop.eup %4374  ;;  %v3269_v20 = vadd.f32 %v5922_v26, %v3252_v40  ;;  %v3062_v30 = vadd.f32 1e-05, %v3046_v50 }
 0x98c   : > { %v3123_v32 = vmul.f32 %v4375_v63, %v3061_v43  ;;  %vm3129_vm0 = vweird.f32 %v4375_v63  ;;  %p4716_p9 = pnand %p4715_p2, %p4919_p12  ;;  %p4721_p1 = por %p4720_p0, %p4719_p5 }
 0x98d   : > { %v3117_v8 = vmul.f32 %v4373_v44, %v3116_v25  ;;  %3285 = vst [vmem:[%s5940_s9 + $0x18] sm:$0xff] %v3269_v20  ;;  %4376 = vrsqrt.f32 %v3062_v30  ;;  %vm3130_vm2 = vmor %vm3128_vm1, %vm3129_vm0  ;;  %vm3138_vm4 = vweird.f32 %v3062_v30 }
 0x98e   : > { %v3124_v1 = vmul.f32 %v4375_v63, %v3123_v32  ;;  %p4717_p3 = pneg %p4716_p9 }
 0x98f   : > { %v3121_v34 = vsel %vm3120_vm15, %v4373_v44, %v3117_v8 }
 0x990   : > { %v3236_v15 = vmul.f32 %v3121_v34, %v5839_v14  ;;  %v3125_v29 = vmul.f32 0.5, %v3124_v1  ;;  %v3023_v53 = vpop.xlane.xlu1 %3022  ;;  %p4722_p8 = pnand %p4721_p1, %p4717_p3 }
 0x991   : > { %v3047_v23 = vmul.f32 %v3023_v53, %v5421_v24 }
 0x992   : > { %v3253_v61 = vmul.f32 %v5918_v6, %v3236_v15  ;;  %v3126_v13 = vsub.f32 1.5, %v3125_v29 }
 0x993   : > { %v4377_v37 = vpop.eup %4376  ;;  %v3063_v38 = vadd.f32 1e-05, %v3047_v23 }
 0x994   : > { %v3270_v52 = vadd.f32 %v5922_v26, %v3253_v61  ;;  %v3127_v22 = vmul.f32 %v4375_v63, %v3126_v13  ;;  %v3133_v7 = vmul.f32 %v4377_v37, %v3062_v30  ;;  %vm3139_vm3 = vweird.f32 %v4377_v37 }
 0x995   : > { %4378 = vrsqrt.f32 %v3063_v38  ;;  %vm3140_vm5 = vmor %vm3138_vm4, %vm3139_vm3  ;;  %vm3148_vm7 = vweird.f32 %v3063_v38 }
 0x996   : > { %3286 = vst [vmem:[%s5940_s9 + $0x20] sm:$0xff] %v3270_v52  ;;  %v3131_v14 = vsel %vm3130_vm2, %v4375_v63, %v3127_v22  ;;  %v3134_v41 = vmul.f32 %v4377_v37, %v3133_v7 }
 0x997   : > { %v3237_v55 = vmul.f32 %v3131_v14, %v5845_v9 }
 0x998   : > { %v3135_v11 = vmul.f32 0.5, %v3134_v41  ;;  %v3025_v39 = vpop.xlane.xlu2 %3024 }
 0x999   : > { %v3254_v56 = vmul.f32 %v5918_v6, %v3237_v55  ;;  %v3048_v27 = vmul.f32 %v3025_v39, %v5421_v24 }
 0x99a   : > { %v3136_v19 = vsub.f32 1.5, %v3135_v11 }
 0x99b   : > { %v4379_v47 = vpop.eup %4378  ;;  %v3271_v60 = vadd.f32 %v5922_v26, %v3254_v56  ;;  %v3064_v35 = vadd.f32 1e-05, %v3048_v27 }
 0x99c   : > { %v3137_v51 = vmul.f32 %v4377_v37, %v3136_v19  ;;  %v3143_v17 = vmul.f32 %v4379_v47, %v3063_v38  ;;  %vm3149_vm6 = vweird.f32 %v4379_v47 }
 0x99d   : > { %3287 = vst [vmem:[%s5940_s9 + $0x28] sm:$0xff] %v3271_v60  ;;  %4380 = vrsqrt.f32 %v3064_v35  ;;  %vm3150_vm8 = vmor %vm3148_vm7, %vm3149_vm6  ;;  %vm3158_vm10 = vweird.f32 %v3064_v35 }
 0x99e   : > { %v3141_v9 = vsel %vm3140_vm5, %v4377_v37, %v3137_v51  ;;  %v3144_v28 = vmul.f32 %v4379_v47, %v3143_v17 }
 0x99f   : > { %v3238_v58 = vmul.f32 %v3141_v9, %v5851_v16 }
 0x9a0   : > { %v3145_v42 = vmul.f32 0.5, %v3144_v28  ;;  %v3027_v33 = vpop.xlane.xlu0 %3026 }
 0x9a1   : > { %v3255_v46 = vmul.f32 %v5918_v6, %v3238_v58  ;;  %v3049_v59 = vmul.f32 %v3027_v33, %v5421_v24 }
 0x9a2   : > { %v3146_v44 = vsub.f32 1.5, %v3145_v42 }
 0x9a3   : > { %v4381_v31 = vpop.eup %4380  ;;  %v3272_v43 = vadd.f32 %v5922_v26, %v3255_v46  ;;  %v3065_v36 = vadd.f32 1e-05, %v3049_v59 }
 0x9a4   : > { %v3147_v5 = vmul.f32 %v4379_v47, %v3146_v44  ;;  %v3153_v12 = vmul.f32 %v4381_v31, %v3064_v35  ;;  %vm3159_vm9 = vweird.f32 %v4381_v31 }
 0x9a5   : > { %3288 = vst [vmem:[%s5940_s9 + $0x30] sm:$0xff] %v3272_v43  ;;  %4382 = vrsqrt.f32 %v3065_v36  ;;  %vm3160_vm11 = vmor %vm3158_vm10, %vm3159_vm9  ;;  %vm3168_vm13 = vweird.f32 %v3065_v36 }
 0x9a6   : > { %v3151_v16 = vsel %vm3150_vm8, %v4379_v47, %v3147_v5  ;;  %v3154_v4 = vmul.f32 %v4381_v31, %v3153_v12 }
 0x9a7   : > { %v3239_v21 = vmul.f32 %v3151_v16, %v5857_v0 }
 0x9a8   : > { %v3155_v3 = vmul.f32 0.5, %v3154_v4  ;;  %v3029_v10 = vpop.xlane.xlu1 %3028 }
 0x9a9   : > { %v3256_v40 = vmul.f32 %v5918_v6, %v3239_v21  ;;  %v3050_v50 = vmul.f32 %v3029_v10, %v5421_v24 }
 0x9aa   : > { %v3156_v25 = vsub.f32 1.5, %v3155_v3 }
 0x9ab   : > { %v4383_v63 = vpop.eup %4382  ;;  %v3273_v20 = vadd.f32 %v5922_v26, %v3256_v40  ;;  %v3066_v30 = vadd.f32 1e-05, %v3050_v50 }
 0x9ac   : > { %v3157_v8 = vmul.f32 %v4381_v31, %v3156_v25  ;;  %v3163_v32 = vmul.f32 %v4383_v63, %v3065_v36  ;;  %vm3169_vm12 = vweird.f32 %v4383_v63 }
 0x9ad   : > { %3289 = vst [vmem:[%s5940_s9 + $0x38] sm:$0xff] %v3273_v20  ;;  %4384 = vrsqrt.f32 %v3066_v30  ;;  %vm3170_vm14 = vmor %vm3168_vm13, %vm3169_vm12  ;;  %vm3178_vm0 = vweird.f32 %v3066_v30 }
 0x9ae   : > { %v3161_v0 = vsel %vm3160_vm11, %v4381_v31, %v3157_v8  ;;  %v3164_v34 = vmul.f32 %v4383_v63, %v3163_v32 }
 0x9af   : > { %v3240_v1 = vmul.f32 %v3161_v0, %v5863_v57 }
 0x9b0   : > { %v3165_v15 = vmul.f32 0.5, %v3164_v34  ;;  %v3031_v29 = vpop.xlane.xlu2 %3030 }
 0x9b1   : > { %v3257_v53 = vmul.f32 %v5918_v6, %v3240_v1  ;;  %v3051_v61 = vmul.f32 %v3031_v29, %v5421_v24 }
 0x9b2   : > { %v3166_v23 = vsub.f32 1.5, %v3165_v15 }
 0x9b3   : > { %v4385_v13 = vpop.eup %4384  ;;  %v3274_v37 = vadd.f32 %v5922_v26, %v3257_v53  ;;  %v3067_v52 = vadd.f32 1e-05, %v3051_v61 }
 0x9b4   : > { %v3167_v38 = vmul.f32 %v4383_v63, %v3166_v23  ;;  %v3173_v22 = vmul.f32 %v4385_v13, %v3066_v30  ;;  %vm3179_vm15 = vweird.f32 %v4385_v13 }
 0x9b5   : > { %3290 = vst [vmem:[%s5940_s9 + $0x40] sm:$0xff] %v3274_v37  ;;  %4386 = vrsqrt.f32 %v3067_v52  ;;  %vm3180_vm1 = vmor %vm3178_vm0, %vm3179_vm15  ;;  %vm3188_vm3 = vweird.f32 %v3067_v52 }
 0x9b6   : > { %v3171_v57 = vsel %vm3170_vm14, %v4383_v63, %v3167_v38  ;;  %v3174_v7 = vmul.f32 %v4385_v13, %v3173_v22 }
 0x9b7   : > { %v3241_v14 = vmul.f32 %v3171_v57, %v5869_v48 }
 0x9b8   : > { %v3175_v41 = vmul.f32 0.5, %v3174_v7  ;;  %v3033_v55 = vpop.xlane.xlu0 %3032 }
 0x9b9   : > { %v3258_v11 = vmul.f32 %v5918_v6, %v3241_v14  ;;  %v3052_v39 = vmul.f32 %v3033_v55, %v5421_v24 }
 0x9ba   : > { %v3176_v56 = vsub.f32 1.5, %v3175_v41 }
 0x9bb   : > { %v4387_v27 = vpop.eup %4386  ;;  %v3275_v19 = vadd.f32 %v5922_v26, %v3258_v11  ;;  %v3068_v47 = vadd.f32 1e-05, %v3052_v39 }
 0x9bc   : > { %v3177_v60 = vmul.f32 %v4385_v13, %v3176_v56  ;;  %v3183_v35 = vmul.f32 %v4387_v27, %v3067_v52  ;;  %vm3189_vm2 = vweird.f32 %v4387_v27 }
 0x9bd   : > { %3291 = vst [vmem:[%s5940_s9 + $0x48] sm:$0xff] %v3275_v19  ;;  %4388 = vrsqrt.f32 %v3068_v47  ;;  %vm3190_vm4 = vmor %vm3188_vm3, %vm3189_vm2  ;;  %vm3198_vm6 = vweird.f32 %v3068_v47 }
 0x9be   : > { %v3181_v48 = vsel %vm3180_vm1, %v4385_v13, %v3177_v60  ;;  %v3184_v51 = vmul.f32 %v4387_v27, %v3183_v35 }
 0x9bf   : > { %v3242_v17 = vmul.f32 %v3181_v48, %v5875_v54 }
 0x9c0   : > { %v3185_v9 = vmul.f32 0.5, %v3184_v51  ;;  %v3035_v28 = vpop.xlane.xlu1 %3034 }
 0x9c1   : > { %v3259_v58 = vmul.f32 %v5918_v6, %v3242_v17  ;;  %v3053_v42 = vmul.f32 %v3035_v28, %v5421_v24 }
 0x9c2   : > { %v3186_v33 = vsub.f32 1.5, %v3185_v9 }
 0x9c3   : > { %v4389_v46 = vpop.eup %4388  ;;  %v3276_v59 = vadd.f32 %v5922_v26, %v3259_v58  ;;  %v3069_v44 = vadd.f32 1e-05, %v3053_v42 }
 0x9c4   : > { %v3187_v31 = vmul.f32 %v4387_v27, %v3186_v33  ;;  %v3193_v43 = vmul.f32 %v4389_v46, %v3068_v47  ;;  %vm3199_vm5 = vweird.f32 %v4389_v46 }
 0x9c5   : > { %3292 = vst [vmem:[%s5940_s9 + $0x50] sm:$0xff] %v3276_v59  ;;  %4390 = vrsqrt.f32 %v3069_v44  ;;  %vm3200_vm7 = vmor %vm3198_vm6, %vm3199_vm5  ;;  %vm3208_vm9 = vweird.f32 %v3069_v44 }
 0x9c6   : > { %v3191_v54 = vsel %vm3190_vm4, %v4387_v27, %v3187_v31  ;;  %v3194_v36 = vmul.f32 %v4389_v46, %v3193_v43 }
 0x9c7   : > { %v3243_v5 = vmul.f32 %v3191_v54, %v5881_v49 }
 0x9c8   : > { %v3195_v12 = vmul.f32 0.5, %v3194_v36  ;;  %v3037_v16 = vpop.xlane.xlu2 %3036 }
 0x9c9   : > { %v3260_v4 = vmul.f32 %v5918_v6, %v3243_v5  ;;  %v3054_v21 = vmul.f32 %v3037_v16, %v5421_v24 }
 0x9ca   : > { %v3196_v3 = vsub.f32 1.5, %v3195_v12 }
 0x9cb   : > { %v4391_v10 = vpop.eup %4390  ;;  %v3277_v40 = vadd.f32 %v5922_v26, %v3260_v4  ;;  %v3070_v50 = vadd.f32 1e-05, %v3054_v21 }
 0x9cc   : > { %v3197_v25 = vmul.f32 %v4389_v46, %v3196_v3  ;;  %v3203_v63 = vmul.f32 %v4391_v10, %v3069_v44  ;;  %vm3209_vm8 = vweird.f32 %v4391_v10 }
 0x9cd   : > { %3293 = vst [vmem:[%s5940_s9 + $0x58] sm:$0xff] %v3277_v40  ;;  %4392 = vrsqrt.f32 %v3070_v50  ;;  %vm3210_vm10 = vmor %vm3208_vm9, %vm3209_vm8  ;;  %vm3218_vm12 = vweird.f32 %v3070_v50 }
 0x9ce   : > { %v3201_v49 = vsel %vm3200_vm7, %v4389_v46, %v3197_v25  ;;  %v3204_v20 = vmul.f32 %v4391_v10, %v3203_v63 }
 0x9cf   : > { %v3244_v30 = vmul.f32 %v3201_v49, %v5887_v45 }
 0x9d0   : > { %v3205_v8 = vmul.f32 0.5, %v3204_v20  ;;  %v3039_v32 = vpop.xlane.xlu0 %3038 }
 0x9d1   : > { %v3261_v0 = vmul.f32 %v5918_v6, %v3244_v30  ;;  %v3055_v34 = vmul.f32 %v3039_v32, %v5421_v24 }
 0x9d2   : > { %v3206_v1 = vsub.f32 1.5, %v3205_v8 }
 0x9d3   : > { %v4393_v15 = vpop.eup %4392  ;;  %v3278_v29 = vadd.f32 %v5922_v26, %v3261_v0  ;;  %v3071_v53 = vadd.f32 1e-05, %v3055_v34 }
 0x9d4   : > { %v3207_v61 = vmul.f32 %v4391_v10, %v3206_v1  ;;  %v3213_v23 = vmul.f32 %v4393_v15, %v3070_v50  ;;  %vm3219_vm11 = vweird.f32 %v4393_v15 }
 0x9d5   : > { %3294 = vst [vmem:[%s5940_s9 + $0x60] sm:$0xff] %v3278_v29  ;;  %4394 = vrsqrt.f32 %v3071_v53  ;;  %vm3220_vm13 = vmor %vm3218_vm12, %vm3219_vm11  ;;  %vm3228_vm15 = vweird.f32 %v3071_v53 }
 0x9d6   : > { %v3211_v45 = vsel %vm3210_vm10, %v4391_v10, %v3207_v61  ;;  %v3214_v13 = vmul.f32 %v4393_v15, %v3213_v23 }
 0x9d7   : > { %v3245_v37 = vmul.f32 %v3211_v45, %v5893_v18 }
 0x9d8   : > { %v3215_v52 = vmul.f32 0.5, %v3214_v13 }
 0x9d9   : > { %v3262_v24 = vmul.f32 %v5918_v6, %v3245_v37 }
 0x9da   : > { %v3216_v38 = vsub.f32 1.5, %v3215_v52 }
 0x9db   : > { %v4395_v22 = vpop.eup %4394  ;;  %v3279_v57 = vadd.f32 %v5922_v26, %v3262_v24 }
 0x9dc   : > { %v3217_v7 = vmul.f32 %v4393_v15, %v3216_v38  ;;  %v3223_v14 = vmul.f32 %v4395_v22, %v3071_v53  ;;  %vm3229_vm14 = vweird.f32 %v4395_v22 }
 0x9dd   : > { %3295 = vst [vmem:[%s5940_s9 + $0x68] sm:$0xff] %v3279_v57  ;;  %vm3230_vm0 = vmor %vm3228_vm15, %vm3229_vm14 }
 0x9de   : > { %v3221_v41 = vsel %vm3220_vm13, %v4393_v15, %v3217_v7  ;;  %v3224_v55 = vmul.f32 %v4395_v22, %v3223_v14 }
 0x9df   : > { %v3246_v18 = vmul.f32 %v3221_v41, %v5899_v2 }
 0x9e0   : > { %v3225_v11 = vmul.f32 0.5, %v3224_v55 }
 0x9e1   : > { %v3263_v39 = vmul.f32 %v5918_v6, %v3246_v18 }
 0x9e2   : > { %v3226_v56 = vsub.f32 1.5, %v3225_v11 }
 0x9e3   : > { %v3280_v27 = vadd.f32 %v5922_v26, %v3263_v39 }
 0x9e4   : > { %v3227_v19 = vmul.f32 %v4395_v22, %v3226_v56 }
 0x9e5   : > { %3296 = vst [vmem:[%s5940_s9 + $0x70] sm:$0xff] %v3280_v27 }
 0x9e6   : > { %v3231_v2 = vsel %vm3230_vm0, %v4395_v22, %v3227_v19 }
 0x9e7   : > { %v3247_v47 = vmul.f32 %v3231_v2, %v5906_v62 }
 0x9e9   : > { %v3264_v60 = vmul.f32 %v5918_v6, %v3247_v47 }
 0x9eb   : > { %v3281_v35 = vadd.f32 %v5922_v26, %v3264_v60 }
 0x9ed   : > { %3297 = vst [vmem:[%s5940_s9 + $0x78] sm:$0xff] %v3281_v35 }
 0x9ee   : > { %4725 = shalt.err (!%p4722_p8)
}
 0x9ef   : > { %4168 = dma.vmem_to_hbm [thread:$0]  (%p4919_p12), %s3334_s23, 2048, %s3336_s1, %s3304_s14, %s4798_s17, %s4798_s17, %s4799_s19  }
 0x9f0 PF: > { %s6136_s24 = sld [smem:[#allocation27_spill]] }
 0x9f1   : > { %s6138_s20 = sld [smem:[#allocation28_spill]] }
 0x9f6   : > { %s3350_s26 = sand.u32 1, %s6136_s24  }
 0x9f7   : > { %p6139_p10 = scmp.ge.s32.totalorder %s6138_s20, 2  ;;  %s3351_s22 = scalar_lea.sflag [#allocation5], %s3350_s26 }
 0x9f9   : > { %p4198_p7 = pnand %p6139_p10, %p4937_p6 }
 0x9fb   : > { %p4199_p11 = pneg %p4198_p7 }
 0x9fd   : > { %4763 = dma.done.wait (%p4199_p11), %s3351_s22, 2048  }
 0x9fe   : > { %4765 = vsyncadd (%p4199_p11), %s3351_s22, 4294965248  ;;  %s3361_s5 = scalar_lea.sflag [#allocation19], %s3350_s26 }
 0x9ff   : > { %4767 = dma.done.wait (%p4199_p11), %s3361_s5, 2048  }
 0xa00   : > { %4769 = vsyncadd (%p4199_p11), %s3361_s5, 4294965248  ;;  %s6140_s12 = sld [smem:[#allocation29_spill]]  ;;  %s6142_s30 = smov %s4776_s10 }
 0xa01   : > { %s6141_s15 = sld [smem:[#allocation30_spill]]  ;;  %s6143_s10 = smov %s4780_s11 }
 0xa06   : > { %p32_p12 = scmp.ge.s32.totalorder %s6140_s12, 4  }
 0xa07   : > { %s6144_s11 = smov %s6141_s15 }
 0xa08   :  { %34 = sbr.rel (!%p32_p12) target bundleno = 17 (0x11), region = 158 }
 0xa0d   :  { %3367 = vsyncpa [#allocation4], 1 }
 0xa0e   :  { %3369 = vsyncpa [#allocation4 + $0x1], 1 }
 0xa0f   :  { %3370 = vsyncpa [#allocation7], 1 }
 0xa10   :  { %3372 = vsyncpa [#allocation7 + $0x1], 1 }
 0xa11   :  { %3373 = vsyncpa [#allocation10], 1 }
 0xa12   :  { %3374 = vsyncpa [#allocation13], 1 }
 0xa13   :  { %3375 = vsyncpa [#allocation16], 1 }
 0xa14   :  { %3376 = vsyncpa [#allocation5], 1 }
 0xa15   :  { %3378 = vsyncpa [#allocation5 + $0x1], 1 }
 0xa16   :  { %3379 = vsyncpa [#allocation19], 1 }
 0xa17   :  { %3381 = vsyncpa [#allocation19 + $0x1], 1 }

</bundles_post_ra>
